<compile_context>
chip_gen: v6e
topology: v6e:2x2x1
jax: 0.10.0
libtpu: 0.0.40
codegen_flags: <defaults>
</compile_context>

<pallas_src>
import functools
import math

import jax
import jax.numpy as jnp
from jax.experimental import pallas as pl
from jax.experimental.pallas import tpu as pltpu  # noqa: F401  (TPU backend)

_BN_EPS = 1e-5


# ---------------------------------------------------------------------------
# Pallas kernels (single block: every ref holds its whole array in VMEM)
# ---------------------------------------------------------------------------
def _bn_relu(y, g, be, count):
    """Training-mode BatchNorm over rows (per-column stats) + ReLU, in f32."""
    inv_n = 1.0 / count
    mean = jnp.sum(y, axis=0, keepdims=True) * inv_n
    d = y - mean
    var = jnp.sum(d * d, axis=0, keepdims=True) * inv_n   # centered: stable
    scale = g * jax.lax.rsqrt(var + _BN_EPS)               # (1, C): cheap row op
    return jnp.maximum(d * scale + be, 0.0)


def _conv_bn_relu_kernel(a_ref, w_ref, g_ref, be_ref, o_ref, *, count):
    """im2col matmul (bf16 in, f32 acc) + BatchNorm + ReLU, channels-last.

    Conv bias is omitted: a per-channel constant is exactly absorbed by the
    BatchNorm batch mean and does not change the variance.
    """
    y = jnp.dot(a_ref[...], w_ref[...], preferred_element_type=jnp.float32)
    o_ref[...] = _bn_relu(y, g_ref[...], be_ref[...], count).astype(o_ref.dtype)


def _conv_sigmoid_kernel(a_ref, w_ref, b_ref, o_ref, *, single_channel):
    """Final ConvTranspose (as matmul) + bias + sigmoid (bias kept: no BN)."""
    if single_channel:
        # Cout == 1: a lane reduce on the VPU beats a degenerate N=1 matmul.
        a = a_ref[...].astype(jnp.float32)
        y = jnp.sum(a * w_ref[...], axis=1, keepdims=True) + b_ref[...]
    else:
        y = jnp.dot(a_ref[...], w_ref[...], preferred_element_type=jnp.float32)
        y = y + b_ref[...]
    o_ref[...] = 1.0 / (1.0 + jnp.exp(-y))


def _stem_c1_kernel(x_ref, m_ref, is_ref, w_ref, g_ref, be_ref, o_ref, *, count):
    """(x-mean)*inv_std -> 1x1 conv (Cin=Cout=1: scale) -> BN -> ReLU.

    Layout (N, Hp*Wp): lane-dense; the single BN channel's statistics are over
    every element.  The conv bias is dropped (absorbed by the BN batch mean).
    """
    inv_n = 1.0 / count
    xn = (x_ref[...] - m_ref[...]) * is_ref[...]
    y = xn * w_ref[...]
    ssum = jnp.sum(jnp.sum(y, axis=1, keepdims=True), axis=0, keepdims=True)
    mean = ssum * inv_n
    d = y - mean
    var = jnp.sum(jnp.sum(d * d, axis=1, keepdims=True), axis=0,
                  keepdims=True) * inv_n
    yn = d * (g_ref[...] * jax.lax.rsqrt(var + _BN_EPS)) + be_ref[...]
    o_ref[...] = jnp.maximum(yn, 0.0).astype(o_ref.dtype)


def _norm_kernel(x_ref, m_ref, is_ref, o_ref):
    o_ref[...] = ((x_ref[...] - m_ref[...]) * is_ref[...]).astype(o_ref.dtype)


def _kern_module_kernel(x_ref, w1_ref, g1_ref, be1_ref,
                        w2_ref, g2_ref, be2_ref, o_ref, *, count):
    """Bottleneck MLP: 2 x (Linear -> BatchNorm1d -> ReLU), fully fused.

    Linear biases dropped (absorbed by the following BatchNorm1d batch mean).
    """
    y = jnp.dot(x_ref[...], w1_ref[...], preferred_element_type=jnp.float32)
    y = _bn_relu(y, g1_ref[...], be1_ref[...], count)
    y = jnp.dot(y.astype(jnp.bfloat16), w2_ref[...],
                preferred_element_type=jnp.float32)
    y = _bn_relu(y, g2_ref[...], be2_ref[...], count)
    o_ref[...] = y.astype(o_ref.dtype)


def _max4_kernel(a_ref, b_ref, c_ref, d_ref, o_ref):
    o_ref[...] = jnp.maximum(jnp.maximum(a_ref[...], b_ref[...]),
                             jnp.maximum(c_ref[...], d_ref[...]))


# ---------------------------------------------------------------------------
# Layer wrappers (single-block pallas_calls + minimal layout glue)
# ---------------------------------------------------------------------------
def _im2col(y, n, h, w, kh, kw, pad):
    """Channels-last im2col: (n*h*w, c) slab -> (n*ho*wo, kh*kw*c) A matrix."""
    c = y.shape[1]
    ph, pw = pad
    x4 = y.reshape(n, h, w, c)
    if ph or pw:
        x4 = jnp.pad(x4, ((0, 0), (ph, ph), (pw, pw), (0, 0)))
    ho = h + 2 * ph - kh + 1
    wo = w + 2 * pw - kw + 1
    if kh == 1 and kw == 1:
        a = x4.reshape(n * ho * wo, c)
    else:
        cols = [x4[:, i:i + ho, j:j + wo, :] for i in range(kh) for j in range(kw)]
        a = jnp.concatenate(cols, axis=-1).reshape(n * ho * wo, kh * kw * c)
    return a, ho, wo


def conv_bn_relu(y, n, h, w, arr, m):
    a, ho, wo = _im2col(y, n, h, w, m["kh"], m["kw"], m["pad"])
    rows = n * ho * wo
    out = pl.pallas_call(
        functools.partial(_conv_bn_relu_kernel, count=float(rows)),
        out_shape=jax.ShapeDtypeStruct((rows, m["cout"]), jnp.bfloat16),
    )(a.astype(jnp.bfloat16), arr["wm"], arr["g"], arr["be"])
    return out, ho, wo


def conv_sigmoid(y, n, h, w, arr, m):
    a, ho, wo = _im2col(y, n, h, w, m["kh"], m["kw"], m["pad"])
    rows = n * ho * wo
    out = pl.pallas_call(
        functools.partial(_conv_sigmoid_kernel, single_channel=(m["cout"] == 1)),
        out_shape=jax.ShapeDtypeStruct((rows, m["cout"]), jnp.float32),
    )(a.astype(jnp.bfloat16), arr["wm"], arr["b"])
    return out, ho, wo


def maxpool2(y, n, h, w):
    """2x2 / stride-2 max pool on the channels-last slab (single Pallas call)."""
    c = y.shape[1]
    ho, wo = h // 2, w // 2
    x4 = y.reshape(n, h, w, c)[:, :2 * ho, :2 * wo, :]
    views = [x4[:, 0::2, 0::2, :], x4[:, 0::2, 1::2, :],
             x4[:, 1::2, 0::2, :], x4[:, 1::2, 1::2, :]]
    out = pl.pallas_call(
        _max4_kernel,
        out_shape=jax.ShapeDtypeStruct((n * ho * wo, c), y.dtype),
    )(*[v.reshape(n * ho * wo, c) for v in views])
    return out, ho, wo


def upsample2(y, n, h, w):
    # UpsamplingNearest2d(scale_factor=2): pure replication (layout glue).
    c = y.shape[1]
    y4 = y.reshape(n, h, w, c)
    y4 = jnp.repeat(jnp.repeat(y4, 2, axis=1), 2, axis=2)
    return y4.reshape(n * 4 * h * w, c), 2 * h, 2 * w


def stem_c1(x_nchw, arr, meta):
    """imsize[0] == 1: fused input-norm + 1x1 conv + BN + ReLU (one kernel)."""
    n, _, h, w = x_nchw.shape
    ph, pw = meta["pow_pad"]
    hp, wp = h + 2 * ph, w + 2 * pw
    x2 = x_nchw.reshape(n, h, w)
    if ph or pw:
        x2 = jnp.pad(x2, ((0, 0), (ph, ph), (pw, pw)))
    x2 = x2.reshape(n, hp * wp).astype(jnp.float32)
    out = pl.pallas_call(
        functools.partial(_stem_c1_kernel, count=float(n * hp * wp)),
        out_shape=jax.ShapeDtypeStruct((n, hp * wp), jnp.bfloat16),
    )(x2, arr["mean2"], arr["istd2"], arr["w"], arr["g"], arr["be"])
    return out.reshape(n * hp * wp, 1), hp, wp


def stem_general(x_nchw, A, meta):
    """imsize[0] > 1: normalize (channels-last), then conv1 via the fused path."""
    n, c, h, w = x_nchw.shape
    x2 = jnp.transpose(x_nchw, (0, 2, 3, 1)).reshape(n * h * w, c)
    m2 = jnp.tile(A["stem"]["mean2"], (n, 1))
    s2 = jnp.tile(A["stem"]["istd2"], (n, 1))
    xn = pl.pallas_call(
        _norm_kernel,
        out_shape=jax.ShapeDtypeStruct((n * h * w, c), jnp.bfloat16),
    )(x2.astype(jnp.float32), m2, s2)
    return conv_bn_relu(xn, n, h, w, A["conv1"], meta["conv1"])


def kern_module(y, n, h, w, arr):
    c = y.shape[1]
    ksz = c * h * w
    # PyTorch flattens NCHW -> (N, C*h*w): reorder our (n*h*w, c) slab to match.
    x = y.reshape(n, h, w, c).transpose(0, 3, 1, 2).reshape(n, ksz)
    out = pl.pallas_call(
        functools.partial(_kern_module_kernel, count=float(n)),
        out_shape=jax.ShapeDtypeStruct((n, ksz), jnp.bfloat16),
    )(x.astype(jnp.bfloat16), arr["w1"], arr["g1"], arr["be1"],
      arr["w2"], arr["g2"], arr["be2"])
    return out.reshape(n, c, h, w).transpose(0, 2, 3, 1).reshape(n * h * w, c)


# ---------------------------------------------------------------------------
# Full forward pass
# ---------------------------------------------------------------------------
def convnet_forward(x, A, *, meta):
    n = x.shape[0]
    if meta["c1_stem"]:
        y, h, w = stem_c1(x, A["stem"], meta)
    else:
        y, h, w = stem_general(x, A, meta)

    for name in ("conv2", "conv3", "conv4", "conv5"):           # encoder
        y, h, w = conv_bn_relu(y, n, h, w, A[name], meta[name])
        y, h, w = maxpool2(y, n, h, w)

    y = kern_module(y, n, h, w, A["kern"])                      # bottleneck MLP

    for name in ("tconv1", "tconv2", "tconv3"):                 # decoder
        y, h, w = upsample2(y, n, h, w)
        y, h, w = conv_bn_relu(y, n, h, w, A[name], meta[name])

    y, h, w = upsample2(y, n, h, w)
    y, h, w = conv_sigmoid(y, n, h, w, A["tconv4"], meta["tconv4"])

    oh, ow = meta["out_hw"]
    out = y.reshape(n, h, w, meta["tconv4"]["cout"]).transpose(0, 3, 1, 2)
    return out[:, :, :oh, :ow]


# ---------------------------------------------------------------------------
# Parameters: PyTorch-style init + one-time conversion to kernel layout
# ---------------------------------------------------------------------------
def init_params(key, imsize=(1, 16, 16), s=8):
    C, H, W = imsize
    pow_pad = (2 ** int(math.ceil(math.log2(H))) - H,
               2 ** int(math.ceil(math.log2(W))) - W)
    kern_size = 4 * ((H + pow_pad[0]) // 16) * ((W + pow_pad[1]) // 16) * s

    keys = iter(jax.random.split(key, 64))
    rnd = lambda shape, sc=0.1: jax.random.normal(next(keys), shape, jnp.float32) * sc
    zeros = lambda n: jnp.zeros((n,), jnp.float32)
    ones = lambda n: jnp.ones((n,), jnp.float32)

    # Biases are kept in the parameter dict (mirrors the PyTorch module) but,
    # for every layer that is immediately followed by BatchNorm, they cancel
    # exactly in the training-mode batch statistics and are not used by the
    # kernels.
    P = {
        "mean": jnp.zeros((C, H, W), jnp.float32),
        "std": jnp.ones((C, H, W), jnp.float32),
        # encoder
        "conv1_w": rnd((C, C, 1, 1)), "conv1_b": rnd((C,), 0.05),
        "bn1_g": ones(C), "bn1_b": zeros(C),
        "conv2_w": rnd((s, C, 5, 5)), "conv2_b": rnd((s,), 0.05),
        "bn2_g": ones(s), "bn2_b": zeros(s),
        "conv3_w": rnd((2 * s, s, 3, 3)), "conv3_b": rnd((2 * s,), 0.05),
        "bn3_g": ones(2 * s), "bn3_b": zeros(2 * s),
        "conv4_w": rnd((4 * s, 2 * s, 3, 3)), "conv4_b": rnd((4 * s,), 0.05),
        "bn4_g": ones(4 * s), "bn4_b": zeros(4 * s),
        "conv5_w": rnd((4 * s, 4 * s, 3, 3)), "conv5_b": rnd((4 * s,), 0.05),
        "bn5_g": ones(4 * s), "bn5_b": zeros(4 * s),
        # KernModule (Linear weights stored PyTorch-style: (out, in))
        "lin1_w": rnd((kern_size, kern_size)), "lin1_b": rnd((kern_size,), 0.05),
        "bnl1_g": ones(kern_size), "bnl1_b": zeros(kern_size),
        "lin2_w": rnd((kern_size, kern_size)), "lin2_b": rnd((kern_size,), 0.05),
        "bnl2_g": ones(kern_size), "bnl2_b": zeros(kern_size),
        # decoder (ConvTranspose weights stored PyTorch-style: (Cin, Cout, k, k))
        "tconv1_w": rnd((4 * s, 4 * s, 3, 3)), "tconv1_b": rnd((4 * s,), 0.05),
        "bn6_g": ones(4 * s), "bn6_b": zeros(4 * s),
        "tconv2_w": rnd((4 * s, 2 * s, 3, 3)), "tconv2_b": rnd((2 * s,), 0.05),
        "bn7_g": ones(2 * s), "bn7_b": zeros(2 * s),
        "tconv3_w": rnd((2 * s, s, 3, 3)), "tconv3_b": rnd((s,), 0.05),
        "bn8_g": ones(s), "bn8_b": zeros(s),
        "tconv4_w": rnd((s, C, 5, 5)), "tconv4_b": rnd((C,), 0.05),
    }
    return P, pow_pad, kern_size


def _conv_entry(w, g, be, pad):
    cout, cin, kh, kw = (int(d) for d in w.shape)
    wm = jnp.transpose(w, (2, 3, 1, 0)).reshape(kh * kw * cin, cout)
    arr = dict(wm=wm.astype(jnp.bfloat16),
               g=g.reshape(1, cout).astype(jnp.float32),
               be=be.reshape(1, cout).astype(jnp.float32))
    meta = dict(kh=kh, kw=kw, cin=cin, cout=cout, pad=(int(pad[0]), int(pad[1])))
    return arr, meta


def _tconv_entry(w_t, g, be, pad):
    # ConvTranspose2d(stride=1, padding=p) == Conv2d(flipped, ch-swapped, pad=k-1-p)
    kh, kw = int(w_t.shape[2]), int(w_t.shape[3])
    w_eq = jnp.transpose(jnp.flip(w_t, axis=(2, 3)), (1, 0, 2, 3))
    return _conv_entry(w_eq, g, be, (kh - 1 - pad[0], kw - 1 - pad[1]))


def _tconv_out_entry(w_t, b, pad):
    cin, cout, kh, kw = (int(d) for d in w_t.shape)
    w_eq = jnp.transpose(jnp.flip(w_t, axis=(2, 3)), (1, 0, 2, 3))
    wm = jnp.transpose(w_eq, (2, 3, 1, 0)).reshape(kh * kw * cin, cout)
    if cout == 1:
        arr = dict(wm=jnp.transpose(wm).astype(jnp.float32),   # (1, K) for VPU reduce
                   b=b.reshape(1, 1).astype(jnp.float32))
    else:
        arr = dict(wm=wm.astype(jnp.bfloat16),
                   b=b.reshape(1, cout).astype(jnp.float32))
    meta = dict(kh=kh, kw=kw, cin=cin, cout=cout,
                pad=(kh - 1 - pad[0], kw - 1 - pad[1]))
    return arr, meta


def prepare_params(P, imsize, pow_pad, out_hw):
    """One-time conversion of PyTorch-style params to kernel (matmul) layout."""
    c, h, w = imsize
    ph, pw = int(pow_pad[0]), int(pow_pad[1])
    A = {}
    meta = {"pow_pad": (ph, pw), "out_hw": (int(out_hw[0]), int(out_hw[1])),
            "c1_stem": c == 1}

    if c == 1:
        mean_p = jnp.pad(P["mean"].reshape(h, w), ((ph, ph), (pw, pw)))
        istd_p = jnp.pad(1.0 / P["std"].reshape(h, w), ((ph, ph), (pw, pw)),
                         constant_values=1.0)
        A["stem"] = dict(mean2=mean_p.reshape(1, -1).astype(jnp.float32),
                         istd2=istd_p.reshape(1, -1).astype(jnp.float32),
                         w=P["conv1_w"].reshape(1, 1).astype(jnp.float32),
                         g=P["bn1_g"].reshape(1, 1).astype(jnp.float32),
                         be=P["bn1_b"].reshape(1, 1).astype(jnp.float32))
    else:
        A["stem"] = dict(
            mean2=jnp.transpose(P["mean"], (1, 2, 0)).reshape(h * w, c).astype(jnp.float32),
            istd2=(1.0 / jnp.transpose(P["std"], (1, 2, 0)).reshape(h * w, c)).astype(jnp.float32))
        A["conv1"], meta["conv1"] = _conv_entry(
            P["conv1_w"], P["bn1_g"], P["bn1_b"], (ph, pw))

    for name, bn, pad in (("conv2", "bn2", (2, 2)), ("conv3", "bn3", (1, 1)),
                          ("conv4", "bn4", (1, 1)), ("conv5", "bn5", (1, 1))):
        A[name], meta[name] = _conv_entry(P[name + "_w"],
                                          P[bn + "_g"], P[bn + "_b"], pad)

    for name, bn, pad in (("tconv1", "bn6", (1, 1)), ("tconv2", "bn7", (1, 1)),
                          ("tconv3", "bn8", (1, 1))):
        A[name], meta[name] = _tconv_entry(P[name + "_w"],
                                           P[bn + "_g"], P[bn + "_b"], pad)

    A["tconv4"], meta["tconv4"] = _tconv_out_entry(P["tconv4_w"], P["tconv4_b"],
                                                   (2, 2))

    ksz = int(P["lin1_w"].shape[0])
    A["kern"] = dict(w1=jnp.transpose(P["lin1_w"]).astype(jnp.bfloat16),
                     g1=P["bnl1_g"].reshape(1, ksz).astype(jnp.float32),
                     be1=P["bnl1_b"].reshape(1, ksz).astype(jnp.float32),
                     w2=jnp.transpose(P["lin2_w"]).astype(jnp.bfloat16),
                     g2=P["bnl2_g"].reshape(1, ksz).astype(jnp.float32),
                     be2=P["bnl2_b"].reshape(1, ksz).astype(jnp.float32))
    return A, meta


if __name__ == "__main__":
    imsize = (1, 16, 16)   # (C, H, W): power-of-two spatial -> pow_pad = (0, 0)
    s = 8
    batch = 2

    key = jax.random.PRNGKey(0)
    kp, kx = jax.random.split(key)
    P, pow_pad, kern_size = init_params(kp, imsize=imsize, s=s)
    A, meta = prepare_params(P, imsize=imsize, pow_pad=pow_pad,
                             out_hw=(imsize[1], imsize[2]))

    x = jax.random.uniform(kx, (batch,) + imsize, jnp.float32)

    fwd = jax.jit(functools.partial(convnet_forward, meta=meta))
    out = jax.block_until_ready(fwd(x, A))

    assert out.shape == (batch, imsize[0], imsize[1], imsize[2]), out.shape
    assert bool(jnp.all(jnp.isfinite(out)))
    assert bool(jnp.all((out >= 0.0) & (out <= 1.0)))   # sigmoid output range
    print("KERNEL_OK")
</pallas_src>

<mosaic_0001>
module attributes {stable_mosaic.version = 11 : i64} {
  func.func @_stem_c1_kernel(%arg0: memref<2x256xf32, #tpu.memory_space<vmem>>, %arg1: memref<1x256xf32, #tpu.memory_space<vmem>>, %arg2: memref<1x256xf32, #tpu.memory_space<vmem>>, %arg3: memref<1x1xf32, #tpu.memory_space<vmem>>, %arg4: memref<1x1xf32, #tpu.memory_space<vmem>>, %arg5: memref<1x1xf32, #tpu.memory_space<vmem>>, %arg6: memref<2x256xbf16, #tpu.memory_space<vmem>>) attributes {dimension_semantics = [], scalar_prefetch = 0 : i64, scratch_operands = 0 : i64, tpu.core_type = #tpu.core_type<tc>} {
    %c0 = arith.constant 0 : index
    %c0_0 = arith.constant 0 : index
    %0 = vector.load %arg0[%c0, %c0_0] : memref<2x256xf32, #tpu.memory_space<vmem>>, vector<2x256xf32>
    %c0_1 = arith.constant 0 : index
    %c0_2 = arith.constant 0 : index
    %1 = vector.load %arg1[%c0_1, %c0_2] : memref<1x256xf32, #tpu.memory_space<vmem>>, vector<1x256xf32>
    %2 = vector.broadcast %1 : vector<1x256xf32> to vector<2x256xf32>
    %3 = arith.subf %0, %2 : vector<2x256xf32>
    %c0_3 = arith.constant 0 : index
    %c0_4 = arith.constant 0 : index
    %4 = vector.load %arg2[%c0_3, %c0_4] : memref<1x256xf32, #tpu.memory_space<vmem>>, vector<1x256xf32>
    %5 = vector.broadcast %4 : vector<1x256xf32> to vector<2x256xf32>
    %6 = arith.mulf %3, %5 : vector<2x256xf32>
    %c0_5 = arith.constant 0 : index
    %c0_6 = arith.constant 0 : index
    %7 = vector.load %arg3[%c0_5, %c0_6] : memref<1x1xf32, #tpu.memory_space<vmem>>, vector<1x1xf32>
    %8 = vector.broadcast %7 : vector<1x1xf32> to vector<2x256xf32>
    %9 = arith.mulf %6, %8 : vector<2x256xf32>
    %cst = arith.constant dense<0.000000e+00> : vector<2xf32>
    %10 = vector.multi_reduction <add>, %9, %cst [1] : vector<2x256xf32> to vector<2xf32>
    %11 = vector.shape_cast %10 : vector<2xf32> to vector<2x1xf32>
    %cst_7 = arith.constant dense<0.000000e+00> : vector<1xf32>
    %12 = vector.multi_reduction <add>, %11, %cst_7 [0] : vector<2x1xf32> to vector<1xf32>
    %13 = vector.shape_cast %12 : vector<1xf32> to vector<1x1xf32>
    %cst_8 = arith.constant 0.001953125 : f32
    %14 = vector.broadcast %cst_8 : f32 to vector<1x1xf32>
    %15 = arith.mulf %13, %14 : vector<1x1xf32>
    %16 = vector.broadcast %15 : vector<1x1xf32> to vector<2x256xf32>
    %17 = arith.subf %9, %16 : vector<2x256xf32>
    %18 = arith.mulf %17, %17 : vector<2x256xf32>
    %cst_9 = arith.constant dense<0.000000e+00> : vector<2xf32>
    %19 = vector.multi_reduction <add>, %18, %cst_9 [1] : vector<2x256xf32> to vector<2xf32>
    %20 = vector.shape_cast %19 : vector<2xf32> to vector<2x1xf32>
    %cst_10 = arith.constant dense<0.000000e+00> : vector<1xf32>
    %21 = vector.multi_reduction <add>, %20, %cst_10 [0] : vector<2x1xf32> to vector<1xf32>
    %22 = vector.shape_cast %21 : vector<1xf32> to vector<1x1xf32>
    %cst_11 = arith.constant 0.001953125 : f32
    %23 = vector.broadcast %cst_11 : f32 to vector<1x1xf32>
    %24 = arith.mulf %22, %23 : vector<1x1xf32>
    %c0_12 = arith.constant 0 : index
    %c0_13 = arith.constant 0 : index
    %25 = vector.load %arg4[%c0_12, %c0_13] : memref<1x1xf32, #tpu.memory_space<vmem>>, vector<1x1xf32>
    %cst_14 = arith.constant 9.99999974E-6 : f32
    %26 = vector.broadcast %cst_14 : f32 to vector<1x1xf32>
    %27 = arith.addf %24, %26 : vector<1x1xf32>
    %28 = math.rsqrt %27 : vector<1x1xf32>
    %29 = arith.mulf %25, %28 : vector<1x1xf32>
    %30 = vector.broadcast %29 : vector<1x1xf32> to vector<2x256xf32>
    %31 = arith.mulf %17, %30 : vector<2x256xf32>
    %c0_15 = arith.constant 0 : index
    %c0_16 = arith.constant 0 : index
    %32 = vector.load %arg5[%c0_15, %c0_16] : memref<1x1xf32, #tpu.memory_space<vmem>>, vector<1x1xf32>
    %33 = vector.broadcast %32 : vector<1x1xf32> to vector<2x256xf32>
    %34 = arith.addf %31, %33 : vector<2x256xf32>
    %cst_17 = arith.constant 0.000000e+00 : f32
    %35 = vector.broadcast %cst_17 : f32 to vector<2x256xf32>
    %36 = arith.maximumf %34, %35 : vector<2x256xf32>
    %37 = arith.truncf %36 : vector<2x256xf32> to vector<2x256xbf16>
    %c0_18 = arith.constant 0 : index
    %c0_19 = arith.constant 0 : index
    %38 = vector.load %arg6[%c0_18, %c0_19] : memref<2x256xbf16, #tpu.memory_space<vmem>>, vector<2x256xbf16>
    tpu.vector_store %arg6[%c0_18, %c0_19], %37 {strides = array<i32>} : memref<2x256xbf16, #tpu.memory_space<vmem>>, vector<2x256xbf16>,
    return
  }
}

module attributes {stable_mosaic.version = 11 : i64} {
  func.func @_conv_bn_relu_kernel(%arg0: memref<512x25xbf16, #tpu.memory_space<vmem>>, %arg1: memref<25x8xbf16, #tpu.memory_space<vmem>>, %arg2: memref<1x8xf32, #tpu.memory_space<vmem>>, %arg3: memref<1x8xf32, #tpu.memory_space<vmem>>, %arg4: memref<512x8xbf16, #tpu.memory_space<vmem>>) attributes {dimension_semantics = [], scalar_prefetch = 0 : i64, scratch_operands = 0 : i64, tpu.core_type = #tpu.core_type<tc>} {
    %c0 = arith.constant 0 : index
    %c0_0 = arith.constant 0 : index
    %0 = vector.load %arg0[%c0, %c0_0] : memref<512x25xbf16, #tpu.memory_space<vmem>>, vector<512x25xbf16>
    %c0_1 = arith.constant 0 : index
    %c0_2 = arith.constant 0 : index
    %1 = vector.load %arg1[%c0_1, %c0_2] : memref<25x8xbf16, #tpu.memory_space<vmem>>, vector<25x8xbf16>
    %cst = arith.constant dense<0.000000e+00> : vector<512x8xf32>
    %2 = tpu.matmul %0, %1, %cst {dimension_numbers = #tpu.dot_dimension_numbers<[1], [0], [0], [1], [0, 0, 1, 1], [], []>} : vector<512x25xbf16>, vector<25x8xbf16>, vector<512x8xf32> -> vector<512x8xf32>
    %c0_3 = arith.constant 0 : index
    %c0_4 = arith.constant 0 : index
    %3 = vector.load %arg2[%c0_3, %c0_4] : memref<1x8xf32, #tpu.memory_space<vmem>>, vector<1x8xf32>
    %c0_5 = arith.constant 0 : index
    %c0_6 = arith.constant 0 : index
    %4 = vector.load %arg3[%c0_5, %c0_6] : memref<1x8xf32, #tpu.memory_space<vmem>>, vector<1x8xf32>
    %cst_7 = arith.constant dense<0.000000e+00> : vector<8xf32>
    %5 = vector.multi_reduction <add>, %2, %cst_7 [0] : vector<512x8xf32> to vector<8xf32>
    %6 = vector.shape_cast %5 : vector<8xf32> to vector<1x8xf32>
    %cst_8 = arith.constant 0.001953125 : f32
    %7 = vector.broadcast %cst_8 : f32 to vector<1x8xf32>
    %8 = arith.mulf %6, %7 : vector<1x8xf32>
    %9 = vector.broadcast %8 : vector<1x8xf32> to vector<512x8xf32>
    %10 = arith.subf %2, %9 : vector<512x8xf32>
    %11 = arith.mulf %10, %10 : vector<512x8xf32>
    %cst_9 = arith.constant dense<0.000000e+00> : vector<8xf32>
    %12 = vector.multi_reduction <add>, %11, %cst_9 [0] : vector<512x8xf32> to vector<8xf32>
    %13 = vector.shape_cast %12 : vector<8xf32> to vector<1x8xf32>
    %cst_10 = arith.constant 0.001953125 : f32
    %14 = vector.broadcast %cst_10 : f32 to vector<1x8xf32>
    %15 = arith.mulf %13, %14 : vector<1x8xf32>
    %cst_11 = arith.constant 9.99999974E-6 : f32
    %16 = vector.broadcast %cst_11 : f32 to vector<1x8xf32>
    %17 = arith.addf %15, %16 : vector<1x8xf32>
    %18 = math.rsqrt %17 : vector<1x8xf32>
    %19 = arith.mulf %3, %18 : vector<1x8xf32>
    %20 = vector.broadcast %19 : vector<1x8xf32> to vector<512x8xf32>
    %21 = arith.mulf %10, %20 : vector<512x8xf32>
    %22 = vector.broadcast %4 : vector<1x8xf32> to vector<512x8xf32>
    %23 = arith.addf %21, %22 : vector<512x8xf32>
    %cst_12 = arith.constant 0.000000e+00 : f32
    %24 = vector.broadcast %cst_12 : f32 to vector<512x8xf32>
    %25 = arith.maximumf %23, %24 : vector<512x8xf32>
    %26 = arith.truncf %25 : vector<512x8xf32> to vector<512x8xbf16>
    %c0_13 = arith.constant 0 : index
    %c0_14 = arith.constant 0 : index
    %27 = vector.load %arg4[%c0_13, %c0_14] : memref<512x8xbf16, #tpu.memory_space<vmem>>, vector<512x8xbf16>
    tpu.vector_store %arg4[%c0_13, %c0_14], %26 {strides = array<i32>} : memref<512x8xbf16, #tpu.memory_space<vmem>>, vector<512x8xbf16>,
    return
  }
}

module attributes {stable_mosaic.version = 11 : i64} {
  func.func @_max4_kernel(%arg0: memref<128x8xbf16, #tpu.memory_space<vmem>>, %arg1: memref<128x8xbf16, #tpu.memory_space<vmem>>, %arg2: memref<128x8xbf16, #tpu.memory_space<vmem>>, %arg3: memref<128x8xbf16, #tpu.memory_space<vmem>>, %arg4: memref<128x8xbf16, #tpu.memory_space<vmem>>) attributes {dimension_semantics = [], scalar_prefetch = 0 : i64, scratch_operands = 0 : i64, tpu.core_type = #tpu.core_type<tc>} {
    %c0 = arith.constant 0 : index
    %c0_0 = arith.constant 0 : index
    %0 = vector.load %arg0[%c0, %c0_0] : memref<128x8xbf16, #tpu.memory_space<vmem>>, vector<128x8xbf16>
    %c0_1 = arith.constant 0 : index
    %c0_2 = arith.constant 0 : index
    %1 = vector.load %arg1[%c0_1, %c0_2] : memref<128x8xbf16, #tpu.memory_space<vmem>>, vector<128x8xbf16>
    %2 = arith.maximumf %0, %1 : vector<128x8xbf16>
    %c0_3 = arith.constant 0 : index
    %c0_4 = arith.constant 0 : index
    %3 = vector.load %arg2[%c0_3, %c0_4] : memref<128x8xbf16, #tpu.memory_space<vmem>>, vector<128x8xbf16>
    %c0_5 = arith.constant 0 : index
    %c0_6 = arith.constant 0 : index
    %4 = vector.load %arg3[%c0_5, %c0_6] : memref<128x8xbf16, #tpu.memory_space<vmem>>, vector<128x8xbf16>
    %5 = arith.maximumf %3, %4 : vector<128x8xbf16>
    %6 = arith.maximumf %2, %5 : vector<128x8xbf16>
    %c0_7 = arith.constant 0 : index
    %c0_8 = arith.constant 0 : index
    %7 = vector.load %arg4[%c0_7, %c0_8] : memref<128x8xbf16, #tpu.memory_space<vmem>>, vector<128x8xbf16>
    tpu.vector_store %arg4[%c0_7, %c0_8], %6 {strides = array<i32>} : memref<128x8xbf16, #tpu.memory_space<vmem>>, vector<128x8xbf16>,
    return
  }
}

module attributes {stable_mosaic.version = 11 : i64} {
  func.func @_conv_bn_relu_kernel(%arg0: memref<128x72xbf16, #tpu.memory_space<vmem>>, %arg1: memref<72x16xbf16, #tpu.memory_space<vmem>>, %arg2: memref<1x16xf32, #tpu.memory_space<vmem>>, %arg3: memref<1x16xf32, #tpu.memory_space<vmem>>, %arg4: memref<128x16xbf16, #tpu.memory_space<vmem>>) attributes {dimension_semantics = [], scalar_prefetch = 0 : i64, scratch_operands = 0 : i64, tpu.core_type = #tpu.core_type<tc>} {
    %c0 = arith.constant 0 : index
    %c0_0 = arith.constant 0 : index
    %0 = vector.load %arg0[%c0, %c0_0] : memref<128x72xbf16, #tpu.memory_space<vmem>>, vector<128x72xbf16>
    %c0_1 = arith.constant 0 : index
    %c0_2 = arith.constant 0 : index
    %1 = vector.load %arg1[%c0_1, %c0_2] : memref<72x16xbf16, #tpu.memory_space<vmem>>, vector<72x16xbf16>
    %cst = arith.constant dense<0.000000e+00> : vector<128x16xf32>
    %2 = tpu.matmul %0, %1, %cst {dimension_numbers = #tpu.dot_dimension_numbers<[1], [0], [0], [1], [0, 0, 1, 1], [], []>} : vector<128x72xbf16>, vector<72x16xbf16>, vector<128x16xf32> -> vector<128x16xf32>
    %c0_3 = arith.constant 0 : index
    %c0_4 = arith.constant 0 : index
    %3 = vector.load %arg2[%c0_3, %c0_4] : memref<1x16xf32, #tpu.memory_space<vmem>>, vector<1x16xf32>
    %c0_5 = arith.constant 0 : index
    %c0_6 = arith.constant 0 : index
    %4 = vector.load %arg3[%c0_5, %c0_6] : memref<1x16xf32, #tpu.memory_space<vmem>>, vector<1x16xf32>
    %cst_7 = arith.constant dense<0.000000e+00> : vector<16xf32>
    %5 = vector.multi_reduction <add>, %2, %cst_7 [0] : vector<128x16xf32> to vector<16xf32>
    %6 = vector.shape_cast %5 : vector<16xf32> to vector<1x16xf32>
    %cst_8 = arith.constant 7.812500e-03 : f32
    %7 = vector.broadcast %cst_8 : f32 to vector<1x16xf32>
    %8 = arith.mulf %6, %7 : vector<1x16xf32>
    %9 = vector.broadcast %8 : vector<1x16xf32> to vector<128x16xf32>
    %10 = arith.subf %2, %9 : vector<128x16xf32>
    %11 = arith.mulf %10, %10 : vector<128x16xf32>
    %cst_9 = arith.constant dense<0.000000e+00> : vector<16xf32>
    %12 = vector.multi_reduction <add>, %11, %cst_9 [0] : vector<128x16xf32> to vector<16xf32>
    %13 = vector.shape_cast %12 : vector<16xf32> to vector<1x16xf32>
    %cst_10 = arith.constant 7.812500e-03 : f32
    %14 = vector.broadcast %cst_10 : f32 to vector<1x16xf32>
    %15 = arith.mulf %13, %14 : vector<1x16xf32>
    %cst_11 = arith.constant 9.99999974E-6 : f32
    %16 = vector.broadcast %cst_11 : f32 to vector<1x16xf32>
    %17 = arith.addf %15, %16 : vector<1x16xf32>
    %18 = math.rsqrt %17 : vector<1x16xf32>
    %19 = arith.mulf %3, %18 : vector<1x16xf32>
    %20 = vector.broadcast %19 : vector<1x16xf32> to vector<128x16xf32>
    %21 = arith.mulf %10, %20 : vector<128x16xf32>
    %22 = vector.broadcast %4 : vector<1x16xf32> to vector<128x16xf32>
    %23 = arith.addf %21, %22 : vector<128x16xf32>
    %cst_12 = arith.constant 0.000000e+00 : f32
    %24 = vector.broadcast %cst_12 : f32 to vector<128x16xf32>
    %25 = arith.maximumf %23, %24 : vector<128x16xf32>
    %26 = arith.truncf %25 : vector<128x16xf32> to vector<128x16xbf16>
    %c0_13 = arith.constant 0 : index
    %c0_14 = arith.constant 0 : index
    %27 = vector.load %arg4[%c0_13, %c0_14] : memref<128x16xbf16, #tpu.memory_space<vmem>>, vector<128x16xbf16>
    tpu.vector_store %arg4[%c0_13, %c0_14], %26 {strides = array<i32>} : memref<128x16xbf16, #tpu.memory_space<vmem>>, vector<128x16xbf16>,
    return
  }
}

module attributes {stable_mosaic.version = 11 : i64} {
  func.func @_max4_kernel(%arg0: memref<32x16xbf16, #tpu.memory_space<vmem>>, %arg1: memref<32x16xbf16, #tpu.memory_space<vmem>>, %arg2: memref<32x16xbf16, #tpu.memory_space<vmem>>, %arg3: memref<32x16xbf16, #tpu.memory_space<vmem>>, %arg4: memref<32x16xbf16, #tpu.memory_space<vmem>>) attributes {dimension_semantics = [], scalar_prefetch = 0 : i64, scratch_operands = 0 : i64, tpu.core_type = #tpu.core_type<tc>} {
    %c0 = arith.constant 0 : index
    %c0_0 = arith.constant 0 : index
    %0 = vector.load %arg0[%c0, %c0_0] : memref<32x16xbf16, #tpu.memory_space<vmem>>, vector<32x16xbf16>
    %c0_1 = arith.constant 0 : index
    %c0_2 = arith.constant 0 : index
    %1 = vector.load %arg1[%c0_1, %c0_2] : memref<32x16xbf16, #tpu.memory_space<vmem>>, vector<32x16xbf16>
    %2 = arith.maximumf %0, %1 : vector<32x16xbf16>
    %c0_3 = arith.constant 0 : index
    %c0_4 = arith.constant 0 : index
    %3 = vector.load %arg2[%c0_3, %c0_4] : memref<32x16xbf16, #tpu.memory_space<vmem>>, vector<32x16xbf16>
    %c0_5 = arith.constant 0 : index
    %c0_6 = arith.constant 0 : index
    %4 = vector.load %arg3[%c0_5, %c0_6] : memref<32x16xbf16, #tpu.memory_space<vmem>>, vector<32x16xbf16>
    %5 = arith.maximumf %3, %4 : vector<32x16xbf16>
    %6 = arith.maximumf %2, %5 : vector<32x16xbf16>
    %c0_7 = arith.constant 0 : index
    %c0_8 = arith.constant 0 : index
    %7 = vector.load %arg4[%c0_7, %c0_8] : memref<32x16xbf16, #tpu.memory_space<vmem>>, vector<32x16xbf16>
    tpu.vector_store %arg4[%c0_7, %c0_8], %6 {strides = array<i32>} : memref<32x16xbf16, #tpu.memory_space<vmem>>, vector<32x16xbf16>,
    return
  }
}

module attributes {stable_mosaic.version = 11 : i64} {
  func.func @_conv_bn_relu_kernel(%arg0: memref<32x144xbf16, #tpu.memory_space<vmem>>, %arg1: memref<144x32xbf16, #tpu.memory_space<vmem>>, %arg2: memref<1x32xf32, #tpu.memory_space<vmem>>, %arg3: memref<1x32xf32, #tpu.memory_space<vmem>>, %arg4: memref<32x32xbf16, #tpu.memory_space<vmem>>) attributes {dimension_semantics = [], scalar_prefetch = 0 : i64, scratch_operands = 0 : i64, tpu.core_type = #tpu.core_type<tc>} {
    %c0 = arith.constant 0 : index
    %c0_0 = arith.constant 0 : index
    %0 = vector.load %arg0[%c0, %c0_0] : memref<32x144xbf16, #tpu.memory_space<vmem>>, vector<32x144xbf16>
    %c0_1 = arith.constant 0 : index
    %c0_2 = arith.constant 0 : index
    %1 = vector.load %arg1[%c0_1, %c0_2] : memref<144x32xbf16, #tpu.memory_space<vmem>>, vector<144x32xbf16>
    %cst = arith.constant dense<0.000000e+00> : vector<32x32xf32>
    %2 = tpu.matmul %0, %1, %cst {dimension_numbers = #tpu.dot_dimension_numbers<[1], [0], [0], [1], [0, 0, 1, 1], [], []>} : vector<32x144xbf16>, vector<144x32xbf16>, vector<32x32xf32> -> vector<32x32xf32>
    %c0_3 = arith.constant 0 : index
    %c0_4 = arith.constant 0 : index
    %3 = vector.load %arg2[%c0_3, %c0_4] : memref<1x32xf32, #tpu.memory_space<vmem>>, vector<1x32xf32>
    %c0_5 = arith.constant 0 : index
    %c0_6 = arith.constant 0 : index
    %4 = vector.load %arg3[%c0_5, %c0_6] : memref<1x32xf32, #tpu.memory_space<vmem>>, vector<1x32xf32>
    %cst_7 = arith.constant dense<0.000000e+00> : vector<32xf32>
    %5 = vector.multi_reduction <add>, %2, %cst_7 [0] : vector<32x32xf32> to vector<32xf32>
    %6 = vector.shape_cast %5 : vector<32xf32> to vector<1x32xf32>
    %cst_8 = arith.constant 3.125000e-02 : f32
    %7 = vector.broadcast %cst_8 : f32 to vector<1x32xf32>
    %8 = arith.mulf %6, %7 : vector<1x32xf32>
    %9 = vector.broadcast %8 : vector<1x32xf32> to vector<32x32xf32>
    %10 = arith.subf %2, %9 : vector<32x32xf32>
    %11 = arith.mulf %10, %10 : vector<32x32xf32>
    %cst_9 = arith.constant dense<0.000000e+00> : vector<32xf32>
    %12 = vector.multi_reduction <add>, %11, %cst_9 [0] : vector<32x32xf32> to vector<32xf32>
    %13 = vector.shape_cast %12 : vector<32xf32> to vector<1x32xf32>
    %cst_10 = arith.constant 3.125000e-02 : f32
    %14 = vector.broadcast %cst_10 : f32 to vector<1x32xf32>
    %15 = arith.mulf %13, %14 : vector<1x32xf32>
    %cst_11 = arith.constant 9.99999974E-6 : f32
    %16 = vector.broadcast %cst_11 : f32 to vector<1x32xf32>
    %17 = arith.addf %15, %16 : vector<1x32xf32>
    %18 = math.rsqrt %17 : vector<1x32xf32>
    %19 = arith.mulf %3, %18 : vector<1x32xf32>
    %20 = vector.broadcast %19 : vector<1x32xf32> to vector<32x32xf32>
    %21 = arith.mulf %10, %20 : vector<32x32xf32>
    %22 = vector.broadcast %4 : vector<1x32xf32> to vector<32x32xf32>
    %23 = arith.addf %21, %22 : vector<32x32xf32>
    %cst_12 = arith.constant 0.000000e+00 : f32
    %24 = vector.broadcast %cst_12 : f32 to vector<32x32xf32>
    %25 = arith.maximumf %23, %24 : vector<32x32xf32>
    %26 = arith.truncf %25 : vector<32x32xf32> to vector<32x32xbf16>
    %c0_13 = arith.constant 0 : index
    %c0_14 = arith.constant 0 : index
    %27 = vector.load %arg4[%c0_13, %c0_14] : memref<32x32xbf16, #tpu.memory_space<vmem>>, vector<32x32xbf16>
    tpu.vector_store %arg4[%c0_13, %c0_14], %26 {strides = array<i32>} : memref<32x32xbf16, #tpu.memory_space<vmem>>, vector<32x32xbf16>,
    return
  }
}

module attributes {stable_mosaic.version = 11 : i64} {
  func.func @_max4_kernel(%arg0: memref<8x32xbf16, #tpu.memory_space<vmem>>, %arg1: memref<8x32xbf16, #tpu.memory_space<vmem>>, %arg2: memref<8x32xbf16, #tpu.memory_space<vmem>>, %arg3: memref<8x32xbf16, #tpu.memory_space<vmem>>, %arg4: memref<8x32xbf16, #tpu.memory_space<vmem>>) attributes {dimension_semantics = [], scalar_prefetch = 0 : i64, scratch_operands = 0 : i64, tpu.core_type = #tpu.core_type<tc>} {
    %c0 = arith.constant 0 : index
    %c0_0 = arith.constant 0 : index
    %0 = vector.load %arg0[%c0, %c0_0] : memref<8x32xbf16, #tpu.memory_space<vmem>>, vector<8x32xbf16>
    %c0_1 = arith.constant 0 : index
    %c0_2 = arith.constant 0 : index
    %1 = vector.load %arg1[%c0_1, %c0_2] : memref<8x32xbf16, #tpu.memory_space<vmem>>, vector<8x32xbf16>
    %2 = arith.maximumf %0, %1 : vector<8x32xbf16>
    %c0_3 = arith.constant 0 : index
    %c0_4 = arith.constant 0 : index
    %3 = vector.load %arg2[%c0_3, %c0_4] : memref<8x32xbf16, #tpu.memory_space<vmem>>, vector<8x32xbf16>
    %c0_5 = arith.constant 0 : index
    %c0_6 = arith.constant 0 : index
    %4 = vector.load %arg3[%c0_5, %c0_6] : memref<8x32xbf16, #tpu.memory_space<vmem>>, vector<8x32xbf16>
    %5 = arith.maximumf %3, %4 : vector<8x32xbf16>
    %6 = arith.maximumf %2, %5 : vector<8x32xbf16>
    %c0_7 = arith.constant 0 : index
    %c0_8 = arith.constant 0 : index
    %7 = vector.load %arg4[%c0_7, %c0_8] : memref<8x32xbf16, #tpu.memory_space<vmem>>, vector<8x32xbf16>
    tpu.vector_store %arg4[%c0_7, %c0_8], %6 {strides = array<i32>} : memref<8x32xbf16, #tpu.memory_space<vmem>>, vector<8x32xbf16>,
    return
  }
}

module attributes {stable_mosaic.version = 11 : i64} {
  func.func @_conv_bn_relu_kernel(%arg0: memref<8x288xbf16, #tpu.memory_space<vmem>>, %arg1: memref<288x32xbf16, #tpu.memory_space<vmem>>, %arg2: memref<1x32xf32, #tpu.memory_space<vmem>>, %arg3: memref<1x32xf32, #tpu.memory_space<vmem>>, %arg4: memref<8x32xbf16, #tpu.memory_space<vmem>>) attributes {dimension_semantics = [], scalar_prefetch = 0 : i64, scratch_operands = 0 : i64, tpu.core_type = #tpu.core_type<tc>} {
    %c0 = arith.constant 0 : index
    %c0_0 = arith.constant 0 : index
    %0 = vector.load %arg0[%c0, %c0_0] : memref<8x288xbf16, #tpu.memory_space<vmem>>, vector<8x288xbf16>
    %c0_1 = arith.constant 0 : index
    %c0_2 = arith.constant 0 : index
    %1 = vector.load %arg1[%c0_1, %c0_2] : memref<288x32xbf16, #tpu.memory_space<vmem>>, vector<288x32xbf16>
    %cst = arith.constant dense<0.000000e+00> : vector<8x32xf32>
    %2 = tpu.matmul %0, %1, %cst {dimension_numbers = #tpu.dot_dimension_numbers<[1], [0], [0], [1], [0, 0, 1, 1], [], []>} : vector<8x288xbf16>, vector<288x32xbf16>, vector<8x32xf32> -> vector<8x32xf32>
    %c0_3 = arith.constant 0 : index
    %c0_4 = arith.constant 0 : index
    %3 = vector.load %arg2[%c0_3, %c0_4] : memref<1x32xf32, #tpu.memory_space<vmem>>, vector<1x32xf32>
    %c0_5 = arith.constant 0 : index
    %c0_6 = arith.constant 0 : index
    %4 = vector.load %arg3[%c0_5, %c0_6] : memref<1x32xf32, #tpu.memory_space<vmem>>, vector<1x32xf32>
    %cst_7 = arith.constant dense<0.000000e+00> : vector<32xf32>
    %5 = vector.multi_reduction <add>, %2, %cst_7 [0] : vector<8x32xf32> to vector<32xf32>
    %6 = vector.shape_cast %5 : vector<32xf32> to vector<1x32xf32>
    %cst_8 = arith.constant 1.250000e-01 : f32
    %7 = vector.broadcast %cst_8 : f32 to vector<1x32xf32>
    %8 = arith.mulf %6, %7 : vector<1x32xf32>
    %9 = vector.broadcast %8 : vector<1x32xf32> to vector<8x32xf32>
    %10 = arith.subf %2, %9 : vector<8x32xf32>
    %11 = arith.mulf %10, %10 : vector<8x32xf32>
    %cst_9 = arith.constant dense<0.000000e+00> : vector<32xf32>
    %12 = vector.multi_reduction <add>, %11, %cst_9 [0] : vector<8x32xf32> to vector<32xf32>
    %13 = vector.shape_cast %12 : vector<32xf32> to vector<1x32xf32>
    %cst_10 = arith.constant 1.250000e-01 : f32
    %14 = vector.broadcast %cst_10 : f32 to vector<1x32xf32>
    %15 = arith.mulf %13, %14 : vector<1x32xf32>
    %cst_11 = arith.constant 9.99999974E-6 : f32
    %16 = vector.broadcast %cst_11 : f32 to vector<1x32xf32>
    %17 = arith.addf %15, %16 : vector<1x32xf32>
    %18 = math.rsqrt %17 : vector<1x32xf32>
    %19 = arith.mulf %3, %18 : vector<1x32xf32>
    %20 = vector.broadcast %19 : vector<1x32xf32> to vector<8x32xf32>
    %21 = arith.mulf %10, %20 : vector<8x32xf32>
    %22 = vector.broadcast %4 : vector<1x32xf32> to vector<8x32xf32>
    %23 = arith.addf %21, %22 : vector<8x32xf32>
    %cst_12 = arith.constant 0.000000e+00 : f32
    %24 = vector.broadcast %cst_12 : f32 to vector<8x32xf32>
    %25 = arith.maximumf %23, %24 : vector<8x32xf32>
    %26 = arith.truncf %25 : vector<8x32xf32> to vector<8x32xbf16>
    %c0_13 = arith.constant 0 : index
    %c0_14 = arith.constant 0 : index
    %27 = vector.load %arg4[%c0_13, %c0_14] : memref<8x32xbf16, #tpu.memory_space<vmem>>, vector<8x32xbf16>
    tpu.vector_store %arg4[%c0_13, %c0_14], %26 {strides = array<i32>} : memref<8x32xbf16, #tpu.memory_space<vmem>>, vector<8x32xbf16>,
    return
  }
}

module attributes {stable_mosaic.version = 11 : i64} {
  func.func @_max4_kernel(%arg0: memref<2x32xbf16, #tpu.memory_space<vmem>>, %arg1: memref<2x32xbf16, #tpu.memory_space<vmem>>, %arg2: memref<2x32xbf16, #tpu.memory_space<vmem>>, %arg3: memref<2x32xbf16, #tpu.memory_space<vmem>>, %arg4: memref<2x32xbf16, #tpu.memory_space<vmem>>) attributes {dimension_semantics = [], scalar_prefetch = 0 : i64, scratch_operands = 0 : i64, tpu.core_type = #tpu.core_type<tc>} {
    %c0 = arith.constant 0 : index
    %c0_0 = arith.constant 0 : index
    %0 = vector.load %arg0[%c0, %c0_0] : memref<2x32xbf16, #tpu.memory_space<vmem>>, vector<2x32xbf16>
    %c0_1 = arith.constant 0 : index
    %c0_2 = arith.constant 0 : index
    %1 = vector.load %arg1[%c0_1, %c0_2] : memref<2x32xbf16, #tpu.memory_space<vmem>>, vector<2x32xbf16>
    %2 = arith.maximumf %0, %1 : vector<2x32xbf16>
    %c0_3 = arith.constant 0 : index
    %c0_4 = arith.constant 0 : index
    %3 = vector.load %arg2[%c0_3, %c0_4] : memref<2x32xbf16, #tpu.memory_space<vmem>>, vector<2x32xbf16>
    %c0_5 = arith.constant 0 : index
    %c0_6 = arith.constant 0 : index
    %4 = vector.load %arg3[%c0_5, %c0_6] : memref<2x32xbf16, #tpu.memory_space<vmem>>, vector<2x32xbf16>
    %5 = arith.maximumf %3, %4 : vector<2x32xbf16>
    %6 = arith.maximumf %2, %5 : vector<2x32xbf16>
    %c0_7 = arith.constant 0 : index
    %c0_8 = arith.constant 0 : index
    %7 = vector.load %arg4[%c0_7, %c0_8] : memref<2x32xbf16, #tpu.memory_space<vmem>>, vector<2x32xbf16>
    tpu.vector_store %arg4[%c0_7, %c0_8], %6 {strides = array<i32>} : memref<2x32xbf16, #tpu.memory_space<vmem>>, vector<2x32xbf16>,
    return
  }
}

module attributes {stable_mosaic.version = 11 : i64} {
  func.func @_kern_module_kernel(%arg0: memref<2x32xbf16, #tpu.memory_space<vmem>>, %arg1: memref<32x32xbf16, #tpu.memory_space<vmem>>, %arg2: memref<1x32xf32, #tpu.memory_space<vmem>>, %arg3: memref<1x32xf32, #tpu.memory_space<vmem>>, %arg4: memref<32x32xbf16, #tpu.memory_space<vmem>>, %arg5: memref<1x32xf32, #tpu.memory_space<vmem>>, %arg6: memref<1x32xf32, #tpu.memory_space<vmem>>, %arg7: memref<2x32xbf16, #tpu.memory_space<vmem>>) attributes {dimension_semantics = [], scalar_prefetch = 0 : i64, scratch_operands = 0 : i64, tpu.core_type = #tpu.core_type<tc>} {
    %c0 = arith.constant 0 : index
    %c0_0 = arith.constant 0 : index
    %0 = vector.load %arg0[%c0, %c0_0] : memref<2x32xbf16, #tpu.memory_space<vmem>>, vector<2x32xbf16>
    %c0_1 = arith.constant 0 : index
    %c0_2 = arith.constant 0 : index
    %1 = vector.load %arg1[%c0_1, %c0_2] : memref<32x32xbf16, #tpu.memory_space<vmem>>, vector<32x32xbf16>
    %cst = arith.constant dense<0.000000e+00> : vector<2x32xf32>
    %2 = tpu.matmul %0, %1, %cst {dimension_numbers = #tpu.dot_dimension_numbers<[1], [0], [0], [1], [0, 0, 1, 1], [], []>} : vector<2x32xbf16>, vector<32x32xbf16>, vector<2x32xf32> -> vector<2x32xf32>
    %c0_3 = arith.constant 0 : index
    %c0_4 = arith.constant 0 : index
    %3 = vector.load %arg2[%c0_3, %c0_4] : memref<1x32xf32, #tpu.memory_space<vmem>>, vector<1x32xf32>
    %c0_5 = arith.constant 0 : index
    %c0_6 = arith.constant 0 : index
    %4 = vector.load %arg3[%c0_5, %c0_6] : memref<1x32xf32, #tpu.memory_space<vmem>>, vector<1x32xf32>
    %cst_7 = arith.constant dense<0.000000e+00> : vector<32xf32>
    %5 = vector.multi_reduction <add>, %2, %cst_7 [0] : vector<2x32xf32> to vector<32xf32>
    %6 = vector.shape_cast %5 : vector<32xf32> to vector<1x32xf32>
    %cst_8 = arith.constant 5.000000e-01 : f32
    %7 = vector.broadcast %cst_8 : f32 to vector<1x32xf32>
    %8 = arith.mulf %6, %7 : vector<1x32xf32>
    %9 = vector.broadcast %8 : vector<1x32xf32> to vector<2x32xf32>
    %10 = arith.subf %2, %9 : vector<2x32xf32>
    %11 = arith.mulf %10, %10 : vector<2x32xf32>
    %cst_9 = arith.constant dense<0.000000e+00> : vector<32xf32>
    %12 = vector.multi_reduction <add>, %11, %cst_9 [0] : vector<2x32xf32> to vector<32xf32>
    %13 = vector.shape_cast %12 : vector<32xf32> to vector<1x32xf32>
    %cst_10 = arith.constant 5.000000e-01 : f32
    %14 = vector.broadcast %cst_10 : f32 to vector<1x32xf32>
    %15 = arith.mulf %13, %14 : vector<1x32xf32>
    %cst_11 = arith.constant 9.99999974E-6 : f32
    %16 = vector.broadcast %cst_11 : f32 to vector<1x32xf32>
    %17 = arith.addf %15, %16 : vector<1x32xf32>
    %18 = math.rsqrt %17 : vector<1x32xf32>
    %19 = arith.mulf %3, %18 : vector<1x32xf32>
    %20 = vector.broadcast %19 : vector<1x32xf32> to vector<2x32xf32>
    %21 = arith.mulf %10, %20 : vector<2x32xf32>
    %22 = vector.broadcast %4 : vector<1x32xf32> to vector<2x32xf32>
    %23 = arith.addf %21, %22 : vector<2x32xf32>
    %cst_12 = arith.constant 0.000000e+00 : f32
    %24 = vector.broadcast %cst_12 : f32 to vector<2x32xf32>
    %25 = arith.maximumf %23, %24 : vector<2x32xf32>
    %26 = arith.truncf %25 : vector<2x32xf32> to vector<2x32xbf16>
    %c0_13 = arith.constant 0 : index
    %c0_14 = arith.constant 0 : index
    %27 = vector.load %arg4[%c0_13, %c0_14] : memref<32x32xbf16, #tpu.memory_space<vmem>>, vector<32x32xbf16>
    %cst_15 = arith.constant dense<0.000000e+00> : vector<2x32xf32>
    %28 = tpu.matmul %26, %27, %cst_15 {dimension_numbers = #tpu.dot_dimension_numbers<[1], [0], [0], [1], [0, 0, 1, 1], [], []>} : vector<2x32xbf16>, vector<32x32xbf16>, vector<2x32xf32> -> vector<2x32xf32>
    %c0_16 = arith.constant 0 : index
    %c0_17 = arith.constant 0 : index
    %29 = vector.load %arg5[%c0_16, %c0_17] : memref<1x32xf32, #tpu.memory_space<vmem>>, vector<1x32xf32>
    %c0_18 = arith.constant 0 : index
    %c0_19 = arith.constant 0 : index
    %30 = vector.load %arg6[%c0_18, %c0_19] : memref<1x32xf32, #tpu.memory_space<vmem>>, vector<1x32xf32>
    %cst_20 = arith.constant dense<0.000000e+00> : vector<32xf32>
    %31 = vector.multi_reduction <add>, %28, %cst_20 [0] : vector<2x32xf32> to vector<32xf32>
    %32 = vector.shape_cast %31 : vector<32xf32> to vector<1x32xf32>
    %cst_21 = arith.constant 5.000000e-01 : f32
    %33 = vector.broadcast %cst_21 : f32 to vector<1x32xf32>
    %34 = arith.mulf %32, %33 : vector<1x32xf32>
    %35 = vector.broadcast %34 : vector<1x32xf32> to vector<2x32xf32>
    %36 = arith.subf %28, %35 : vector<2x32xf32>
    %37 = arith.mulf %36, %36 : vector<2x32xf32>
    %cst_22 = arith.constant dense<0.000000e+00> : vector<32xf32>
    %38 = vector.multi_reduction <add>, %37, %cst_22 [0] : vector<2x32xf32> to vector<32xf32>
    %39 = vector.shape_cast %38 : vector<32xf32> to vector<1x32xf32>
    %cst_23 = arith.constant 5.000000e-01 : f32
    %40 = vector.broadcast %cst_23 : f32 to vector<1x32xf32>
    %41 = arith.mulf %39, %40 : vector<1x32xf32>
    %cst_24 = arith.constant 9.99999974E-6 : f32
    %42 = vector.broadcast %cst_24 : f32 to vector<1x32xf32>
    %43 = arith.addf %41, %42 : vector<1x32xf32>
    %44 = math.rsqrt %43 : vector<1x32xf32>
    %45 = arith.mulf %29, %44 : vector<1x32xf32>
    %46 = vector.broadcast %45 : vector<1x32xf32> to vector<2x32xf32>
    %47 = arith.mulf %36, %46 : vector<2x32xf32>
    %48 = vector.broadcast %30 : vector<1x32xf32> to vector<2x32xf32>
    %49 = arith.addf %47, %48 : vector<2x32xf32>
    %cst_25 = arith.constant 0.000000e+00 : f32
    %50 = vector.broadcast %cst_25 : f32 to vector<2x32xf32>
    %51 = arith.maximumf %49, %50 : vector<2x32xf32>
    %52 = arith.truncf %51 : vector<2x32xf32> to vector<2x32xbf16>
    %c0_26 = arith.constant 0 : index
    %c0_27 = arith.constant 0 : index
    %53 = vector.load %arg7[%c0_26, %c0_27] : memref<2x32xbf16, #tpu.memory_space<vmem>>, vector<2x32xbf16>
    tpu.vector_store %arg7[%c0_26, %c0_27], %52 {strides = array<i32>} : memref<2x32xbf16, #tpu.memory_space<vmem>>, vector<2x32xbf16>,
    return
  }
}

module attributes {stable_mosaic.version = 11 : i64} {
  func.func @_conv_bn_relu_kernel(%arg0: memref<32x288xbf16, #tpu.memory_space<vmem>>, %arg1: memref<288x16xbf16, #tpu.memory_space<vmem>>, %arg2: memref<1x16xf32, #tpu.memory_space<vmem>>, %arg3: memref<1x16xf32, #tpu.memory_space<vmem>>, %arg4: memref<32x16xbf16, #tpu.memory_space<vmem>>) attributes {dimension_semantics = [], scalar_prefetch = 0 : i64, scratch_operands = 0 : i64, tpu.core_type = #tpu.core_type<tc>} {
    %c0 = arith.constant 0 : index
    %c0_0 = arith.constant 0 : index
    %0 = vector.load %arg0[%c0, %c0_0] : memref<32x288xbf16, #tpu.memory_space<vmem>>, vector<32x288xbf16>
    %c0_1 = arith.constant 0 : index
    %c0_2 = arith.constant 0 : index
    %1 = vector.load %arg1[%c0_1, %c0_2] : memref<288x16xbf16, #tpu.memory_space<vmem>>, vector<288x16xbf16>
    %cst = arith.constant dense<0.000000e+00> : vector<32x16xf32>
    %2 = tpu.matmul %0, %1, %cst {dimension_numbers = #tpu.dot_dimension_numbers<[1], [0], [0], [1], [0, 0, 1, 1], [], []>} : vector<32x288xbf16>, vector<288x16xbf16>, vector<32x16xf32> -> vector<32x16xf32>
    %c0_3 = arith.constant 0 : index
    %c0_4 = arith.constant 0 : index
    %3 = vector.load %arg2[%c0_3, %c0_4] : memref<1x16xf32, #tpu.memory_space<vmem>>, vector<1x16xf32>
    %c0_5 = arith.constant 0 : index
    %c0_6 = arith.constant 0 : index
    %4 = vector.load %arg3[%c0_5, %c0_6] : memref<1x16xf32, #tpu.memory_space<vmem>>, vector<1x16xf32>
    %cst_7 = arith.constant dense<0.000000e+00> : vector<16xf32>
    %5 = vector.multi_reduction <add>, %2, %cst_7 [0] : vector<32x16xf32> to vector<16xf32>
    %6 = vector.shape_cast %5 : vector<16xf32> to vector<1x16xf32>
    %cst_8 = arith.constant 3.125000e-02 : f32
    %7 = vector.broadcast %cst_8 : f32 to vector<1x16xf32>
    %8 = arith.mulf %6, %7 : vector<1x16xf32>
    %9 = vector.broadcast %8 : vector<1x16xf32> to vector<32x16xf32>
    %10 = arith.subf %2, %9 : vector<32x16xf32>
    %11 = arith.mulf %10, %10 : vector<32x16xf32>
    %cst_9 = arith.constant dense<0.000000e+00> : vector<16xf32>
    %12 = vector.multi_reduction <add>, %11, %cst_9 [0] : vector<32x16xf32> to vector<16xf32>
    %13 = vector.shape_cast %12 : vector<16xf32> to vector<1x16xf32>
    %cst_10 = arith.constant 3.125000e-02 : f32
    %14 = vector.broadcast %cst_10 : f32 to vector<1x16xf32>
    %15 = arith.mulf %13, %14 : vector<1x16xf32>
    %cst_11 = arith.constant 9.99999974E-6 : f32
    %16 = vector.broadcast %cst_11 : f32 to vector<1x16xf32>
    %17 = arith.addf %15, %16 : vector<1x16xf32>
    %18 = math.rsqrt %17 : vector<1x16xf32>
    %19 = arith.mulf %3, %18 : vector<1x16xf32>
    %20 = vector.broadcast %19 : vector<1x16xf32> to vector<32x16xf32>
    %21 = arith.mulf %10, %20 : vector<32x16xf32>
    %22 = vector.broadcast %4 : vector<1x16xf32> to vector<32x16xf32>
    %23 = arith.addf %21, %22 : vector<32x16xf32>
    %cst_12 = arith.constant 0.000000e+00 : f32
    %24 = vector.broadcast %cst_12 : f32 to vector<32x16xf32>
    %25 = arith.maximumf %23, %24 : vector<32x16xf32>
    %26 = arith.truncf %25 : vector<32x16xf32> to vector<32x16xbf16>
    %c0_13 = arith.constant 0 : index
    %c0_14 = arith.constant 0 : index
    %27 = vector.load %arg4[%c0_13, %c0_14] : memref<32x16xbf16, #tpu.memory_space<vmem>>, vector<32x16xbf16>
    tpu.vector_store %arg4[%c0_13, %c0_14], %26 {strides = array<i32>} : memref<32x16xbf16, #tpu.memory_space<vmem>>, vector<32x16xbf16>,
    return
  }
}

module attributes {stable_mosaic.version = 11 : i64} {
  func.func @_conv_bn_relu_kernel(%arg0: memref<128x144xbf16, #tpu.memory_space<vmem>>, %arg1: memref<144x8xbf16, #tpu.memory_space<vmem>>, %arg2: memref<1x8xf32, #tpu.memory_space<vmem>>, %arg3: memref<1x8xf32, #tpu.memory_space<vmem>>, %arg4: memref<128x8xbf16, #tpu.memory_space<vmem>>) attributes {dimension_semantics = [], scalar_prefetch = 0 : i64, scratch_operands = 0 : i64, tpu.core_type = #tpu.core_type<tc>} {
    %c0 = arith.constant 0 : index
    %c0_0 = arith.constant 0 : index
    %0 = vector.load %arg0[%c0, %c0_0] : memref<128x144xbf16, #tpu.memory_space<vmem>>, vector<128x144xbf16>
    %c0_1 = arith.constant 0 : index
    %c0_2 = arith.constant 0 : index
    %1 = vector.load %arg1[%c0_1, %c0_2] : memref<144x8xbf16, #tpu.memory_space<vmem>>, vector<144x8xbf16>
    %cst = arith.constant dense<0.000000e+00> : vector<128x8xf32>
    %2 = tpu.matmul %0, %1, %cst {dimension_numbers = #tpu.dot_dimension_numbers<[1], [0], [0], [1], [0, 0, 1, 1], [], []>} : vector<128x144xbf16>, vector<144x8xbf16>, vector<128x8xf32> -> vector<128x8xf32>
    %c0_3 = arith.constant 0 : index
    %c0_4 = arith.constant 0 : index
    %3 = vector.load %arg2[%c0_3, %c0_4] : memref<1x8xf32, #tpu.memory_space<vmem>>, vector<1x8xf32>
    %c0_5 = arith.constant 0 : index
    %c0_6 = arith.constant 0 : index
    %4 = vector.load %arg3[%c0_5, %c0_6] : memref<1x8xf32, #tpu.memory_space<vmem>>, vector<1x8xf32>
    %cst_7 = arith.constant dense<0.000000e+00> : vector<8xf32>
    %5 = vector.multi_reduction <add>, %2, %cst_7 [0] : vector<128x8xf32> to vector<8xf32>
    %6 = vector.shape_cast %5 : vector<8xf32> to vector<1x8xf32>
    %cst_8 = arith.constant 7.812500e-03 : f32
    %7 = vector.broadcast %cst_8 : f32 to vector<1x8xf32>
    %8 = arith.mulf %6, %7 : vector<1x8xf32>
    %9 = vector.broadcast %8 : vector<1x8xf32> to vector<128x8xf32>
    %10 = arith.subf %2, %9 : vector<128x8xf32>
    %11 = arith.mulf %10, %10 : vector<128x8xf32>
    %cst_9 = arith.constant dense<0.000000e+00> : vector<8xf32>
    %12 = vector.multi_reduction <add>, %11, %cst_9 [0] : vector<128x8xf32> to vector<8xf32>
    %13 = vector.shape_cast %12 : vector<8xf32> to vector<1x8xf32>
    %cst_10 = arith.constant 7.812500e-03 : f32
    %14 = vector.broadcast %cst_10 : f32 to vector<1x8xf32>
    %15 = arith.mulf %13, %14 : vector<1x8xf32>
    %cst_11 = arith.constant 9.99999974E-6 : f32
    %16 = vector.broadcast %cst_11 : f32 to vector<1x8xf32>
    %17 = arith.addf %15, %16 : vector<1x8xf32>
    %18 = math.rsqrt %17 : vector<1x8xf32>
    %19 = arith.mulf %3, %18 : vector<1x8xf32>
    %20 = vector.broadcast %19 : vector<1x8xf32> to vector<128x8xf32>
    %21 = arith.mulf %10, %20 : vector<128x8xf32>
    %22 = vector.broadcast %4 : vector<1x8xf32> to vector<128x8xf32>
    %23 = arith.addf %21, %22 : vector<128x8xf32>
    %cst_12 = arith.constant 0.000000e+00 : f32
    %24 = vector.broadcast %cst_12 : f32 to vector<128x8xf32>
    %25 = arith.maximumf %23, %24 : vector<128x8xf32>
    %26 = arith.truncf %25 : vector<128x8xf32> to vector<128x8xbf16>
    %c0_13 = arith.constant 0 : index
    %c0_14 = arith.constant 0 : index
    %27 = vector.load %arg4[%c0_13, %c0_14] : memref<128x8xbf16, #tpu.memory_space<vmem>>, vector<128x8xbf16>
    tpu.vector_store %arg4[%c0_13, %c0_14], %26 {strides = array<i32>} : memref<128x8xbf16, #tpu.memory_space<vmem>>, vector<128x8xbf16>,
    return
  }
}

module attributes {stable_mosaic.version = 11 : i64} {
  func.func @_conv_sigmoid_kernel(%arg0: memref<512x200xbf16, #tpu.memory_space<vmem>>, %arg1: memref<1x200xf32, #tpu.memory_space<vmem>>, %arg2: memref<1x1xf32, #tpu.memory_space<vmem>>, %arg3: memref<512x1xf32, #tpu.memory_space<vmem>>) attributes {dimension_semantics = [], scalar_prefetch = 0 : i64, scratch_operands = 0 : i64, tpu.core_type = #tpu.core_type<tc>} {
    %c0 = arith.constant 0 : index
    %c0_0 = arith.constant 0 : index
    %0 = vector.load %arg0[%c0, %c0_0] : memref<512x200xbf16, #tpu.memory_space<vmem>>, vector<512x200xbf16>
    %1 = arith.extf %0 : vector<512x200xbf16> to vector<512x200xf32>
    %c0_1 = arith.constant 0 : index
    %c0_2 = arith.constant 0 : index
    %2 = vector.load %arg1[%c0_1, %c0_2] : memref<1x200xf32, #tpu.memory_space<vmem>>, vector<1x200xf32>
    %3 = vector.broadcast %2 : vector<1x200xf32> to vector<512x200xf32>
    %4 = arith.mulf %1, %3 : vector<512x200xf32>
    %cst = arith.constant dense<0.000000e+00> : vector<512xf32>
    %5 = vector.multi_reduction <add>, %4, %cst [1] : vector<512x200xf32> to vector<512xf32>
    %6 = vector.shape_cast %5 : vector<512xf32> to vector<512x1xf32>
    %c0_3 = arith.constant 0 : index
    %c0_4 = arith.constant 0 : index
    %7 = vector.load %arg2[%c0_3, %c0_4] : memref<1x1xf32, #tpu.memory_space<vmem>>, vector<1x1xf32>
    %8 = vector.broadcast %7 : vector<1x1xf32> to vector<512x1xf32>
    %9 = arith.addf %6, %8 : vector<512x1xf32>
    %cst_5 = arith.constant 0.000000e+00 : f32
    %10 = vector.broadcast %cst_5 : f32 to vector<512x1xf32>
    %11 = arith.subf %10, %9 : vector<512x1xf32>
    %12 = math.exp %11 : vector<512x1xf32>
    %cst_6 = arith.constant 1.000000e+00 : f32
    %13 = vector.broadcast %cst_6 : f32 to vector<512x1xf32>
    %14 = arith.addf %13, %12 : vector<512x1xf32>
    %cst_7 = arith.constant 1.000000e+00 : f32
    %15 = vector.broadcast %cst_7 : f32 to vector<512x1xf32>
    %16 = arith.divf %15, %14 : vector<512x1xf32>
    %c0_8 = arith.constant 0 : index
    %c0_9 = arith.constant 0 : index
    %17 = vector.load %arg3[%c0_8, %c0_9] : memref<512x1xf32, #tpu.memory_space<vmem>>, vector<512x1xf32>
    tpu.vector_store %arg3[%c0_8, %c0_9], %16 {strides = array<i32>} : memref<512x1xf32, #tpu.memory_space<vmem>>, vector<512x1xf32>,
    return
  }
}

</mosaic_0001>

<bundles_post_ra>
// kernel: convnet_forward.14
= control target key start
LH: loop header
LB: loop body
LE: loop exit
PB: predicated region body
PF: predicated region fallthrough
CT: control target
= control target key end

     0   :  { %v205_v0 = vmov 0   ;;  %v32_v3 = vlaneseq  ;;  %v206_v7 = vmov 1983009808   ;;  %vm92_vm0 = vcmask 1041408   ;;  %s288_s3 = inlined_call_operand.<no memory space> [shape: f32[1,1], index: 3, kind: input, shape index: {}]   ;;  %s289_s1 = inlined_call_operand.vmem [shape: f32[1,256], index: 1, kind: input, shape index: {}]   ;;  %s290_s2 = inlined_call_operand.vmem [shape: f32[1,256], index: 2, kind: input, shape index: {}]   ;;  %s291_s0 = inlined_call_operand.vmem [shape: f32[2,256], index: 0, kind: input, shape index: {}]   ;;  %s292_s4 = inlined_call_operand.<no memory space> [shape: f32[1,1], index: 4, kind: input, shape index: {}]   ;;  %s293_s5 = inlined_call_operand.<no memory space> [shape: f32[1,1], index: 5, kind: input, shape index: {}]   ;;  %s294_s6 = inlined_call_operand.vmem [shape: bf16[2,256], index: 6, kind: output, shape index: {}]  }
   0x1   :  { %201 = vset.pattern.permute.xlu0 %v205_v0  ;;  %v11_v1 = vstv %s288_s3  ;;  %202 = vset.pattern.permute.xlu1 %v205_v0  ;;  %v42_v8 = vunpack.c.l.s4 %v206_v7  ;;  %v30_v9 = vld [vmem:[%s289_s1] sm:$0x3]  ;;  %v13_v47 = vstv %s292_s4  ;;  %v15_v48 = vstv %s293_s5 }
   0x2   :  { %12 = vst [vmem:[#allocation2] sm:$0x1] %v11_v1  ;;  %v246_v4 = vshrl.u32 %v32_v3, 7  ;;  %v50_v13 = vld [vmem:[%s290_s2] sm:$0x3] }
   0x3   :  { %v43_v10 = vunpack.c.0.s8 %v42_v8  ;;  %v29_v20 = vld [vmem:[%s291_s0] sm:$0xf]  ;;  %14 = vst [vmem:[#allocation3] sm:$0x1] %v13_v47  ;;  %16 = vst [vmem:[#allocation4] sm:$0x1] %v15_v48 }
   0x4   :  { %v249_v5 = vsub.s32 0, %v246_v4  ;;  %v38_v6 = vsub.s32 1, %v246_v4 }
   0x5   :  { %v260_v14 = vsub.s32 %v43_v10, %v246_v4 }
   0x6   :  { %v35_v11 = vrot.slane %v30_v9, %v249_v5  ;;  %v39_v12 = vrot.slane %v30_v9, %v38_v6  ;;  %v55_v16 = vrot.slane %v50_v13, %v249_v5  ;;  %v59_v17 = vrot.slane %v50_v13, %v38_v6 }
   0x8   :  { %v40_v15 = vcombine.low %v35_v11, %v39_v12  ;;  %v60_v19 = vcombine.low %v55_v16, %v59_v17 }
   0x9   :  { %v194_v2 = vld [vmem:[#allocation2] ss:$0 sm:$0xff] }
   0xa   :  { %77 = vperm.xlu0 %201, %v194_v2   ;;  %v47_v18 = vrot.slane %v40_v15, %v260_v14  ;;  %v67_v22 = vrot.slane %v60_v19, %v260_v14  ;;  %v132_v59 = vld [vmem:[#allocation3] sm:$0x1]  ;;  %v195_v63 = vld [vmem:[#allocation4] ss:$0 sm:$0xff]  ;;  %v207_v2 = vmov 1966171168  }
   0xb   :  { %v175_v3 = vunpack.c.l.s4 %v207_v2 }
   0xc   :  { %v49_v21 = vsub.f32 %v29_v20, %v47_v18 }
   0xd   :  { %v176_v8 = vunpack.c.0.s8 %v175_v3 }
   0xe   :  { %v69_v23 = vmul.f32 %v67_v22, %v49_v21 }
   0xf   :  { %v179_v11 = vsub.s32 %v176_v8, %v246_v4 }
  0x85   :  { %v78_v24 = vpop.permute.xlu0 %77 }
  0x86   :  { %v80_v25 = vmul.f32 %v78_v24, %v69_v23 }
  0x88   :  { %v88_v26 = vrot.slane %v80_v25, %v260_v14 }
  0x8a   :  { %v89_v27 = vcombine.high %v88_v26, %v88_v26  ;;  %v93_v28 = vsel %vm92_vm0, %v88_v26, 0.0 }
  0x8c   :  { %v94_v29 = vsel %vm92_vm0, %v89_v27, 0.0 }
  0x8d   :  { %v95_v30 = vadd.f32 %v94_v29, %v93_v28 }
  0x8f   :  { %96 = vadd.xlane.f32.xlu0 %v95_v30 }
 0x118   :  { %v97_v31 = vpop.xlane.xlu0 %96 }
 0x119   :  { %v98_v32 = vsel %vm92_vm0, %v97_v31, 0.0 }
 0x11a   :  { %v99_v33 = vrot.slane %v98_v32, 4 }
 0x11c   :  { %v100_v34 = vadd.f32 %v99_v33, %v98_v32 }
 0x11e   :  { %v101_v35 = vrot.slane %v100_v34, 2 }
 0x120   :  { %v102_v36 = vadd.f32 %v101_v35, %v100_v34 }
 0x122   :  { %v103_v37 = vrot.slane %v102_v36, 1 }
 0x124   :  { %v104_v38 = vadd.f32 %v103_v37, %v102_v36 }
 0x126   :  { %v105_v39 = vmul.f32 0.001953125, %v104_v38 }
 0x128   :  { %v106_v40 = vsub.f32 %v80_v25, %v105_v39 }
 0x12a   :  { %v107_v41 = vmul.f32 %v106_v40, %v106_v40 }
 0x12c   :  { %v115_v42 = vrot.slane %v107_v41, %v260_v14 }
 0x12e   :  { %v116_v43 = vcombine.high %v115_v42, %v115_v42  ;;  %v119_v44 = vsel %vm92_vm0, %v115_v42, 0.0 }
 0x130   :  { %v120_v45 = vsel %vm92_vm0, %v116_v43, 0.0 }
 0x131   :  { %v121_v46 = vadd.f32 %v120_v45, %v119_v44 }
 0x133   :  { %122 = vadd.xlane.f32.xlu1 %v121_v46 }
 0x1bc   :  { %v123_v49 = vpop.xlane.xlu1 %122 }
 0x1bd   :  { %v124_v50 = vsel %vm92_vm0, %v123_v49, 0.0 }
 0x1be   :  { %v125_v51 = vrot.slane %v124_v50, 4 }
 0x1c0   :  { %v126_v52 = vadd.f32 %v125_v51, %v124_v50 }
 0x1c2   :  { %v127_v53 = vrot.slane %v126_v52, 2 }
 0x1c4   :  { %v128_v54 = vadd.f32 %v127_v53, %v126_v52 }
 0x1c6   :  { %v129_v55 = vrot.slane %v128_v54, 1 }
 0x1c8   :  { %v130_v56 = vadd.f32 %v129_v55, %v128_v54 }
 0x1ca   :  { %v131_v57 = vmul.f32 0.001953125, %v130_v56 }
 0x1cc   :  { %v133_v58 = vadd.f32 1e-05, %v131_v57 }
 0x1ce   :  { %203 = vrsqrt.f32 %v133_v58 }
 0x1db   :  { %v204_v60 = vpop.eup %203 }
 0x1dc   :  { %v135_v61 = vmul.f32 %v204_v60, %v132_v59 }
 0x1de   :  { %v140_v62 = vrot.slane %v135_v61, %v249_v5 }
 0x1e0   :  { %142 = vperm.xlu1 %202, %v140_v62  }
 0x1e4   :  { %153 = vperm.xlu1 %202, %v195_v63  }
 0x25b   :  { %v143_v0 = vpop.permute.xlu1 %142 }
 0x25c   :  { %v145_v1 = vmul.f32 %v143_v0, %v106_v40 }
 0x25f   :  { %v154_v6 = vpop.permute.xlu1 %153 }
 0x260   :  { %v156_v7 = vadd.f32 %v154_v6, %v145_v1 }
 0x262   :  { %v157_v9 = vmax.f32 %v156_v7, 0.0 }
 0x264   :  { %v165_v10 = vrot.slane %v157_v9, %v260_v14 }
 0x266   :  { %v166_v12 = vcombine.high %v165_v10, %v165_v10 }
 0x268   :  { %v196_v13 = vpack.c.bf16 %v166_v12, %v165_v10 }
 0x26a   :  { %v180_v15 = vrot.slane %v196_v13, %v179_v11 }
 0x26c   :  { %197 = vst.sshfl [vmem:[%s294_s6] sm:$0x5 pattern:$0x73625140] %v180_v15 }

// kernel: convnet_forward.16
= control target key start
LH: loop header
LB: loop body
LE: loop exit
PB: predicated region body
PF: predicated region fallthrough
CT: control target
= control target key end

     0   :  { %vm129_vm0 = vcmask 60416   ;;  %s431_s0 = inlined_call_operand.vmem [shape: bf16[128,8], index: 0, kind: input, shape index: {}]   ;;  %s432_s1 = inlined_call_operand.vmem [shape: bf16[128,8], index: 1, kind: input, shape index: {}]   ;;  %s433_s2 = inlined_call_operand.vmem [shape: bf16[128,8], index: 2, kind: input, shape index: {}]   ;;  %s434_s3 = inlined_call_operand.vmem [shape: bf16[128,8], index: 3, kind: input, shape index: {}]   ;;  %s435_s4 = inlined_call_operand.vmem [shape: bf16[128,8], index: 4, kind: output, shape index: {}]  }
   0x1   :  { %v17_v0 = vld [vmem:[%s431_s0] sm:$0xf]  ;;  %v18_v5 = vld [vmem:[%s431_s0 + $0x4] sm:$0xf]  ;;  %v19_v11 = vld [vmem:[%s431_s0 + $0x8] sm:$0xf] }
   0x2   :  { %v33_v1 = vld [vmem:[%s432_s1] sm:$0xf]  ;;  %v34_v6 = vld [vmem:[%s432_s1 + $0x4] sm:$0xf]  ;;  %v35_v13 = vld [vmem:[%s432_s1 + $0x8] sm:$0xf] }
   0x3   :  { %v65_v2 = vld [vmem:[%s433_s2] sm:$0xf]  ;;  %v49_v3 = vmax.bf16 %v33_v1, %v17_v0  ;;  %v50_v8 = vmax.bf16 %v34_v6, %v18_v5  ;;  %v66_v9 = vld [vmem:[%s433_s2 + $0x4] sm:$0xf]  ;;  %v67_v14 = vld [vmem:[%s433_s2 + $0x8] sm:$0xf]  ;;  %v51_v17 = vmax.bf16 %v35_v13, %v19_v11 }
   0x4   :  { %v81_v4 = vld [vmem:[%s434_s3] sm:$0xf]  ;;  %v82_v10 = vld [vmem:[%s434_s3 + $0x4] sm:$0xf]  ;;  %v83_v15 = vld [vmem:[%s434_s3 + $0x8] sm:$0xf] }
   0x5   :  { %v97_v7 = vmax.bf16 %v81_v4, %v65_v2  ;;  %v98_v12 = vmax.bf16 %v82_v10, %v66_v9  ;;  %v99_v18 = vmax.bf16 %v83_v15, %v67_v14  ;;  %v20_v19 = vld [vmem:[%s431_s0 + $0xc] sm:$0xf]  ;;  %v21_v25 = vld [vmem:[%s431_s0 + $0x10] sm:$0xf]  ;;  %v22_v32 = vld [vmem:[%s431_s0 + $0x14] sm:$0xf] }
   0x6   :  { %v36_v20 = vld [vmem:[%s432_s1 + $0xc] sm:$0xf]  ;;  %v37_v26 = vld [vmem:[%s432_s1 + $0x10] sm:$0xf]  ;;  %v38_v34 = vld [vmem:[%s432_s1 + $0x14] sm:$0xf] }
   0x7   :  { %v113_v16 = vmax.bf16 %v97_v7, %v49_v3  ;;  %v68_v21 = vld [vmem:[%s433_s2 + $0xc] sm:$0xf]  ;;  %v114_v22 = vmax.bf16 %v98_v12, %v50_v8  ;;  %v52_v23 = vmax.bf16 %v36_v20, %v20_v19  ;;  %v115_v27 = vmax.bf16 %v99_v18, %v51_v17  ;;  %v69_v30 = vld [vmem:[%s433_s2 + $0x10] sm:$0xf]  ;;  %v70_v35 = vld [vmem:[%s433_s2 + $0x14] sm:$0xf] }
   0x8   :  { %v84_v24 = vld [vmem:[%s434_s3 + $0xc] sm:$0xf]  ;;  %v53_v29 = vmax.bf16 %v37_v26, %v21_v25  ;;  %v85_v31 = vld [vmem:[%s434_s3 + $0x10] sm:$0xf]  ;;  %v86_v36 = vld [vmem:[%s434_s3 + $0x14] sm:$0xf]  ;;  %v54_v38 = vmax.bf16 %v38_v34, %v22_v32 }
   0x9   :  { %130 = vst.msk [vmem:[%s435_s4] sm:$0xf] %vm129_vm0, %v113_v16  ;;  %v100_v28 = vmax.bf16 %v84_v24, %v68_v21  ;;  %131 = vst.msk [vmem:[%s435_s4 + $0x4] sm:$0xf] %vm129_vm0, %v114_v22  ;;  %v101_v33 = vmax.bf16 %v85_v31, %v69_v30  ;;  %v102_v39 = vmax.bf16 %v86_v36, %v70_v35  ;;  %v23_v40 = vld [vmem:[%s431_s0 + $0x18] sm:$0xf] }
   0xa   :  { %132 = vst.msk [vmem:[%s435_s4 + $0x8] sm:$0xf] %vm129_vm0, %v115_v27  ;;  %v39_v41 = vld [vmem:[%s432_s1 + $0x18] sm:$0xf]  ;;  %v24_v46 = vld [vmem:[%s431_s0 + $0x1c] sm:$0xf] }
   0xb   :  { %v116_v37 = vmax.bf16 %v100_v28, %v52_v23  ;;  %v71_v42 = vld [vmem:[%s433_s2 + $0x18] sm:$0xf]  ;;  %v117_v43 = vmax.bf16 %v101_v33, %v53_v29  ;;  %v55_v44 = vmax.bf16 %v39_v41, %v23_v40  ;;  %v40_v47 = vld [vmem:[%s432_s1 + $0x1c] sm:$0xf]  ;;  %v118_v48 = vmax.bf16 %v102_v39, %v54_v38  ;;  %v25_v53 = vld [vmem:[%s431_s0 + $0x20] sm:$0xf] }
   0xc   :  { %v87_v45 = vld [vmem:[%s434_s3 + $0x18] sm:$0xf]  ;;  %v56_v50 = vmax.bf16 %v40_v47, %v24_v46  ;;  %v72_v51 = vld [vmem:[%s433_s2 + $0x1c] sm:$0xf]  ;;  %v41_v55 = vld [vmem:[%s432_s1 + $0x20] sm:$0xf] }
   0xd   :  { %133 = vst.msk [vmem:[%s435_s4 + $0xc] sm:$0xf] %vm129_vm0, %v116_v37  ;;  %v103_v49 = vmax.bf16 %v87_v45, %v71_v42  ;;  %v88_v52 = vld [vmem:[%s434_s3 + $0x1c] sm:$0xf]  ;;  %134 = vst.msk [vmem:[%s435_s4 + $0x10] sm:$0xf] %vm129_vm0, %v117_v43  ;;  %v57_v59 = vmax.bf16 %v41_v55, %v25_v53 }
   0xe   :  { %v104_v54 = vmax.bf16 %v88_v52, %v72_v51  ;;  %v73_v56 = vld [vmem:[%s433_s2 + $0x20] sm:$0xf]  ;;  %135 = vst.msk [vmem:[%s435_s4 + $0x14] sm:$0xf] %vm129_vm0, %v118_v48  ;;  %v26_v61 = vld [vmem:[%s431_s0 + $0x24] sm:$0xf] }
   0xf   :  { %v89_v57 = vld [vmem:[%s434_s3 + $0x20] sm:$0xf]  ;;  %v119_v58 = vmax.bf16 %v103_v49, %v55_v44  ;;  %v42_v62 = vld [vmem:[%s432_s1 + $0x24] sm:$0xf]  ;;  %v27_v3 = vld [vmem:[%s431_s0 + $0x28] sm:$0xf] }
  0x10   :  { %v105_v60 = vmax.bf16 %v89_v57, %v73_v56  ;;  %v74_v63 = vld [vmem:[%s433_s2 + $0x24] sm:$0xf]  ;;  %v120_v0 = vmax.bf16 %v104_v54, %v56_v50  ;;  %v58_v1 = vmax.bf16 %v42_v62, %v26_v61  ;;  %v43_v4 = vld [vmem:[%s432_s1 + $0x28] sm:$0xf]  ;;  %v28_v10 = vld [vmem:[%s431_s0 + $0x2c] sm:$0xf] }
  0x11   :  { %v90_v2 = vld [vmem:[%s434_s3 + $0x24] sm:$0xf]  ;;  %136 = vst.msk [vmem:[%s435_s4 + $0x18] sm:$0xf] %vm129_vm0, %v119_v58  ;;  %v59_v7 = vmax.bf16 %v43_v4, %v27_v3  ;;  %v75_v8 = vld [vmem:[%s433_s2 + $0x28] sm:$0xf] }
  0x12   :  { %v121_v5 = vmax.bf16 %v105_v60, %v57_v59  ;;  %v106_v6 = vmax.bf16 %v90_v2, %v74_v63  ;;  %v91_v9 = vld [vmem:[%s434_s3 + $0x28] sm:$0xf]  ;;  %137 = vst.msk [vmem:[%s435_s4 + $0x1c] sm:$0xf] %vm129_vm0, %v120_v0  ;;  %v44_v12 = vld [vmem:[%s432_s1 + $0x2c] sm:$0xf] }
  0x13   :  { %v107_v11 = vmax.bf16 %v91_v9, %v75_v8  ;;  %v76_v13 = vld [vmem:[%s433_s2 + $0x2c] sm:$0xf]  ;;  %v60_v16 = vmax.bf16 %v44_v12, %v28_v10  ;;  %v29_v18 = vld [vmem:[%s431_s0 + $0x30] sm:$0xf]  ;;  %v30_v24 = vld [vmem:[%s431_s0 + $0x34] sm:$0xf] }
  0x14   :  { %v92_v14 = vld [vmem:[%s434_s3 + $0x2c] sm:$0xf]  ;;  %138 = vst.msk [vmem:[%s435_s4 + $0x20] sm:$0xf] %vm129_vm0, %v121_v5  ;;  %v122_v15 = vmax.bf16 %v106_v6, %v58_v1  ;;  %v45_v19 = vld [vmem:[%s432_s1 + $0x30] sm:$0xf] }
  0x15   :  { %v108_v17 = vmax.bf16 %v92_v14, %v76_v13  ;;  %v77_v20 = vld [vmem:[%s433_s2 + $0x30] sm:$0xf]  ;;  %v123_v21 = vmax.bf16 %v107_v11, %v59_v7  ;;  %v61_v22 = vmax.bf16 %v45_v19, %v29_v18  ;;  %v46_v25 = vld [vmem:[%s432_s1 + $0x34] sm:$0xf]  ;;  %v31_v31 = vld [vmem:[%s431_s0 + $0x38] sm:$0xf] }
  0x16   :  { %v93_v23 = vld [vmem:[%s434_s3 + $0x30] sm:$0xf]  ;;  %139 = vst.msk [vmem:[%s435_s4 + $0x24] sm:$0xf] %vm129_vm0, %v122_v15  ;;  %v62_v28 = vmax.bf16 %v46_v25, %v30_v24  ;;  %v78_v29 = vld [vmem:[%s433_s2 + $0x34] sm:$0xf] }
  0x17   :  { %v124_v26 = vmax.bf16 %v108_v17, %v60_v16  ;;  %v109_v27 = vmax.bf16 %v93_v23, %v77_v20  ;;  %v94_v30 = vld [vmem:[%s434_s3 + $0x34] sm:$0xf]  ;;  %140 = vst.msk [vmem:[%s435_s4 + $0x28] sm:$0xf] %vm129_vm0, %v123_v21  ;;  %v47_v33 = vld [vmem:[%s432_s1 + $0x38] sm:$0xf] }
  0x18   :  { %v110_v32 = vmax.bf16 %v94_v30, %v78_v29  ;;  %v79_v34 = vld [vmem:[%s433_s2 + $0x38] sm:$0xf]  ;;  %v63_v37 = vmax.bf16 %v47_v33, %v31_v31  ;;  %v32_v39 = vld [vmem:[%s431_s0 + $0x3c] sm:$0xf] }
  0x19   :  { %v95_v35 = vld [vmem:[%s434_s3 + $0x38] sm:$0xf]  ;;  %141 = vst.msk [vmem:[%s435_s4 + $0x2c] sm:$0xf] %vm129_vm0, %v124_v26  ;;  %v125_v36 = vmax.bf16 %v109_v27, %v61_v22  ;;  %v48_v40 = vld [vmem:[%s432_s1 + $0x3c] sm:$0xf] }
  0x1a   :  { %v111_v38 = vmax.bf16 %v95_v35, %v79_v34  ;;  %v80_v41 = vld [vmem:[%s433_s2 + $0x3c] sm:$0xf]  ;;  %v126_v42 = vmax.bf16 %v110_v32, %v62_v28  ;;  %v64_v43 = vmax.bf16 %v48_v40, %v32_v39 }
  0x1b   :  { %v96_v44 = vld [vmem:[%s434_s3 + $0x3c] sm:$0xf]  ;;  %142 = vst.msk [vmem:[%s435_s4 + $0x30] sm:$0xf] %vm129_vm0, %v125_v36 }
  0x1c   :  { %v127_v45 = vmax.bf16 %v111_v38, %v63_v37  ;;  %v112_v46 = vmax.bf16 %v96_v44, %v80_v41  ;;  %143 = vst.msk [vmem:[%s435_s4 + $0x34] sm:$0xf] %vm129_vm0, %v126_v42 }
  0x1e   :  { %144 = vst.msk [vmem:[%s435_s4 + $0x38] sm:$0xf] %vm129_vm0, %v127_v45  ;;  %v128_v47 = vmax.bf16 %v112_v46, %v64_v43 }
  0x20   :  { %145 = vst.msk [vmem:[%s435_s4 + $0x3c] sm:$0xf] %vm129_vm0, %v128_v47 }

// kernel: convnet_forward.15
= control target key start
LH: loop header
LB: loop body
LE: loop exit
PB: predicated region body
PF: predicated region fallthrough
CT: control target
= control target key end

     0   :  { %vm354_vm0 = vcmask 1043456   ;;  %vm355_vm1 = vcmask 1044480   ;;  %v1919_v1 = vmov 65535   ;;  %vm257_vm2 = vcmask 203776   ;;  %s3819_s1 = inlined_call_operand.vmem [shape: bf16[25,8], index: 1, kind: input, shape index: {}]   ;;  %s3820_s0 = inlined_call_operand.vmem [shape: bf16[512,25], index: 0, kind: input, shape index: {}]   ;;  %s3821_s2 = inlined_call_operand.vmem [shape: f32[1,8], index: 2, kind: input, shape index: {}]   ;;  %s3822_s3 = inlined_call_operand.vmem [shape: f32[1,8], index: 3, kind: input, shape index: {}]   ;;  %s3823_s4 = inlined_call_operand.vmem [shape: bf16[512,8], index: 4, kind: output, shape index: {}]  }
   0x1   :  { %v1883_v0 = vld [vmem:[%s3819_s1 + $0x8] sm:$0x1f]   ;;  %v356_v2 = vsel %vm354_vm0, 4294967295, %v1919_v1  ;;  %v1885_v4 = vld [vmem:[%s3820_s0] sm:$0xff]   ;;  %v1887_v8 = vld [vmem:[%s3820_s0 + $0x10] sm:$0xff]   ;;  %vm652_vm3 = vcmask 64512  }
   0x2   :  { %v357_v3 = vsel %vm355_vm1, %v356_v2, 0  ;;  %v1884_v6 = vld [vmem:[%s3819_s1] sm:$0xff]   ;;  %1814 = vmatprep.mubr.msk.bf16.mxu0 %vm257_vm2, %v1885_v4  ;;  %v1886_v7 = vld [vmem:[%s3820_s0 + $0x8] sm:$0xff]   ;;  %v1888_v9 = vld [vmem:[%s3820_s0 + $0x18] sm:$0xff]   ;;  %vm1512_vm4 = vcmask 60416  }
   0x3   :  { %v359_v5 = vand.u32 %v1883_v0, %v357_v3  ;;  %v1889_v10 = vld [vmem:[%s3820_s0 + $0x20] sm:$0xff]   ;;  %v1902_v12 = vld [vmem:[%s3820_s0 + $0x88] sm:$0xff]   ;;  %v1903_v13 = vld [vmem:[%s3820_s0 + $0x90] sm:$0xff]  }
   0x4   :  { %v1901_v11 = vld [vmem:[%s3820_s0 + $0x80] sm:$0xff]   ;;  %v1890_v14 = vld [vmem:[%s3820_s0 + $0x28] sm:$0xff]   ;;  %v1891_v15 = vld [vmem:[%s3820_s0 + $0x30] sm:$0xff]  }
   0x5   :  { %1810 = vmatprep.subr.bf16.mxu0 %v359_v5  ;;  %1878 = vmatprep.subr.bf16.mxu1 %v359_v5  ;;  %v1904_v16 = vld [vmem:[%s3820_s0 + $0x98] sm:$0xff]   ;;  %v1905_v17 = vld [vmem:[%s3820_s0 + $0xa0] sm:$0xff]   ;;  %v1906_v19 = vld [vmem:[%s3820_s0 + $0xa8] sm:$0xff]  }
   0x6   :  { %1811 = vmatpush3.bf16.msra.mxu0 %v359_v5  ;;  %1880 = vmatpush3.bf16.msra.mxu1 %v359_v5  ;;  %v1892_v18 = vld [vmem:[%s3820_s0 + $0x38] sm:$0xff]   ;;  %v1893_v20 = vld [vmem:[%s3820_s0 + $0x40] sm:$0xff]   ;;  %v1907_v21 = vld [vmem:[%s3820_s0 + $0xb0] sm:$0xff]  }
   0x7   :  { %1812 = vmatprep.subr.bf16.mxu0 %v1884_v6  ;;  %1879 = vmatprep.subr.bf16.mxu1 %v1884_v6  ;;  %v1894_v22 = vld [vmem:[%s3820_s0 + $0x48] sm:$0xff]   ;;  %v1908_v23 = vld [vmem:[%s3820_s0 + $0xb8] sm:$0xff]   ;;  %v1895_v24 = vld [vmem:[%s3820_s0 + $0x50] sm:$0xff]  }
   0x8   :  { %1846 = vmatprep.mubr.msk.bf16.mxu1 %vm257_vm2, %v1901_v11  ;;  %v1909_v25 = vld [vmem:[%s3820_s0 + $0xc0] sm:$0xff]   ;;  %v1896_v26 = vld [vmem:[%s3820_s0 + $0x58] sm:$0xff]   ;;  %v1910_v27 = vld [vmem:[%s3820_s0 + $0xc8] sm:$0xff]  }
   0x9   :  { %v1897_v28 = vld [vmem:[%s3820_s0 + $0x60] sm:$0xff]   ;;  %v1911_v29 = vld [vmem:[%s3820_s0 + $0xd0] sm:$0xff]   ;;  %v1898_v30 = vld [vmem:[%s3820_s0 + $0x68] sm:$0xff]  }
   0xa   :  { %1813 = vmatpush3.bf16.msra.mxu0 %v1884_v6  ;;  %1881 = vmatpush3.bf16.msra.mxu1 %v1884_v6  ;;  %v1912_v31 = vld [vmem:[%s3820_s0 + $0xd8] sm:$0xff]   ;;  %v1899_v32 = vld [vmem:[%s3820_s0 + $0x70] sm:$0xff]   ;;  %v1913_v33 = vld [vmem:[%s3820_s0 + $0xe0] sm:$0xff]  }
   0xb   :  { %v1900_v34 = vld [vmem:[%s3820_s0 + $0x78] sm:$0xff]   ;;  %v1914_v35 = vld [vmem:[%s3820_s0 + $0xe8] sm:$0xff]   ;;  %v1915_v36 = vld [vmem:[%s3820_s0 + $0xf0] sm:$0xff]  }
   0xc   :  { %v1916_v37 = vld [vmem:[%s3820_s0 + $0xf8] sm:$0xff]  }
   0xd   :  { %1815 = vmatmul.mubr.msk.bf16.vlgmr.msra.gmra.mxu0 %vm257_vm2, %v1886_v7  ;;  %1847 = vmatmul.mubr.msk.bf16.vlgmr.msra.gmra.mxu1 %vm257_vm2, %v1902_v12 }
   0xe   :  { %1818 = vmatprep.mubr.msk.bf16.mxu0 %vm257_vm2, %v1887_v8  ;;  %1850 = vmatprep.mubr.msk.bf16.mxu1 %vm257_vm2, %v1903_v13 }
  0x15   :  { %1819 = vmatmul.mubr.msk.bf16.gmra.mxu0 %vm257_vm2, %v1888_v9  ;;  %1851 = vmatmul.mubr.msk.bf16.gmra.mxu1 %vm257_vm2, %v1904_v16 }
  0x16   :  { %1822 = vmatprep.mubr.msk.bf16.mxu0 %vm257_vm2, %v1889_v10  ;;  %1854 = vmatprep.mubr.msk.bf16.mxu1 %vm257_vm2, %v1905_v17 }
  0x1d   :  { %1823 = vmatmul.mubr.msk.bf16.gmra.mxu0 %vm257_vm2, %v1890_v14  ;;  %1855 = vmatmul.mubr.msk.bf16.gmra.mxu1 %vm257_vm2, %v1906_v19 }
  0x1e   :  { %1826 = vmatprep.mubr.msk.bf16.mxu0 %vm257_vm2, %v1891_v15  ;;  %1858 = vmatprep.mubr.msk.bf16.mxu1 %vm257_vm2, %v1907_v21 }
  0x25   :  { %1827 = vmatmul.mubr.msk.bf16.gmra.mxu0 %vm257_vm2, %v1892_v18  ;;  %1859 = vmatmul.mubr.msk.bf16.gmra.mxu1 %vm257_vm2, %v1908_v23 }
  0x26   :  { %1830 = vmatprep.mubr.msk.bf16.mxu0 %vm257_vm2, %v1893_v20  ;;  %1862 = vmatprep.mubr.msk.bf16.mxu1 %vm257_vm2, %v1909_v25 }
  0x2d   :  { %1831 = vmatmul.mubr.msk.bf16.gmra.mxu0 %vm257_vm2, %v1894_v22  ;;  %1863 = vmatmul.mubr.msk.bf16.gmra.mxu1 %vm257_vm2, %v1910_v27 }
  0x2e   :  { %1834 = vmatprep.mubr.msk.bf16.mxu0 %vm257_vm2, %v1895_v24  ;;  %1866 = vmatprep.mubr.msk.bf16.mxu1 %vm257_vm2, %v1911_v29 }
  0x35   :  { %1835 = vmatmul.mubr.msk.bf16.gmra.mxu0 %vm257_vm2, %v1896_v26  ;;  %1867 = vmatmul.mubr.msk.bf16.gmra.mxu1 %vm257_vm2, %v1912_v31 }
  0x36   :  { %1838 = vmatprep.mubr.msk.bf16.mxu0 %vm257_vm2, %v1897_v28  ;;  %1870 = vmatprep.mubr.msk.bf16.mxu1 %vm257_vm2, %v1913_v33 }
  0x3d   :  { %1839 = vmatmul.mubr.msk.bf16.gmra.mxu0 %vm257_vm2, %v1898_v30  ;;  %1871 = vmatmul.mubr.msk.bf16.gmra.mxu1 %vm257_vm2, %v1914_v35 }
  0x3e   :  { %1842 = vmatprep.mubr.msk.bf16.mxu0 %vm257_vm2, %v1899_v32  ;;  %1874 = vmatprep.mubr.msk.bf16.mxu1 %vm257_vm2, %v1915_v36 }
  0x45   :  { %1843 = vmatmul.mubr.msk.bf16.gmra.mxu0 %vm257_vm2, %v1900_v34  ;;  %1875 = vmatmul.mubr.msk.bf16.gmra.mxu1 %vm257_vm2, %v1916_v37 }
  0xcd   :  { %v2079_v38 = vpop.f32.mrf.mxu0  ;;  %v2093_v46 = vpop.f32.mrf.mxu1 }
  0xce   :  { %v656_v47 = vsel %vm652_vm3, %v2079_v38, 0.0 }
  0xcf   :  { %v2081_v39 = vpop.f32.mrf.mxu0  ;;  %v2099_v50 = vpop.f32.mrf.mxu1 }
  0xd0   :  { %v653_v42 = vsel %vm652_vm3, %v2081_v39, 0.0 }
  0xd1   :  { %v2083_v40 = vpop.f32.mrf.mxu0  ;;  %v2105_v54 = vpop.f32.mrf.mxu1 }
  0xd2   :  { %v658_v51 = vsel %vm652_vm3, %v2083_v40, 0.0 }
  0xd3   :  { %v2085_v41 = vpop.f32.mrf.mxu0  ;;  %v2115_v61 = vpop.f32.mrf.mxu1 }
  0xd4   :  { %v654_v43 = vsel %vm652_vm3, %v2085_v41, 0.0 }
  0xd5   :  { %v655_v44 = vadd.f32 %v654_v43, %v653_v42  ;;  %v2091_v45 = vpop.f32.mrf.mxu0  ;;  %v2125_v4 = vpop.f32.mrf.mxu1 }
  0xd6   :  { %v664_v62 = vsel %vm652_vm3, %v2091_v45, 0.0 }
  0xd7   :  { %v657_v48 = vadd.f32 %v656_v47, %v655_v44  ;;  %v2097_v49 = vpop.f32.mrf.mxu0  ;;  %v2135_v11 = vpop.f32.mrf.mxu1 }
  0xd8   :  { %v660_v55 = vsel %vm652_vm3, %v2097_v49, 0.0 }
  0xd9   :  { %v659_v52 = vadd.f32 %v658_v51, %v657_v48  ;;  %v2103_v53 = vpop.f32.mrf.mxu0  ;;  %v2145_v18 = vpop.f32.mrf.mxu1 }
  0xda   :  { %v666_v1 = vsel %vm652_vm3, %v2103_v53, 0.0 }
  0xdb   :  { %v661_v56 = vadd.f32 %v660_v55, %v659_v52  ;;  %v2109_v57 = vpop.f32.mrf.mxu0  ;;  %v2155_v25 = vpop.f32.mrf.mxu1 }
  0xdc   :  { %v662_v58 = vsel %vm652_vm3, %v2109_v57, 0.0 }
  0xdd   :  { %v663_v59 = vadd.f32 %v662_v58, %v661_v56  ;;  %v2113_v60 = vpop.f32.mrf.mxu0  ;;  %v2165_v32 = vpop.f32.mrf.mxu1 }
  0xde   :  { %v672_v12 = vsel %vm652_vm3, %v2113_v60, 0.0  ;;  %3875 = vst [vmem:[#allocation2_spill] sm:$0xff] %v2165_v32 }
  0xdf   :  { %v665_v63 = vadd.f32 %v664_v62, %v663_v59  ;;  %v2119_v0 = vpop.f32.mrf.mxu0  ;;  %v2175_v43 = vpop.f32.mrf.mxu1 }
  0xe0   :  { %v668_v5 = vsel %vm652_vm3, %v2119_v0, 0.0  ;;  %3876 = vst [vmem:[#allocation3_spill] sm:$0xff] %v2175_v43 }
  0xe1   :  { %v667_v2 = vadd.f32 %v666_v1, %v665_v63  ;;  %v2123_v3 = vpop.f32.mrf.mxu0  ;;  %v2185_v56 = vpop.f32.mrf.mxu1 }
  0xe2   :  { %v674_v15 = vsel %vm652_vm3, %v2123_v3, 0.0 }
  0xe3   :  { %v669_v6 = vadd.f32 %v668_v5, %v667_v2  ;;  %v2129_v7 = vpop.f32.mrf.mxu0  ;;  %v2195_v5 = vpop.f32.mrf.mxu1 }
  0xe4   :  { %v670_v8 = vsel %vm652_vm3, %v2129_v7, 0.0 }
  0xe5   :  { %v671_v9 = vadd.f32 %v670_v8, %v669_v6  ;;  %v2133_v10 = vpop.f32.mrf.mxu0 }
  0xe6   :  { %v680_v26 = vsel %vm652_vm3, %v2133_v10, 0.0 }
  0xe7   :  { %v673_v13 = vadd.f32 %v672_v12, %v671_v9  ;;  %v2139_v14 = vpop.f32.mrf.mxu0 }
  0xe8   :  { %v676_v19 = vsel %vm652_vm3, %v2139_v14, 0.0 }
  0xe9   :  { %v675_v16 = vadd.f32 %v674_v15, %v673_v13  ;;  %v2143_v17 = vpop.f32.mrf.mxu0 }
  0xea   :  { %v682_v29 = vsel %vm652_vm3, %v2143_v17, 0.0 }
  0xeb   :  { %v677_v20 = vadd.f32 %v676_v19, %v675_v16  ;;  %v2149_v21 = vpop.f32.mrf.mxu0  ;;  %v2205_v16 = vpop.f32.mrf.mxu1 }
  0xec   :  { %v678_v22 = vsel %vm652_vm3, %v2149_v21, 0.0  ;;  %3877 = vst [vmem:[#allocation4_spill] sm:$0xff] %v2205_v16 }
  0xed   :  { %v679_v23 = vadd.f32 %v678_v22, %v677_v20  ;;  %v2153_v24 = vpop.f32.mrf.mxu0 }
  0xee   :  { %v688_v44 = vsel %vm652_vm3, %v2153_v24, 0.0 }
  0xef   :  { %v681_v27 = vadd.f32 %v680_v26, %v679_v23  ;;  %v2159_v28 = vpop.f32.mrf.mxu0 }
  0xf0   :  { %v684_v33 = vsel %vm652_vm3, %v2159_v28, 0.0 }
  0xf1   :  { %v683_v30 = vadd.f32 %v682_v29, %v681_v27  ;;  %v2163_v31 = vpop.f32.mrf.mxu0  ;;  %v2215_v29 = vpop.f32.mrf.mxu1 }
  0xf2   :  { %v690_v51 = vsel %vm652_vm3, %v2163_v31, 0.0  ;;  %3878 = vst [vmem:[#allocation5_spill] sm:$0xff] %v2215_v29 }
  0xf3   :  { %v685_v34 = vadd.f32 %v684_v33, %v683_v30  ;;  %v2169_v35 = vpop.f32.mrf.mxu0 }
  0xf4   :  { %v686_v36 = vsel %vm652_vm3, %v2169_v35, 0.0 }
  0xf5   :  { %v687_v37 = vadd.f32 %v686_v36, %v685_v34  ;;  %v2173_v42 = vpop.f32.mrf.mxu0 }
  0xf6   :  { %v696_v6 = vsel %vm652_vm3, %v2173_v42, 0.0 }
  0xf7   :  { %v689_v47 = vadd.f32 %v688_v44, %v687_v37  ;;  %v2179_v48 = vpop.f32.mrf.mxu0 }
  0xf8   :  { %v692_v58 = vsel %vm652_vm3, %v2179_v48, 0.0 }
  0xf9   :  { %v691_v52 = vadd.f32 %v690_v51, %v689_v47  ;;  %v2183_v55 = vpop.f32.mrf.mxu0  ;;  %v2225_v47 = vpop.f32.mrf.mxu1 }
  0xfa   :  { %v698_v12 = vsel %vm652_vm3, %v2183_v55, 0.0 }
  0xfb   :  { %v693_v59 = vadd.f32 %v692_v58, %v691_v52  ;;  %v2189_v62 = vpop.f32.mrf.mxu0 }
  0xfc   :  { %v694_v63 = vsel %vm652_vm3, %v2189_v62, 0.0 }
  0xfd   :  { %v695_v1 = vadd.f32 %v694_v63, %v693_v59  ;;  %v2193_v2 = vpop.f32.mrf.mxu0 }
  0xfe   :  { %v704_v30 = vsel %vm652_vm3, %v2193_v2, 0.0 }
  0xff   :  { %v697_v8 = vadd.f32 %v696_v6, %v695_v1  ;;  %v2199_v9 = vpop.f32.mrf.mxu0  ;;  %v2233_v1 = vpop.f32.mrf.mxu1 }
 0x100   :  { %v700_v19 = vsel %vm652_vm3, %v2199_v9, 0.0 }
 0x101   :  { %v699_v13 = vadd.f32 %v698_v12, %v697_v8  ;;  %v2203_v15 = vpop.f32.mrf.mxu0 }
 0x102   :  { %v706_v36 = vsel %vm652_vm3, %v2203_v15, 0.0 }
 0x103   :  { %v701_v20 = vadd.f32 %v700_v19, %v699_v13  ;;  %v2209_v22 = vpop.f32.mrf.mxu0  ;;  %v2239_v19 = vpop.f32.mrf.mxu1 }
 0x104   :  { %v702_v23 = vsel %vm652_vm3, %v2209_v22, 0.0  ;;  %3879 = vst [vmem:[#allocation6_spill] sm:$0xff] %v2239_v19 }
 0x105   :  { %v703_v26 = vadd.f32 %v702_v23, %v701_v20  ;;  %v2213_v27 = vpop.f32.mrf.mxu0  ;;  %v716_v20 = vsel %vm652_vm3, %v2099_v50, 0.0 }
 0x106   :  { %v712_v6 = vsel %vm652_vm3, %v2213_v27, 0.0 }
 0x107   :  { %v705_v33 = vadd.f32 %v704_v30, %v703_v26  ;;  %v2219_v34 = vpop.f32.mrf.mxu0  ;;  %v718_v26 = vsel %vm652_vm3, %v2115_v61, 0.0 }
 0x108   :  { %v708_v51 = vsel %vm652_vm3, %v2219_v34, 0.0 }
 0x109   :  { %v707_v37 = vadd.f32 %v706_v36, %v705_v33  ;;  %v2223_v44 = vpop.f32.mrf.mxu0  ;;  %v2245_v33 = vpop.f32.mrf.mxu1  ;;  %v720_v36 = vsel %vm652_vm3, %v2093_v46, 0.0 }
 0x10a   :  { %v714_v12 = vsel %vm652_vm3, %v2223_v44, 0.0  ;;  %3880 = vst [vmem:[#allocation7_spill] sm:$0xff] %v2245_v33 }
 0x10b   :  { %v709_v52 = vadd.f32 %v708_v51, %v707_v37  ;;  %v2229_v58 = vpop.f32.mrf.mxu0  ;;  %v722_v51 = vsel %vm652_vm3, %v2105_v54, 0.0 }
 0x10c   :  { %v710_v59 = vsel %vm652_vm3, %v2229_v58, 0.0 }
 0x10d   :  { %v711_v63 = vadd.f32 %v710_v59, %v709_v52  ;;  %v2251_v59 = vpop.f32.mrf.mxu1 }
 0x10f   :  { %v713_v8 = vadd.f32 %v712_v6, %v711_v63  ;;  %v724_v63 = vsel %vm652_vm3, %v2135_v11, 0.0 }
 0x111   :  { %v715_v13 = vadd.f32 %v714_v12, %v713_v8  ;;  %v726_v8 = vsel %vm652_vm3, %v2155_v25, 0.0 }
 0x113   :  { %v717_v23 = vadd.f32 %v716_v20, %v715_v13  ;;  %v2257_v13 = vpop.f32.mrf.mxu1  ;;  %v728_v20 = vsel %vm652_vm3, %v2125_v4, 0.0 }
 0x115   :  { %v719_v30 = vadd.f32 %v718_v26, %v717_v23  ;;  %v730_v26 = vsel %vm652_vm3, %v2145_v18, 0.0 }
 0x117   :  { %v721_v37 = vadd.f32 %v720_v36, %v719_v30  ;;  %v2263_v36 = vpop.f32.mrf.mxu1 }
 0x118   :  { %3881 = vst [vmem:[#allocation8_spill] sm:$0xff] %v2263_v36 }
 0x119   :  { %v723_v52 = vadd.f32 %v722_v51, %v721_v37  ;;  %v732_v37 = vsel %vm652_vm3, %v2175_v43, 0.0  ;;  %v740_v43 = vsel %vm652_vm3, %v2215_v29, 0.0  ;;  %v748_v29 = vsel %vm652_vm3, %v2245_v33, 0.0 }
 0x11b   :  { %v725_v6 = vadd.f32 %v724_v63, %v723_v52  ;;  %v734_v52 = vsel %vm652_vm3, %v2195_v5, 0.0 }
 0x11d   :  { %v727_v12 = vadd.f32 %v726_v8, %v725_v6  ;;  %v2269_v6 = vpop.f32.mrf.mxu1  ;;  %v736_v8 = vsel %vm652_vm3, %v2165_v32, 0.0  ;;  %v744_v32 = vsel %vm652_vm3, %v2205_v16, 0.0  ;;  %v752_v16 = vsel %vm652_vm3, %v2239_v19, 0.0 }
 0x11e   :  { %3882 = vst [vmem:[#allocation9_spill] sm:$0xff] %v2269_v6  ;;  %v756_v33 = vsel %vm652_vm3, %v2269_v6, 0.0  ;;  %v760_v19 = vsel %vm652_vm3, %v2263_v36, 0.0 }
 0x11f   :  { %v729_v23 = vadd.f32 %v728_v20, %v727_v12  ;;  %v738_v20 = vsel %vm652_vm3, %v2185_v56, 0.0 }
 0x121   :  { %v731_v30 = vadd.f32 %v730_v26, %v729_v23  ;;  %v2275_v26 = vpop.f32.mrf.mxu1 }
 0x122   :  { %3883 = vst [vmem:[#allocation10_spill] sm:$0xff] %v2275_v26 }
 0x123   :  { %v733_v51 = vadd.f32 %v732_v37, %v731_v30  ;;  %v742_v37 = vsel %vm652_vm3, %v2233_v1, 0.0 }
 0x125   :  { %v735_v63 = vadd.f32 %v734_v52, %v733_v51  ;;  %v2281_v52 = vpop.f32.mrf.mxu1 }
 0x127   :  { %v737_v12 = vadd.f32 %v736_v8, %v735_v63  ;;  %v746_v8 = vsel %vm652_vm3, %v2225_v47, 0.0 }
 0x129   :  { %v739_v23 = vadd.f32 %v738_v20, %v737_v12  ;;  %v2287_v20 = vpop.f32.mrf.mxu1 }
 0x12a   :  { %3884 = vst [vmem:[#allocation11_spill] sm:$0xff] %v2287_v20  ;;  %v768_v36 = vsel %vm652_vm3, %v2287_v20, 0.0 }
 0x12b   :  { %v741_v30 = vadd.f32 %v740_v43, %v739_v23  ;;  %v750_v23 = vsel %vm652_vm3, %v2257_v13, 0.0 }
 0x12d   :  { %v743_v51 = vadd.f32 %v742_v37, %v741_v30  ;;  %v2293_v37 = vpop.f32.mrf.mxu1 }
 0x12e   :  { %3885 = vst [vmem:[#allocation12_spill] sm:$0xff] %v2293_v37  ;;  %v764_v6 = vsel %vm652_vm3, %v2293_v37, 0.0 }
 0x12f   :  { %v745_v63 = vadd.f32 %v744_v32, %v743_v51  ;;  %v754_v51 = vsel %vm652_vm3, %v2251_v59, 0.0 }
 0x131   :  { %v747_v12 = vadd.f32 %v746_v8, %v745_v63  ;;  %v2299_v8 = vpop.f32.mrf.mxu1 }
 0x132   :  { %3886 = vst [vmem:[#allocation13_spill] sm:$0xff] %v2299_v8 }
 0x133   :  { %v749_v43 = vadd.f32 %v748_v29, %v747_v12  ;;  %v758_v12 = vsel %vm652_vm3, %v2281_v52, 0.0 }
 0x135   :  { %v751_v30 = vadd.f32 %v750_v23, %v749_v43  ;;  %v2305_v23 = vpop.f32.mrf.mxu1 }
 0x136   :  { %3887 = vst [vmem:[#allocation14_spill] sm:$0xff] %v2305_v23 }
 0x137   :  { %v753_v32 = vadd.f32 %v752_v16, %v751_v30  ;;  %v762_v30 = vsel %vm652_vm3, %v2275_v26, 0.0 }
 0x139   :  { %v755_v63 = vadd.f32 %v754_v51, %v753_v32  ;;  %v2311_v51 = vpop.f32.mrf.mxu1 }
 0x13a   :  { %v776_v20 = vsel %vm652_vm3, %v2311_v51, 0.0 }
 0x13b   :  { %v757_v29 = vadd.f32 %v756_v33, %v755_v63  ;;  %v766_v63 = vsel %vm652_vm3, %v2305_v23, 0.0 }
 0x13d   :  { %v759_v43 = vadd.f32 %v758_v12, %v757_v29  ;;  %v2317_v12 = vpop.f32.mrf.mxu1 }
 0x13e   :  { %3888 = vst [vmem:[#allocation15_spill] sm:$0xff] %v2317_v12  ;;  %v772_v37 = vsel %vm652_vm3, %v2317_v12, 0.0 }
 0x13f   :  { %v761_v16 = vadd.f32 %v760_v19, %v759_v43  ;;  %v770_v43 = vsel %vm652_vm3, %v2299_v8, 0.0 }
 0x141   :  { %v763_v32 = vadd.f32 %v762_v30, %v761_v16  ;;  %v2323_v30 = vpop.f32.mrf.mxu1 }
 0x143   :  { %v765_v33 = vadd.f32 %v764_v6, %v763_v32  ;;  %v2327_v32 = vpop.f32.mrf.mxu1 }
 0x144   :  { %3889 = vst [vmem:[#allocation16_spill] sm:$0xff] %v2327_v32 }
 0x145   :  { %v767_v29 = vadd.f32 %v766_v63, %v765_v33  ;;  %v774_v33 = vsel %vm652_vm3, %v2327_v32, 0.0 }
 0x147   :  { %v769_v19 = vadd.f32 %v768_v36, %v767_v29  ;;  %v778_v29 = vsel %vm652_vm3, %v2323_v30, 0.0 }
 0x149   :  { %v771_v16 = vadd.f32 %v770_v43, %v769_v19 }
 0x14b   :  { %v773_v6 = vadd.f32 %v772_v37, %v771_v16 }
 0x14d   :  { %v775_v63 = vadd.f32 %v774_v33, %v773_v6 }
 0x14f   :  { %v777_v36 = vadd.f32 %v776_v20, %v775_v63 }
 0x151   :  { %v779_v19 = vadd.f32 %v778_v29, %v777_v36 }
 0x153   :  { %v780_v43 = vrot.slane %v779_v19, 4 }
 0x155   :  { %v781_v8 = vadd.f32 %v780_v43, %v779_v19 }
 0x157   :  { %v782_v23 = vrot.slane %v781_v8, 2 }
 0x159   :  { %v783_v26 = vadd.f32 %v782_v23, %v781_v8 }
 0x15b   :  { %v784_v12 = vrot.slane %v783_v26, 1 }
 0x15d   :  { %v785_v37 = vadd.f32 %v784_v12, %v783_v26 }
 0x15f   :  { %v2335_v16 = vmul.f32 0.001953125, %v785_v37 }
 0x161   :  { %v2339_v32 = vsub.f32 %v2081_v39, %v2335_v16  ;;  %v2343_v6 = vsub.f32 %v2085_v41, %v2335_v16  ;;  %v2347_v20 = vsub.f32 %v2079_v38, %v2335_v16  ;;  %v2351_v33 = vsub.f32 %v2083_v40, %v2335_v16 }
 0x162   :  { %v2359_v39 = vsub.f32 %v2097_v49, %v2335_v16  ;;  %v2365_v38 = vsub.f32 %v2109_v57, %v2335_v16  ;;  %v2373_v36 = vsub.f32 %v2091_v45, %v2335_v16  ;;  %v2380_v57 = vsub.f32 %v2103_v53, %v2335_v16 }
 0x163   :  { %v851_v26 = vmul.f32 %v2339_v32, %v2339_v32  ;;  %v852_v8 = vmul.f32 %v2343_v6, %v2343_v6  ;;  %v853_v41 = vmul.f32 %v2347_v20, %v2347_v20  ;;  %v854_v40 = vmul.f32 %v2351_v33, %v2351_v33 }
 0x164   :  { %v855_v49 = vmul.f32 %v2359_v39, %v2359_v39  ;;  %v856_v43 = vmul.f32 %v2365_v38, %v2365_v38  ;;  %v2387_v45 = vsub.f32 %v2119_v0, %v2335_v16  ;;  %v2394_v53 = vsub.f32 %v2129_v7, %v2335_v16 }
 0x165   :  { %v915_v23 = vsel %vm652_vm3, %v851_v26, 0.0  ;;  %v916_v12 = vsel %vm652_vm3, %v852_v8, 0.0  ;;  %v918_v29 = vsel %vm652_vm3, %v853_v41, 0.0  ;;  %v920_v37 = vsel %vm652_vm3, %v854_v40, 0.0 }
 0x166   :  { %v917_v63 = vadd.f32 %v916_v12, %v915_v23  ;;  %v857_v8 = vmul.f32 %v2373_v36, %v2373_v36  ;;  %v922_v41 = vsel %vm652_vm3, %v855_v49, 0.0  ;;  %v858_v12 = vmul.f32 %v2380_v57, %v2380_v57 }
 0x167   :  { %v924_v40 = vsel %vm652_vm3, %v856_v43, 0.0  ;;  %v2401_v0 = vsub.f32 %v2113_v60, %v2335_v16  ;;  %v2408_v7 = vsub.f32 %v2123_v3, %v2335_v16  ;;  %v2415_v60 = vsub.f32 %v2139_v14, %v2335_v16 }
 0x168   :  { %v919_v19 = vadd.f32 %v918_v29, %v917_v63  ;;  %v859_v29 = vmul.f32 %v2387_v45, %v2387_v45  ;;  %v926_v49 = vsel %vm652_vm3, %v857_v8, 0.0  ;;  %v928_v43 = vsel %vm652_vm3, %v858_v12, 0.0 }
 0x169   :  { %v2422_v3 = vsub.f32 %v2149_v21, %v2335_v16  ;;  %v2429_v14 = vsub.f32 %v2133_v10, %v2335_v16  ;;  %v2436_v21 = vsub.f32 %v2143_v17, %v2335_v16  ;;  %v2443_v10 = vsub.f32 %v2159_v28, %v2335_v16 }
 0x16a   :  { %v921_v26 = vadd.f32 %v920_v37, %v919_v19  ;;  %v860_v37 = vmul.f32 %v2394_v53, %v2394_v53  ;;  %v930_v8 = vsel %vm652_vm3, %v859_v29, 0.0  ;;  %v2450_v17 = vsub.f32 %v2169_v35, %v2335_v16 }
 0x16b   :  { %v2457_v28 = vsub.f32 %v2153_v24, %v2335_v16  ;;  %v2464_v35 = vsub.f32 %v2163_v31, %v2335_v16  ;;  %v2471_v24 = vsub.f32 %v2179_v48, %v2335_v16  ;;  %v2478_v31 = vsub.f32 %v2189_v62, %v2335_v16 }
 0x16c   :  { %v923_v23 = vadd.f32 %v922_v41, %v921_v26  ;;  %v861_v41 = vmul.f32 %v2401_v0, %v2401_v0  ;;  %v932_v12 = vsel %vm652_vm3, %v860_v37, 0.0  ;;  %v2485_v48 = vsub.f32 %v2173_v42, %v2335_v16 }
 0x16d   :  { %v2492_v62 = vsub.f32 %v2183_v55, %v2335_v16  ;;  %v2499_v42 = vsub.f32 %v2199_v9, %v2335_v16  ;;  %v2506_v55 = vsub.f32 %v2209_v22, %v2335_v16  ;;  %v2513_v9 = vsub.f32 %v2193_v2, %v2335_v16 }
 0x16e   :  { %v925_v63 = vadd.f32 %v924_v40, %v923_v23  ;;  %v862_v40 = vmul.f32 %v2408_v7, %v2408_v7  ;;  %v934_v29 = vsel %vm652_vm3, %v861_v41, 0.0  ;;  %v2520_v22 = vsub.f32 %v2203_v15, %v2335_v16 }
 0x16f   :  { %v2527_v2 = vsub.f32 %v2219_v34, %v2335_v16  ;;  %v2534_v15 = vsub.f32 %v2229_v58, %v2335_v16  ;;  %v2541_v34 = vsub.f32 %v2213_v27, %v2335_v16  ;;  %v2548_v58 = vsub.f32 %v2223_v44, %v2335_v16 }
 0x170   :  { %v927_v19 = vadd.f32 %v926_v49, %v925_v63  ;;  %v863_v49 = vmul.f32 %v2415_v60, %v2415_v60  ;;  %v936_v37 = vsel %vm652_vm3, %v862_v40, 0.0  ;;  %v2555_v27 = vsub.f32 %v2099_v50, %v2335_v16 }
 0x171   :  { %v2562_v44 = vsub.f32 %v2115_v61, %v2335_v16  ;;  %v2569_v50 = vsub.f32 %v2093_v46, %v2335_v16  ;;  %v2576_v61 = vsub.f32 %v2105_v54, %v2335_v16  ;;  %v2583_v46 = vsub.f32 %v2135_v11, %v2335_v16 }
 0x172   :  { %v929_v26 = vadd.f32 %v928_v43, %v927_v19  ;;  %v864_v43 = vmul.f32 %v2422_v3, %v2422_v3  ;;  %v938_v41 = vsel %vm652_vm3, %v863_v49, 0.0  ;;  %v2590_v54 = vsub.f32 %v2155_v25, %v2335_v16 }
 0x173   :  { %v2597_v11 = vsub.f32 %v2125_v4, %v2335_v16  ;;  %v2604_v25 = vsub.f32 %v2145_v18, %v2335_v16  ;;  %v2618_v18 = vsub.f32 %v2195_v5, %v2335_v16  ;;  %v2632_v5 = vsub.f32 %v2185_v56, %v2335_v16 }
 0x174   :  { %v931_v23 = vadd.f32 %v930_v8, %v929_v26  ;;  %v865_v8 = vmul.f32 %v2429_v14, %v2429_v14  ;;  %v940_v40 = vsel %vm652_vm3, %v864_v43, 0.0  ;;  %v2646_v56 = vsub.f32 %v2233_v1, %v2335_v16 }
 0x175   :  { %v2660_v1 = vsub.f32 %v2225_v47, %v2335_v16  ;;  %v2674_v47 = vsub.f32 %v2257_v13, %v2335_v16  ;;  %v2688_v13 = vsub.f32 %v2251_v59, %v2335_v16  ;;  %v2702_v59 = vsub.f32 %v2281_v52, %v2335_v16 }
 0x176   :  { %v933_v63 = vadd.f32 %v932_v12, %v931_v23  ;;  %v866_v12 = vmul.f32 %v2436_v21, %v2436_v21  ;;  %v942_v49 = vsel %vm652_vm3, %v865_v8, 0.0 }
 0x177   :  { %3900 = vst [vmem:[#allocation17_spill] sm:$0xff] %v2674_v47  ;;  %3903 = vst [vmem:[#allocation18_spill] sm:$0xff] %v2688_v13 }
 0x178   :  { %v935_v19 = vadd.f32 %v934_v29, %v933_v63  ;;  %v867_v29 = vmul.f32 %v2443_v10, %v2443_v10  ;;  %v944_v43 = vsel %vm652_vm3, %v866_v12, 0.0  ;;  %3906 = vst [vmem:[#allocation19_spill] sm:$0xff] %v2702_v59 }
 0x17a   :  { %v937_v26 = vadd.f32 %v936_v37, %v935_v19  ;;  %v868_v37 = vmul.f32 %v2450_v17, %v2450_v17  ;;  %v946_v8 = vsel %vm652_vm3, %v867_v29, 0.0 }
 0x17c   :  { %v939_v23 = vadd.f32 %v938_v41, %v937_v26  ;;  %v869_v41 = vmul.f32 %v2457_v28, %v2457_v28  ;;  %v948_v12 = vsel %vm652_vm3, %v868_v37, 0.0 }
 0x17e   :  { %v941_v63 = vadd.f32 %v940_v40, %v939_v23  ;;  %v870_v40 = vmul.f32 %v2464_v35, %v2464_v35  ;;  %v950_v29 = vsel %vm652_vm3, %v869_v41, 0.0 }
 0x180   :  { %v943_v19 = vadd.f32 %v942_v49, %v941_v63  ;;  %v871_v49 = vmul.f32 %v2471_v24, %v2471_v24  ;;  %v952_v37 = vsel %vm652_vm3, %v870_v40, 0.0 }
 0x182   :  { %v945_v26 = vadd.f32 %v944_v43, %v943_v19  ;;  %v872_v43 = vmul.f32 %v2478_v31, %v2478_v31  ;;  %v954_v41 = vsel %vm652_vm3, %v871_v49, 0.0 }
 0x184   :  { %v947_v23 = vadd.f32 %v946_v8, %v945_v26  ;;  %v873_v8 = vmul.f32 %v2485_v48, %v2485_v48  ;;  %v956_v40 = vsel %vm652_vm3, %v872_v43, 0.0 }
 0x186   :  { %v949_v63 = vadd.f32 %v948_v12, %v947_v23  ;;  %v874_v12 = vmul.f32 %v2492_v62, %v2492_v62  ;;  %v958_v49 = vsel %vm652_vm3, %v873_v8, 0.0 }
 0x188   :  { %v951_v19 = vadd.f32 %v950_v29, %v949_v63  ;;  %v875_v29 = vmul.f32 %v2499_v42, %v2499_v42  ;;  %v960_v43 = vsel %vm652_vm3, %v874_v12, 0.0 }
 0x18a   :  { %v953_v26 = vadd.f32 %v952_v37, %v951_v19  ;;  %v876_v37 = vmul.f32 %v2506_v55, %v2506_v55  ;;  %v962_v8 = vsel %vm652_vm3, %v875_v29, 0.0 }
 0x18c   :  { %v955_v23 = vadd.f32 %v954_v41, %v953_v26  ;;  %v877_v41 = vmul.f32 %v2513_v9, %v2513_v9  ;;  %v964_v12 = vsel %vm652_vm3, %v876_v37, 0.0 }
 0x18e   :  { %v957_v63 = vadd.f32 %v956_v40, %v955_v23  ;;  %v878_v40 = vmul.f32 %v2520_v22, %v2520_v22  ;;  %v966_v29 = vsel %vm652_vm3, %v877_v41, 0.0 }
 0x190   :  { %v959_v19 = vadd.f32 %v958_v49, %v957_v63  ;;  %v879_v49 = vmul.f32 %v2527_v2, %v2527_v2  ;;  %v968_v37 = vsel %vm652_vm3, %v878_v40, 0.0 }
 0x192   :  { %v961_v26 = vadd.f32 %v960_v43, %v959_v19  ;;  %v880_v43 = vmul.f32 %v2534_v15, %v2534_v15  ;;  %v970_v41 = vsel %vm652_vm3, %v879_v49, 0.0 }
 0x194   :  { %v963_v23 = vadd.f32 %v962_v8, %v961_v26  ;;  %v881_v8 = vmul.f32 %v2541_v34, %v2541_v34  ;;  %v972_v40 = vsel %vm652_vm3, %v880_v43, 0.0 }
 0x196   :  { %v965_v63 = vadd.f32 %v964_v12, %v963_v23  ;;  %v882_v12 = vmul.f32 %v2548_v58, %v2548_v58  ;;  %v974_v49 = vsel %vm652_vm3, %v881_v8, 0.0 }
 0x198   :  { %v967_v19 = vadd.f32 %v966_v29, %v965_v63  ;;  %v883_v29 = vmul.f32 %v2555_v27, %v2555_v27  ;;  %v976_v43 = vsel %vm652_vm3, %v882_v12, 0.0 }
 0x19a   :  { %v969_v26 = vadd.f32 %v968_v37, %v967_v19  ;;  %v884_v37 = vmul.f32 %v2562_v44, %v2562_v44  ;;  %v978_v8 = vsel %vm652_vm3, %v883_v29, 0.0 }
 0x19c   :  { %v971_v23 = vadd.f32 %v970_v41, %v969_v26  ;;  %v885_v41 = vmul.f32 %v2569_v50, %v2569_v50  ;;  %v980_v12 = vsel %vm652_vm3, %v884_v37, 0.0 }
 0x19e   :  { %v973_v63 = vadd.f32 %v972_v40, %v971_v23  ;;  %v886_v40 = vmul.f32 %v2576_v61, %v2576_v61  ;;  %v982_v29 = vsel %vm652_vm3, %v885_v41, 0.0 }
 0x1a0   :  { %v975_v19 = vadd.f32 %v974_v49, %v973_v63  ;;  %v887_v49 = vmul.f32 %v2583_v46, %v2583_v46  ;;  %v984_v37 = vsel %vm652_vm3, %v886_v40, 0.0 }
 0x1a2   :  { %v977_v26 = vadd.f32 %v976_v43, %v975_v19  ;;  %v888_v43 = vmul.f32 %v2590_v54, %v2590_v54  ;;  %v986_v41 = vsel %vm652_vm3, %v887_v49, 0.0 }
 0x1a4   :  { %v979_v23 = vadd.f32 %v978_v8, %v977_v26  ;;  %v3890_v8 = vld [vmem:[#allocation3_spill] sm:$0xff]  ;;  %v988_v40 = vsel %vm652_vm3, %v888_v43, 0.0 }
 0x1a5   :  { %v2611_v4 = vsub.f32 %v3890_v8, %v2335_v16 }
 0x1a6   :  { %v981_v63 = vadd.f32 %v980_v12, %v979_v23  ;;  %v889_v23 = vmul.f32 %v2597_v11, %v2597_v11 }
 0x1a7   :  { %3891 = vst [vmem:[#allocation3_spill] sm:$0xff] %v2611_v4  ;;  %v891_v8 = vmul.f32 %v2611_v4, %v2611_v4 }
 0x1a8   :  { %v983_v19 = vadd.f32 %v982_v29, %v981_v63  ;;  %v890_v63 = vmul.f32 %v2604_v25, %v2604_v25  ;;  %v990_v49 = vsel %vm652_vm3, %v889_v23, 0.0 }
 0x1a9   :  { %v994_v23 = vsel %vm652_vm3, %v891_v8, 0.0 }
 0x1aa   :  { %v985_v26 = vadd.f32 %v984_v37, %v983_v19  ;;  %v3892_v19 = vld [vmem:[#allocation2_spill] sm:$0xff]  ;;  %v992_v43 = vsel %vm652_vm3, %v890_v63, 0.0 }
 0x1ab   :  { %v2625_v37 = vsub.f32 %v3892_v19, %v2335_v16 }
 0x1ac   :  { %v987_v12 = vadd.f32 %v986_v41, %v985_v26  ;;  %v892_v41 = vmul.f32 %v2618_v18, %v2618_v18 }
 0x1ad   :  { %3893 = vst [vmem:[#allocation2_spill] sm:$0xff] %v2625_v37  ;;  %v893_v4 = vmul.f32 %v2625_v37, %v2625_v37 }
 0x1ae   :  { %v989_v29 = vadd.f32 %v988_v40, %v987_v12  ;;  %v3894_v40 = vld [vmem:[#allocation5_spill] sm:$0xff]  ;;  %v996_v63 = vsel %vm652_vm3, %v892_v41, 0.0 }
 0x1af   :  { %v2639_v19 = vsub.f32 %v3894_v40, %v2335_v16  ;;  %v998_v8 = vsel %vm652_vm3, %v893_v4, 0.0 }
 0x1b0   :  { %v991_v26 = vadd.f32 %v990_v49, %v989_v29  ;;  %v894_v49 = vmul.f32 %v2632_v5, %v2632_v5 }
 0x1b1   :  { %3895 = vst [vmem:[#allocation5_spill] sm:$0xff] %v2639_v19  ;;  %v895_v37 = vmul.f32 %v2639_v19, %v2639_v19 }
 0x1b2   :  { %v993_v12 = vadd.f32 %v992_v43, %v991_v26  ;;  %v3896_v43 = vld [vmem:[#allocation4_spill] sm:$0xff]  ;;  %v1000_v41 = vsel %vm652_vm3, %v894_v49, 0.0 }
 0x1b3   :  { %v2653_v40 = vsub.f32 %v3896_v43, %v2335_v16  ;;  %v1002_v4 = vsel %vm652_vm3, %v895_v37, 0.0 }
 0x1b4   :  { %v995_v29 = vadd.f32 %v994_v23, %v993_v12  ;;  %v896_v23 = vmul.f32 %v2646_v56, %v2646_v56 }
 0x1b5   :  { %3897 = vst [vmem:[#allocation4_spill] sm:$0xff] %v2653_v40  ;;  %v897_v19 = vmul.f32 %v2653_v40, %v2653_v40 }
 0x1b6   :  { %v997_v26 = vadd.f32 %v996_v63, %v995_v29  ;;  %v3898_v63 = vld [vmem:[#allocation7_spill] sm:$0xff]  ;;  %v1004_v49 = vsel %vm652_vm3, %v896_v23, 0.0 }
 0x1b7   :  { %v2667_v43 = vsub.f32 %v3898_v63, %v2335_v16  ;;  %v1006_v37 = vsel %vm652_vm3, %v897_v19, 0.0 }
 0x1b8   :  { %v999_v12 = vadd.f32 %v998_v8, %v997_v26  ;;  %v898_v8 = vmul.f32 %v2660_v1, %v2660_v1 }
 0x1b9   :  { %3899 = vst [vmem:[#allocation7_spill] sm:$0xff] %v2667_v43  ;;  %v899_v40 = vmul.f32 %v2667_v43, %v2667_v43 }
 0x1ba   :  { %v1001_v29 = vadd.f32 %v1000_v41, %v999_v12  ;;  %v3901_v41 = vld [vmem:[#allocation6_spill] sm:$0xff]  ;;  %v1008_v23 = vsel %vm652_vm3, %v898_v8, 0.0 }
 0x1bb   :  { %v2681_v63 = vsub.f32 %v3901_v41, %v2335_v16  ;;  %v1010_v19 = vsel %vm652_vm3, %v899_v40, 0.0 }
 0x1bc   :  { %v1003_v26 = vadd.f32 %v1002_v4, %v1001_v29  ;;  %v900_v4 = vmul.f32 %v2674_v47, %v2674_v47 }
 0x1bd   :  { %3902 = vst [vmem:[#allocation6_spill] sm:$0xff] %v2681_v63  ;;  %v901_v43 = vmul.f32 %v2681_v63, %v2681_v63 }
 0x1be   :  { %v1005_v12 = vadd.f32 %v1004_v49, %v1003_v26  ;;  %v3904_v49 = vld [vmem:[#allocation9_spill] sm:$0xff]  ;;  %v1012_v8 = vsel %vm652_vm3, %v900_v4, 0.0 }
 0x1bf   :  { %v2695_v41 = vsub.f32 %v3904_v49, %v2335_v16  ;;  %v1014_v40 = vsel %vm652_vm3, %v901_v43, 0.0 }
 0x1c0   :  { %v1007_v29 = vadd.f32 %v1006_v37, %v1005_v12  ;;  %v902_v37 = vmul.f32 %v2688_v13, %v2688_v13  ;;  %v904_v13 = vmul.f32 %v2702_v59, %v2702_v59 }
 0x1c1   :  { %3905 = vst [vmem:[#allocation9_spill] sm:$0xff] %v2695_v41  ;;  %v903_v63 = vmul.f32 %v2695_v41, %v2695_v41 }
 0x1c2   :  { %v1009_v26 = vadd.f32 %v1008_v23, %v1007_v29  ;;  %v3907_v23 = vld [vmem:[#allocation8_spill] sm:$0xff]  ;;  %v1016_v4 = vsel %vm652_vm3, %v902_v37, 0.0  ;;  %v1020_v37 = vsel %vm652_vm3, %v904_v13, 0.0 }
 0x1c3   :  { %v2709_v49 = vsub.f32 %v3907_v23, %v2335_v16  ;;  %v1018_v43 = vsel %vm652_vm3, %v903_v63, 0.0 }
 0x1c4   :  { %v1011_v12 = vadd.f32 %v1010_v19, %v1009_v26  ;;  %v3909_v19 = vld [vmem:[#allocation10_spill] sm:$0xff] }
 0x1c5   :  { %3908 = vst [vmem:[#allocation8_spill] sm:$0xff] %v2709_v49  ;;  %v2716_v52 = vsub.f32 %v3909_v19, %v2335_v16  ;;  %v905_v41 = vmul.f32 %v2709_v49, %v2709_v49 }
 0x1c6   :  { %v1013_v29 = vadd.f32 %v1012_v8, %v1011_v12  ;;  %v3911_v8 = vld [vmem:[#allocation12_spill] sm:$0xff] }
 0x1c7   :  { %3910 = vst [vmem:[#allocation10_spill] sm:$0xff] %v2716_v52  ;;  %v2723_v23 = vsub.f32 %v3911_v8, %v2335_v16  ;;  %v906_v59 = vmul.f32 %v2716_v52, %v2716_v52  ;;  %v1022_v63 = vsel %vm652_vm3, %v905_v41, 0.0 }
 0x1c8   :  { %v1015_v26 = vadd.f32 %v1014_v40, %v1013_v29  ;;  %v3913_v40 = vld [vmem:[#allocation14_spill] sm:$0xff] }
 0x1c9   :  { %3912 = vst [vmem:[#allocation12_spill] sm:$0xff] %v2723_v23  ;;  %v2730_v19 = vsub.f32 %v3913_v40, %v2335_v16  ;;  %v907_v49 = vmul.f32 %v2723_v23, %v2723_v23  ;;  %v1024_v13 = vsel %vm652_vm3, %v906_v59, 0.0 }
 0x1ca   :  { %v1017_v12 = vadd.f32 %v1016_v4, %v1015_v26  ;;  %v3915_v4 = vld [vmem:[#allocation11_spill] sm:$0xff] }
 0x1cb   :  { %3914 = vst [vmem:[#allocation14_spill] sm:$0xff] %v2730_v19  ;;  %v2737_v8 = vsub.f32 %v3915_v4, %v2335_v16  ;;  %v908_v52 = vmul.f32 %v2730_v19, %v2730_v19  ;;  %v1026_v41 = vsel %vm652_vm3, %v907_v49, 0.0 }
 0x1cc   :  { %v1019_v29 = vadd.f32 %v1018_v43, %v1017_v12  ;;  %v3917_v43 = vld [vmem:[#allocation13_spill] sm:$0xff] }
 0x1cd   :  { %3916 = vst [vmem:[#allocation11_spill] sm:$0xff] %v2737_v8  ;;  %v2744_v40 = vsub.f32 %v3917_v43, %v2335_v16  ;;  %v909_v23 = vmul.f32 %v2737_v8, %v2737_v8  ;;  %v1028_v59 = vsel %vm652_vm3, %v908_v52, 0.0 }
 0x1ce   :  { %v1021_v26 = vadd.f32 %v1020_v37, %v1019_v29  ;;  %v3919_v37 = vld [vmem:[#allocation15_spill] sm:$0xff] }
 0x1cf   :  { %3918 = vst [vmem:[#allocation13_spill] sm:$0xff] %v2744_v40  ;;  %v2751_v4 = vsub.f32 %v3919_v37, %v2335_v16  ;;  %v910_v19 = vmul.f32 %v2744_v40, %v2744_v40  ;;  %v1030_v49 = vsel %vm652_vm3, %v909_v23, 0.0 }
 0x1d0   :  { %v1023_v12 = vadd.f32 %v1022_v63, %v1021_v26  ;;  %v3921_v63 = vld [vmem:[#allocation16_spill] sm:$0xff] }
 0x1d1   :  { %3920 = vst [vmem:[#allocation15_spill] sm:$0xff] %v2751_v4  ;;  %v2758_v43 = vsub.f32 %v3921_v63, %v2335_v16  ;;  %v911_v37 = vmul.f32 %v2751_v4, %v2751_v4  ;;  %v1032_v52 = vsel %vm652_vm3, %v910_v19, 0.0 }
 0x1d2   :  { %v1025_v29 = vadd.f32 %v1024_v13, %v1023_v12  ;;  %v2765_v13 = vsub.f32 %v2311_v51, %v2335_v16 }
 0x1d3   :  { %3922 = vst [vmem:[#allocation16_spill] sm:$0xff] %v2758_v43  ;;  %v912_v63 = vmul.f32 %v2758_v43, %v2758_v43 }
 0x1d4   :  { %v1027_v26 = vadd.f32 %v1026_v41, %v1025_v29  ;;  %3923 = vst [vmem:[#allocation20_spill] sm:$0xff] %v2765_v13  ;;  %v2772_v41 = vsub.f32 %v2323_v30, %v2335_v16  ;;  %v913_v51 = vmul.f32 %v2765_v13, %v2765_v13 }
 0x1d6   :  { %v1029_v12 = vadd.f32 %v1028_v59, %v1027_v26  ;;  %3924 = vst [vmem:[#allocation21_spill] sm:$0xff] %v2772_v41  ;;  %v1034_v59 = vsel %vm652_vm3, %v911_v37, 0.0  ;;  %v914_v23 = vmul.f32 %v2772_v41, %v2772_v41  ;;  %v1038_v30 = vsel %vm652_vm3, %v913_v51, 0.0 }
 0x1d8   :  { %v1031_v29 = vadd.f32 %v1030_v49, %v1029_v12  ;;  %v1036_v12 = vsel %vm652_vm3, %v912_v63, 0.0  ;;  %v1040_v43 = vsel %vm652_vm3, %v914_v23, 0.0 }
 0x1da   :  { %v1033_v26 = vadd.f32 %v1032_v52, %v1031_v29 }
 0x1dc   :  { %v1035_v40 = vadd.f32 %v1034_v59, %v1033_v26  ;;  %v1053_v59 = vlaneseq }
 0x1de   :  { %v1037_v49 = vadd.f32 %v1036_v12, %v1035_v40  ;;  %v1054_v41 = vshrl.u32 %v1053_v59, 7  ;;  %v650_v40 = vld [vmem:[%s3821_s2] sm:$0x1] }
 0x1df   :  { %v3931_v59 = vld [vmem:[#allocation6_spill] sm:$0xff] }
 0x1e0   :  { %v1039_v16 = vadd.f32 %v1038_v30, %v1037_v49  ;;  %v1055_v63 = vsub.s32 0, %v1054_v41  ;;  %v3925_v41 = vld [vmem:[#allocation3_spill] sm:$0xff]  ;;  %v3926_v49 = vld [vmem:[#allocation2_spill] sm:$0xff]  ;;  %v3927_v30 = vld [vmem:[#allocation5_spill] sm:$0xff] }
 0x1e2   :  { %v1041_v4 = vadd.f32 %v1040_v43, %v1039_v16 }
 0x1e4   :  { %v1042_v19 = vrot.slane %v1041_v4, 4 }
 0x1e6   :  { %v1043_v29 = vadd.f32 %v1042_v19, %v1041_v4  ;;  %v3928_v19 = vld [vmem:[#allocation4_spill] sm:$0xff] }
 0x1e8   :  { %v1044_v52 = vrot.slane %v1043_v29, 2 }
 0x1ea   :  { %v1045_v8 = vadd.f32 %v1044_v52, %v1043_v29  ;;  %v3929_v52 = vld [vmem:[#allocation7_spill] sm:$0xff] }
 0x1ec   :  { %v1046_v13 = vrot.slane %v1045_v8, 1 }
 0x1ee   :  { %v1047_v47 = vadd.f32 %v1046_v13, %v1045_v8 }
 0x1f0   :  { %v1048_v37 = vmul.f32 0.001953125, %v1047_v47 }
 0x1f2   :  { %v1049_v26 = vadd.f32 1e-05, %v1048_v37  ;;  %v3930_v37 = vld [vmem:[#allocation17_spill] sm:$0xff] }
 0x1f4   :  { %1917 = vrsqrt.f32 %v1049_v26 }
 0x201   :  { %v1918_v51 = vpop.eup %1917 }
 0x202   :  { %v1051_v12 = vmul.f32 %v1918_v51, %v650_v40  ;;  %v3932_v40 = vld [vmem:[#allocation18_spill] sm:$0xff]  ;;  %v3934_v51 = vld [vmem:[#allocation9_spill] sm:$0xff] }
 0x204   :  { %v2788_v23 = vrot.slane %v1051_v12, %v1055_v63 }
 0x206   :  { %v2792_v4 = vmul.f32 %v2788_v23, %v2339_v32  ;;  %v2796_v47 = vmul.f32 %v2788_v23, %v2343_v6  ;;  %v2800_v8 = vmul.f32 %v2788_v23, %v2347_v20  ;;  %v2804_v43 = vmul.f32 %v2788_v23, %v2351_v33 }
 0x207   :  { %v2808_v13 = vmul.f32 %v2788_v23, %v2359_v39  ;;  %v2812_v32 = vmul.f32 %v2788_v23, %v2365_v38  ;;  %v2816_v6 = vmul.f32 %v2788_v23, %v2373_v36  ;;  %v2820_v20 = vmul.f32 %v2788_v23, %v2380_v57 }
 0x208   :  { %v2824_v33 = vmul.f32 %v2788_v23, %v2387_v45  ;;  %v2828_v39 = vmul.f32 %v2788_v23, %v2394_v53  ;;  %v2832_v38 = vmul.f32 %v2788_v23, %v2401_v0  ;;  %v2836_v36 = vmul.f32 %v2788_v23, %v2408_v7 }
 0x209   :  { %v2840_v57 = vmul.f32 %v2788_v23, %v2415_v60  ;;  %v2844_v45 = vmul.f32 %v2788_v23, %v2422_v3  ;;  %v2848_v53 = vmul.f32 %v2788_v23, %v2429_v14  ;;  %v2852_v0 = vmul.f32 %v2788_v23, %v2436_v21 }
 0x20a   :  { %v2856_v7 = vmul.f32 %v2788_v23, %v2443_v10  ;;  %v2860_v60 = vmul.f32 %v2788_v23, %v2450_v17  ;;  %v2864_v3 = vmul.f32 %v2788_v23, %v2457_v28  ;;  %v2868_v14 = vmul.f32 %v2788_v23, %v2464_v35 }
 0x20b   :  { %v2872_v21 = vmul.f32 %v2788_v23, %v2471_v24  ;;  %v2876_v10 = vmul.f32 %v2788_v23, %v2478_v31  ;;  %v2880_v17 = vmul.f32 %v2788_v23, %v2485_v48  ;;  %v2884_v28 = vmul.f32 %v2788_v23, %v2492_v62 }
 0x20c   :  { %v2888_v35 = vmul.f32 %v2788_v23, %v2499_v42  ;;  %v2892_v24 = vmul.f32 %v2788_v23, %v2506_v55  ;;  %v2896_v31 = vmul.f32 %v2788_v23, %v2513_v9  ;;  %v2900_v48 = vmul.f32 %v2788_v23, %v2520_v22 }
 0x20d   :  { %v2904_v62 = vmul.f32 %v2788_v23, %v2527_v2  ;;  %v2908_v42 = vmul.f32 %v2788_v23, %v2534_v15  ;;  %v2912_v55 = vmul.f32 %v2788_v23, %v2541_v34  ;;  %v2916_v9 = vmul.f32 %v2788_v23, %v2548_v58 }
 0x20e   :  { %v2920_v22 = vmul.f32 %v2788_v23, %v2555_v27  ;;  %v2924_v2 = vmul.f32 %v2788_v23, %v2562_v44  ;;  %v2928_v15 = vmul.f32 %v2788_v23, %v2569_v50  ;;  %v2932_v34 = vmul.f32 %v2788_v23, %v2576_v61 }
 0x20f   :  { %v2936_v58 = vmul.f32 %v2788_v23, %v2583_v46  ;;  %v2940_v27 = vmul.f32 %v2788_v23, %v2590_v54  ;;  %v2944_v44 = vmul.f32 %v2788_v23, %v2597_v11  ;;  %v2948_v50 = vmul.f32 %v2788_v23, %v2604_v25 }
 0x210   :  { %v2952_v61 = vmul.f32 %v2788_v23, %v3925_v41  ;;  %v2956_v46 = vmul.f32 %v2788_v23, %v2618_v18  ;;  %v2960_v54 = vmul.f32 %v2788_v23, %v3926_v49  ;;  %v2964_v11 = vmul.f32 %v2788_v23, %v2632_v5  ;;  %v3936_v41 = vld [vmem:[#allocation19_spill] sm:$0xff] }
 0x211   :  { %v2968_v25 = vmul.f32 %v2788_v23, %v3927_v30  ;;  %v2972_v16 = vmul.f32 %v2788_v23, %v2646_v56  ;;  %v2976_v18 = vmul.f32 %v2788_v23, %v3928_v19  ;;  %v2980_v29 = vmul.f32 %v2788_v23, %v2660_v1  ;;  %v3001_v1 = vld [vmem:[%s3822_s3] ss:$0 sm:$0xff]  ;;  %v3938_v30 = vld [vmem:[#allocation8_spill] sm:$0xff] }
 0x212   :  { %v2984_v5 = vmul.f32 %v2788_v23, %v3929_v52  ;;  %v2988_v26 = vmul.f32 %v2788_v23, %v3930_v37  ;;  %v2992_v56 = vmul.f32 %v2788_v23, %v3931_v59  ;;  %v2996_v63 = vmul.f32 %v2788_v23, %v3932_v40  ;;  %v3940_v52 = vld [vmem:[#allocation10_spill] sm:$0xff]  ;;  %v3942_v59 = vld [vmem:[#allocation12_spill] sm:$0xff] }
 0x213   :  { %v3005_v12 = vmul.f32 %v2788_v23, %v3934_v51  ;;  %v3009_v49 = vmul.f32 %v2788_v23, %v3936_v41  ;;  %v3013_v19 = vmul.f32 %v2788_v23, %v3938_v30  ;;  %v3017_v37 = vmul.f32 %v2788_v23, %v3940_v52 }
 0x214   :  { %3933 = vst [vmem:[#allocation3_spill] sm:$0xff] %v2996_v63  ;;  %v3021_v40 = vmul.f32 %v2788_v23, %v3942_v59  ;;  %v3944_v63 = vld [vmem:[#allocation14_spill] sm:$0xff] }
 0x215   :  { %3935 = vst [vmem:[#allocation2_spill] sm:$0xff] %v3005_v12  ;;  %3937 = vst [vmem:[#allocation5_spill] sm:$0xff] %v3009_v49  ;;  %v3025_v51 = vmul.f32 %v2788_v23, %v3944_v63  ;;  %v3946_v12 = vld [vmem:[#allocation11_spill] sm:$0xff]  ;;  %v3947_v49 = vld [vmem:[#allocation13_spill] sm:$0xff] }
 0x216   :  { %3939 = vst [vmem:[#allocation4_spill] sm:$0xff] %v3013_v19  ;;  %3941 = vst [vmem:[#allocation7_spill] sm:$0xff] %v3017_v37  ;;  %v3029_v41 = vmul.f32 %v2788_v23, %v3946_v12  ;;  %v3033_v30 = vmul.f32 %v2788_v23, %v3947_v49  ;;  %v3948_v19 = vld [vmem:[#allocation15_spill] sm:$0xff]  ;;  %v3949_v37 = vld [vmem:[#allocation16_spill] sm:$0xff]  ;;  %v3053_v49 = vadd.f32 %v3001_v1, %v2792_v4 }
 0x217   :  { %3943 = vst [vmem:[#allocation17_spill] sm:$0xff] %v3021_v40  ;;  %3945 = vst [vmem:[#allocation6_spill] sm:$0xff] %v3025_v51  ;;  %v3037_v52 = vmul.f32 %v2788_v23, %v3948_v19  ;;  %v3041_v59 = vmul.f32 %v2788_v23, %v3949_v37  ;;  %v3950_v40 = vld [vmem:[#allocation20_spill] sm:$0xff]  ;;  %v3951_v51 = vld [vmem:[#allocation21_spill] sm:$0xff]  ;;  %v3057_v19 = vadd.f32 %v3001_v1, %v2796_v47 }
 0x218   :  { %v3045_v63 = vmul.f32 %v2788_v23, %v3950_v40  ;;  %v3049_v12 = vmul.f32 %v2788_v23, %v3951_v51  ;;  %v3061_v37 = vadd.f32 %v3001_v1, %v2800_v8  ;;  %v3065_v40 = vadd.f32 %v3001_v1, %v2804_v43 }
 0x219   :  { %v3069_v23 = vadd.f32 %v3001_v1, %v2808_v13  ;;  %v3073_v4 = vadd.f32 %v3001_v1, %v2812_v32  ;;  %v3077_v47 = vadd.f32 %v3001_v1, %v2816_v6  ;;  %v3081_v8 = vadd.f32 %v3001_v1, %v2820_v20 }
 0x21a   :  { %v3085_v43 = vadd.f32 %v3001_v1, %v2824_v33  ;;  %v3089_v13 = vadd.f32 %v3001_v1, %v2828_v39  ;;  %v3093_v32 = vadd.f32 %v3001_v1, %v2832_v38  ;;  %v3097_v6 = vadd.f32 %v3001_v1, %v2836_v36 }
 0x21b   :  { %v3101_v20 = vadd.f32 %v3001_v1, %v2840_v57  ;;  %v3105_v33 = vadd.f32 %v3001_v1, %v2844_v45  ;;  %v3109_v39 = vadd.f32 %v3001_v1, %v2848_v53  ;;  %v3113_v38 = vadd.f32 %v3001_v1, %v2852_v0  ;;  %v3962_v51 = vld [vmem:[#allocation3_spill] sm:$0xff] }
 0x21c   :  { %v3117_v36 = vadd.f32 %v3001_v1, %v2856_v7  ;;  %v3121_v57 = vadd.f32 %v3001_v1, %v2860_v60  ;;  %v3125_v45 = vadd.f32 %v3001_v1, %v2864_v3  ;;  %v3129_v53 = vadd.f32 %v3001_v1, %v2868_v14 }
 0x21d   :  { %v3133_v0 = vadd.f32 %v3001_v1, %v2872_v21  ;;  %v3137_v7 = vadd.f32 %v3001_v1, %v2876_v10  ;;  %v3141_v60 = vadd.f32 %v3001_v1, %v2880_v17  ;;  %v3145_v3 = vadd.f32 %v3001_v1, %v2884_v28 }
 0x21e   :  { %v3149_v14 = vadd.f32 %v3001_v1, %v2888_v35  ;;  %v3153_v21 = vadd.f32 %v3001_v1, %v2892_v24  ;;  %v3157_v10 = vadd.f32 %v3001_v1, %v2896_v31  ;;  %v3161_v17 = vadd.f32 %v3001_v1, %v2900_v48 }
 0x21f   :  { %v3165_v28 = vadd.f32 %v3001_v1, %v2904_v62  ;;  %v3169_v35 = vadd.f32 %v3001_v1, %v2908_v42  ;;  %v3173_v24 = vadd.f32 %v3001_v1, %v2912_v55  ;;  %v3177_v31 = vadd.f32 %v3001_v1, %v2916_v9 }
 0x220   :  { %v3181_v48 = vadd.f32 %v3001_v1, %v2920_v22  ;;  %v3185_v62 = vadd.f32 %v3001_v1, %v2924_v2  ;;  %v3189_v42 = vadd.f32 %v3001_v1, %v2928_v15  ;;  %v3193_v55 = vadd.f32 %v3001_v1, %v2932_v34 }
 0x221   :  { %v3197_v9 = vadd.f32 %v3001_v1, %v2936_v58  ;;  %v3201_v22 = vadd.f32 %v3001_v1, %v2940_v27  ;;  %v3205_v2 = vadd.f32 %v3001_v1, %v2944_v44  ;;  %v3209_v15 = vadd.f32 %v3001_v1, %v2948_v50 }
 0x222   :  { %v3213_v34 = vadd.f32 %v3001_v1, %v2952_v61  ;;  %v3217_v58 = vadd.f32 %v3001_v1, %v2956_v46  ;;  %v3221_v27 = vadd.f32 %v3001_v1, %v2960_v54  ;;  %v3225_v44 = vadd.f32 %v3001_v1, %v2964_v11 }
 0x223   :  { %3952 = vst [vmem:[#allocation18_spill] sm:$0xff] %v3197_v9  ;;  %3953 = vst [vmem:[#allocation9_spill] sm:$0xff] %v3201_v22  ;;  %v3229_v50 = vadd.f32 %v3001_v1, %v2968_v25  ;;  %v3233_v61 = vadd.f32 %v3001_v1, %v2972_v16  ;;  %v3237_v46 = vadd.f32 %v3001_v1, %v2976_v18 }
 0x224   :  { %3954 = vst [vmem:[#allocation19_spill] sm:$0xff] %v3205_v2  ;;  %3955 = vst [vmem:[#allocation8_spill] sm:$0xff] %v3209_v15  ;;  %v3241_v54 = vadd.f32 %v3001_v1, %v2980_v29  ;;  %v3245_v11 = vadd.f32 %v3001_v1, %v2984_v5  ;;  %v3249_v25 = vadd.f32 %v3001_v1, %v2988_v26 }
 0x225   :  { %3956 = vst [vmem:[#allocation10_spill] sm:$0xff] %v3213_v34  ;;  %3957 = vst [vmem:[#allocation12_spill] sm:$0xff] %v3237_v46  ;;  %v3253_v16 = vadd.f32 %v3001_v1, %v2992_v56  ;;  %v3257_v18 = vadd.f32 %v3001_v1, %v3962_v51  ;;  %v3964_v46 = vld [vmem:[#allocation2_spill] sm:$0xff] }
 0x226   :  { %3958 = vst [vmem:[#allocation14_spill] sm:$0xff] %v3241_v54  ;;  %3959 = vst [vmem:[#allocation11_spill] sm:$0xff] %v3245_v11  ;;  %v3261_v29 = vadd.f32 %v3001_v1, %v3964_v46  ;;  %v3965_v54 = vld [vmem:[#allocation5_spill] sm:$0xff]  ;;  %v3966_v11 = vld [vmem:[#allocation4_spill] sm:$0xff] }
 0x227   :  { %3960 = vst [vmem:[#allocation13_spill] sm:$0xff] %v3249_v25  ;;  %3961 = vst [vmem:[#allocation15_spill] sm:$0xff] %v3253_v16  ;;  %v3265_v5 = vadd.f32 %v3001_v1, %v3965_v54  ;;  %v3269_v26 = vadd.f32 %v3001_v1, %v3966_v11  ;;  %v3967_v25 = vld [vmem:[#allocation7_spill] sm:$0xff]  ;;  %v3968_v16 = vld [vmem:[#allocation17_spill] sm:$0xff]  ;;  %v3285_v54 = vadd.f32 %v3001_v1, %v3029_v41 }
 0x228   :  { %3963 = vst [vmem:[#allocation16_spill] sm:$0xff] %v3257_v18  ;;  %v3273_v56 = vadd.f32 %v3001_v1, %v3967_v25  ;;  %v3277_v51 = vadd.f32 %v3001_v1, %v3968_v16  ;;  %v3969_v18 = vld [vmem:[#allocation6_spill] sm:$0xff]  ;;  %v3289_v11 = vadd.f32 %v3001_v1, %v3033_v30  ;;  %v3293_v25 = vadd.f32 %v3001_v1, %v3037_v52 }
 0x229   :  { %v3281_v46 = vadd.f32 %v3001_v1, %v3969_v18  ;;  %3970 = vst [vmem:[#allocation20_spill] sm:$0xff] %v3285_v54  ;;  %v3297_v16 = vadd.f32 %v3001_v1, %v3041_v59  ;;  %v3301_v18 = vadd.f32 %v3001_v1, %v3045_v63  ;;  %v3305_v41 = vadd.f32 %v3001_v1, %v3049_v12 }
 0x22a   :  { %3971 = vst [vmem:[#allocation21_spill] sm:$0xff] %v3289_v11  ;;  %3972 = vst [vmem:[#allocation3_spill] sm:$0xff] %v3293_v25  ;;  %v3982_v22 = vmov %v3289_v11  ;;  %v3983_v2 = vmov %v3293_v25  ;;  %v3986_v25 = vmax.f32 %v3053_v49, 0.0  ;;  %v3989_v12 = vmax.f32 %v3065_v40, 0.0 }
 0x22b   :  { %3973 = vst [vmem:[#allocation2_spill] sm:$0xff] %v3297_v16  ;;  %3974 = vst [vmem:[#allocation5_spill] sm:$0xff] %v3301_v18  ;;  %v3984_v15 = vmov %v3297_v16  ;;  %v3985_v34 = vmov %v3301_v18  ;;  %v3987_v16 = vmax.f32 %v3057_v19, 0.0  ;;  %v3988_v18 = vmax.f32 %v3061_v37, 0.0 }
 0x22c   :  { %v3975_v54 = vld [vmem:[#allocation12_spill] sm:$0xff]  ;;  %v1712_v59 = vpack.c.bf16 %v3986_v25, %v3986_v25  ;;  %v1715_v30 = vpack.c.bf16 %v3989_v12, %v3989_v12  ;;  %v3990_v11 = vmax.f32 %v3069_v23, 0.0  ;;  %v3991_v49 = vmax.f32 %v3073_v4, 0.0 }
 0x22d   :  { %v1713_v63 = vpack.c.bf16 %v3987_v16, %v3987_v16  ;;  %v1714_v1 = vpack.c.bf16 %v3988_v18, %v3988_v18  ;;  %v3992_v19 = vmax.f32 %v3077_v47, 0.0  ;;  %v3993_v37 = vmax.f32 %v3081_v8, 0.0 }
 0x22e   :  { %v1716_v52 = vpack.c.bf16 %v3990_v11, %v3990_v11  ;;  %v1717_v25 = vpack.c.bf16 %v3991_v49, %v3991_v49  ;;  %v3994_v40 = vmax.f32 %v3085_v43, 0.0  ;;  %v3995_v23 = vmax.f32 %v3089_v13, 0.0  ;;  %1513 = vst.msk [vmem:[%s3823_s4] sm:$0xf] %vm1512_vm4, %v1712_v59  ;;  %1516 = vst.msk [vmem:[%s3823_s4 + $0xc] sm:$0xf] %vm1512_vm4, %v1715_v30 }
 0x22f   :  { %v1718_v16 = vpack.c.bf16 %v3992_v19, %v3992_v19  ;;  %v1719_v18 = vpack.c.bf16 %v3993_v37, %v3993_v37  ;;  %v3996_v4 = vmax.f32 %v3093_v32, 0.0  ;;  %v3997_v47 = vmax.f32 %v3097_v6, 0.0  ;;  %1514 = vst.msk [vmem:[%s3823_s4 + $0x4] sm:$0xf] %vm1512_vm4, %v1713_v63  ;;  %1515 = vst.msk [vmem:[%s3823_s4 + $0x8] sm:$0xf] %vm1512_vm4, %v1714_v1 }
 0x230   :  { %v3981_v9 = vld [vmem:[#allocation20_spill] sm:$0xff]  ;;  %v1720_v12 = vpack.c.bf16 %v3994_v40, %v3994_v40  ;;  %v1721_v11 = vpack.c.bf16 %v3995_v23, %v3995_v23  ;;  %v3998_v8 = vmax.f32 %v3101_v20, 0.0  ;;  %v3999_v13 = vmax.f32 %v3105_v33, 0.0  ;;  %1517 = vst.msk [vmem:[%s3823_s4 + $0x10] sm:$0xf] %vm1512_vm4, %v1716_v52 }
 0x231   :  { %v1722_v49 = vpack.c.bf16 %v3996_v4, %v3996_v4  ;;  %v1723_v19 = vpack.c.bf16 %v3997_v47, %v3997_v47  ;;  %v4000_v6 = vmax.f32 %v3109_v39, 0.0  ;;  %v4001_v63 = vmax.f32 %v3113_v38, 0.0  ;;  %1518 = vst.msk [vmem:[%s3823_s4 + $0x14] sm:$0xf] %vm1512_vm4, %v1717_v25  ;;  %1519 = vst.msk [vmem:[%s3823_s4 + $0x18] sm:$0xf] %vm1512_vm4, %v1718_v16 }
 0x232   :  { %v1724_v43 = vpack.c.bf16 %v3998_v8, %v3998_v8  ;;  %v1725_v32 = vpack.c.bf16 %v3999_v13, %v3999_v13  ;;  %1520 = vst.msk [vmem:[%s3823_s4 + $0x1c] sm:$0xf] %vm1512_vm4, %v1719_v18  ;;  %v4002_v20 = vmax.f32 %v3117_v36, 0.0  ;;  %v4003_v39 = vmax.f32 %v3121_v57, 0.0  ;;  %1521 = vst.msk [vmem:[%s3823_s4 + $0x20] sm:$0xf] %vm1512_vm4, %v1720_v12 }
 0x233   :  { %v1726_v59 = vpack.c.bf16 %v4000_v6, %v4000_v6  ;;  %v1727_v1 = vpack.c.bf16 %v4001_v63, %v4001_v63  ;;  %v4004_v30 = vmax.f32 %v3125_v45, 0.0  ;;  %v4005_v25 = vmax.f32 %v3129_v53, 0.0  ;;  %1522 = vst.msk [vmem:[%s3823_s4 + $0x24] sm:$0xf] %vm1512_vm4, %v1721_v11  ;;  %1523 = vst.msk [vmem:[%s3823_s4 + $0x28] sm:$0xf] %vm1512_vm4, %v1722_v49 }
 0x234   :  { %v1728_v33 = vpack.c.bf16 %v4002_v20, %v4002_v20  ;;  %v1729_v38 = vpack.c.bf16 %v4003_v39, %v4003_v39  ;;  %1524 = vst.msk [vmem:[%s3823_s4 + $0x2c] sm:$0xf] %vm1512_vm4, %v1723_v19  ;;  %v4006_v36 = vmax.f32 %v3133_v0, 0.0  ;;  %v4007_v45 = vmax.f32 %v3137_v7, 0.0  ;;  %1525 = vst.msk [vmem:[%s3823_s4 + $0x30] sm:$0xf] %vm1512_vm4, %v1724_v43 }
 0x235   :  { %v1730_v52 = vpack.c.bf16 %v4004_v30, %v4004_v30  ;;  %v1731_v16 = vpack.c.bf16 %v4005_v25, %v4005_v25  ;;  %v4008_v37 = vmax.f32 %v3141_v60, 0.0  ;;  %v4009_v40 = vmax.f32 %v3145_v3, 0.0  ;;  %1526 = vst.msk [vmem:[%s3823_s4 + $0x34] sm:$0xf] %vm1512_vm4, %v1725_v32  ;;  %1527 = vst.msk [vmem:[%s3823_s4 + $0x38] sm:$0xf] %vm1512_vm4, %v1726_v59 }
 0x236   :  { %v1732_v57 = vpack.c.bf16 %v4006_v36, %v4006_v36  ;;  %v1733_v53 = vpack.c.bf16 %v4007_v45, %v4007_v45  ;;  %1528 = vst.msk [vmem:[%s3823_s4 + $0x3c] sm:$0xf] %vm1512_vm4, %v1727_v1  ;;  %v4010_v0 = vmax.f32 %v3149_v14, 0.0  ;;  %v4011_v60 = vmax.f32 %v3153_v21, 0.0  ;;  %1529 = vst.msk [vmem:[%s3823_s4 + $0x40] sm:$0xf] %vm1512_vm4, %v1728_v33 }
 0x237   :  { %v1734_v18 = vpack.c.bf16 %v4008_v37, %v4008_v37  ;;  %v1735_v12 = vpack.c.bf16 %v4009_v40, %v4009_v40  ;;  %v4012_v23 = vmax.f32 %v3157_v10, 0.0  ;;  %v4013_v4 = vmax.f32 %v3161_v17, 0.0  ;;  %1530 = vst.msk [vmem:[%s3823_s4 + $0x44] sm:$0xf] %vm1512_vm4, %v1729_v38  ;;  %1531 = vst.msk [vmem:[%s3823_s4 + $0x48] sm:$0xf] %vm1512_vm4, %v1730_v52 }
 0x238   :  { %v1736_v7 = vpack.c.bf16 %v4010_v0, %v4010_v0  ;;  %v1737_v3 = vpack.c.bf16 %v4011_v60, %v4011_v60  ;;  %1532 = vst.msk [vmem:[%s3823_s4 + $0x4c] sm:$0xf] %vm1512_vm4, %v1731_v16  ;;  %v4014_v14 = vmax.f32 %v3165_v28, 0.0  ;;  %v4015_v10 = vmax.f32 %v3169_v35, 0.0  ;;  %1533 = vst.msk [vmem:[%s3823_s4 + $0x50] sm:$0xf] %vm1512_vm4, %v1732_v57 }
 0x239   :  { %v1738_v11 = vpack.c.bf16 %v4012_v23, %v4012_v23  ;;  %v1739_v49 = vpack.c.bf16 %v4013_v4, %v4013_v4  ;;  %v4016_v47 = vmax.f32 %v3173_v24, 0.0  ;;  %v4017_v8 = vmax.f32 %v3177_v31, 0.0  ;;  %1534 = vst.msk [vmem:[%s3823_s4 + $0x54] sm:$0xf] %vm1512_vm4, %v1733_v53  ;;  %1535 = vst.msk [vmem:[%s3823_s4 + $0x58] sm:$0xf] %vm1512_vm4, %v1734_v18 }
 0x23a   :  { %v1740_v21 = vpack.c.bf16 %v4014_v14, %v4014_v14  ;;  %v1741_v17 = vpack.c.bf16 %v4015_v10, %v4015_v10  ;;  %1536 = vst.msk [vmem:[%s3823_s4 + $0x5c] sm:$0xf] %vm1512_vm4, %v1735_v12  ;;  %v4018_v28 = vmax.f32 %v3181_v48, 0.0  ;;  %v4019_v24 = vmax.f32 %v3185_v62, 0.0  ;;  %1537 = vst.msk [vmem:[%s3823_s4 + $0x60] sm:$0xf] %vm1512_vm4, %v1736_v7 }
 0x23b   :  { %v1742_v19 = vpack.c.bf16 %v4016_v47, %v4016_v47  ;;  %v1743_v43 = vpack.c.bf16 %v4017_v8, %v4017_v8  ;;  %v4020_v13 = vmax.f32 %v3189_v42, 0.0  ;;  %v4021_v6 = vmax.f32 %v3193_v55, 0.0  ;;  %1538 = vst.msk [vmem:[%s3823_s4 + $0x64] sm:$0xf] %vm1512_vm4, %v1737_v3  ;;  %1539 = vst.msk [vmem:[%s3823_s4 + $0x68] sm:$0xf] %vm1512_vm4, %v1738_v11 }
 0x23c   :  { %v1744_v35 = vpack.c.bf16 %v4018_v28, %v4018_v28  ;;  %v1745_v31 = vpack.c.bf16 %v4019_v24, %v4019_v24  ;;  %1540 = vst.msk [vmem:[%s3823_s4 + $0x6c] sm:$0xf] %vm1512_vm4, %v1739_v49  ;;  %v4022_v48 = vld [vmem:[#allocation18_spill] sm:$0xff]  ;;  %v4024_v55 = vld [vmem:[#allocation9_spill] sm:$0xff]  ;;  %v4026_v20 = vld [vmem:[#allocation19_spill] sm:$0xff]  ;;  %v4032_v57 = vmax.f32 %v3217_v58, 0.0 }
 0x23d   :  { %v1746_v32 = vpack.c.bf16 %v4020_v13, %v4020_v13  ;;  %v1747_v59 = vpack.c.bf16 %v4021_v6, %v4021_v6  ;;  %v4023_v62 = vmax.f32 %v4022_v48, 0.0  ;;  %v4025_v63 = vmax.f32 %v4024_v55, 0.0  ;;  %v4028_v38 = vld [vmem:[#allocation8_spill] sm:$0xff]  ;;  %1541 = vst.msk [vmem:[%s3823_s4 + $0x70] sm:$0xf] %vm1512_vm4, %v1740_v21  ;;  %v4030_v25 = vld [vmem:[#allocation10_spill] sm:$0xff] }
 0x23e   :  { %v4027_v33 = vmax.f32 %v4026_v20, 0.0  ;;  %v4029_v30 = vmax.f32 %v4028_v38, 0.0  ;;  %1542 = vst.msk [vmem:[%s3823_s4 + $0x74] sm:$0xf] %vm1512_vm4, %v1741_v17  ;;  %1543 = vst.msk [vmem:[%s3823_s4 + $0x78] sm:$0xf] %vm1512_vm4, %v1742_v19  ;;  %v1753_v45 = vpack.c.bf16 %v4032_v57, %v4032_v57 }
 0x23f   :  { %v1748_v42 = vpack.c.bf16 %v4023_v62, %v4023_v62  ;;  %v1749_v1 = vpack.c.bf16 %v4025_v63, %v4025_v63  ;;  %1544 = vst.msk [vmem:[%s3823_s4 + $0x7c] sm:$0xf] %vm1512_vm4, %v1743_v43  ;;  %v4031_v16 = vmax.f32 %v4030_v25, 0.0  ;;  %v4033_v53 = vmax.f32 %v3221_v27, 0.0  ;;  %1545 = vst.msk [vmem:[%s3823_s4 + $0x80] sm:$0xf] %vm1512_vm4, %v1744_v35 }
 0x240   :  { %v1750_v39 = vpack.c.bf16 %v4027_v33, %v4027_v33  ;;  %v1751_v52 = vpack.c.bf16 %v4029_v30, %v4029_v30  ;;  %v4034_v18 = vmax.f32 %v3225_v44, 0.0  ;;  %1546 = vst.msk [vmem:[%s3823_s4 + $0x84] sm:$0xf] %vm1512_vm4, %v1745_v31  ;;  %1547 = vst.msk [vmem:[%s3823_s4 + $0x88] sm:$0xf] %vm1512_vm4, %v1746_v32  ;;  %v4035_v58 = vmax.f32 %v3229_v50, 0.0 }
 0x241   :  { %v1752_v36 = vpack.c.bf16 %v4031_v16, %v4031_v16  ;;  %v1754_v37 = vpack.c.bf16 %v4033_v53, %v4033_v53  ;;  %1548 = vst.msk [vmem:[%s3823_s4 + $0x8c] sm:$0xf] %vm1512_vm4, %v1747_v59  ;;  %v4036_v44 = vmax.f32 %v3233_v61, 0.0  ;;  %v4037_v0 = vmax.f32 %v3975_v54, 0.0  ;;  %v4038_v60 = vld [vmem:[#allocation14_spill] sm:$0xff]  ;;  %v4040_v50 = vld [vmem:[#allocation11_spill] sm:$0xff] }
 0x242   :  { %v1755_v40 = vpack.c.bf16 %v4034_v18, %v4034_v18  ;;  %v1756_v27 = vpack.c.bf16 %v4035_v58, %v4035_v58  ;;  %v4039_v3 = vmax.f32 %v4038_v60, 0.0  ;;  %1549 = vst.msk [vmem:[%s3823_s4 + $0x90] sm:$0xf] %vm1512_vm4, %v1748_v42  ;;  %1550 = vst.msk [vmem:[%s3823_s4 + $0x94] sm:$0xf] %vm1512_vm4, %v1749_v1  ;;  %v4041_v61 = vmax.f32 %v4040_v50, 0.0 }
 0x243   :  { %v1757_v12 = vpack.c.bf16 %v4036_v44, %v4036_v44  ;;  %v1758_v7 = vpack.c.bf16 %v4037_v0, %v4037_v0  ;;  %1551 = vst.msk [vmem:[%s3823_s4 + $0x98] sm:$0xf] %vm1512_vm4, %v1750_v39  ;;  %1552 = vst.msk [vmem:[%s3823_s4 + $0x9c] sm:$0xf] %vm1512_vm4, %v1751_v52  ;;  %v4042_v11 = vld [vmem:[#allocation13_spill] sm:$0xff]  ;;  %v4044_v14 = vld [vmem:[#allocation15_spill] sm:$0xff] }
 0x244   :  { %v1759_v23 = vpack.c.bf16 %v4039_v3, %v4039_v3  ;;  %v1760_v54 = vpack.c.bf16 %v4041_v61, %v4041_v61  ;;  %v4043_v4 = vmax.f32 %v4042_v11, 0.0  ;;  %v4045_v21 = vmax.f32 %v4044_v14, 0.0  ;;  %v4046_v17 = vld [vmem:[#allocation16_spill] sm:$0xff]  ;;  %1553 = vst.msk [vmem:[%s3823_s4 + $0xa0] sm:$0xf] %vm1512_vm4, %v1752_v36 }
 0x245   :  { %v4047_v47 = vmax.f32 %v4046_v17, 0.0  ;;  %1554 = vst.msk [vmem:[%s3823_s4 + $0xa4] sm:$0xf] %vm1512_vm4, %v1753_v45  ;;  %1555 = vst.msk [vmem:[%s3823_s4 + $0xa8] sm:$0xf] %vm1512_vm4, %v1754_v37  ;;  %v4048_v8 = vmax.f32 %v3261_v29, 0.0 }
 0x246   :  { %v1761_v49 = vpack.c.bf16 %v4043_v4, %v4043_v4  ;;  %v1762_v10 = vpack.c.bf16 %v4045_v21, %v4045_v21  ;;  %1556 = vst.msk [vmem:[%s3823_s4 + $0xac] sm:$0xf] %vm1512_vm4, %v1755_v40  ;;  %v4049_v28 = vmax.f32 %v3265_v5, 0.0  ;;  %v4050_v24 = vmax.f32 %v3269_v26, 0.0  ;;  %1557 = vst.msk [vmem:[%s3823_s4 + $0xb0] sm:$0xf] %vm1512_vm4, %v1756_v27 }
 0x247   :  { %v1763_v19 = vpack.c.bf16 %v4047_v47, %v4047_v47  ;;  %v1764_v43 = vpack.c.bf16 %v4048_v8, %v4048_v8  ;;  %v4051_v13 = vmax.f32 %v3273_v56, 0.0  ;;  %1558 = vst.msk [vmem:[%s3823_s4 + $0xb4] sm:$0xf] %vm1512_vm4, %v1757_v12  ;;  %1559 = vst.msk [vmem:[%s3823_s4 + $0xb8] sm:$0xf] %vm1512_vm4, %v1758_v7  ;;  %v4052_v29 = vmax.f32 %v3277_v51, 0.0 }
 0x248   :  { %v1765_v35 = vpack.c.bf16 %v4049_v28, %v4049_v28  ;;  %v1766_v31 = vpack.c.bf16 %v4050_v24, %v4050_v24  ;;  %1560 = vst.msk [vmem:[%s3823_s4 + $0xbc] sm:$0xf] %vm1512_vm4, %v1759_v23  ;;  %v4053_v26 = vmax.f32 %v3281_v46, 0.0  ;;  %v4054_v6 = vmax.f32 %v3981_v9, 0.0  ;;  %1561 = vst.msk [vmem:[%s3823_s4 + $0xc0] sm:$0xf] %vm1512_vm4, %v1760_v54 }
 0x249   :  { %v1767_v32 = vpack.c.bf16 %v4051_v13, %v4051_v13  ;;  %v1768_v5 = vpack.c.bf16 %v4052_v29, %v4052_v29  ;;  %v4055_v48 = vmax.f32 %v3982_v22, 0.0  ;;  %1562 = vst.msk [vmem:[%s3823_s4 + $0xc4] sm:$0xf] %vm1512_vm4, %v1761_v49  ;;  %1563 = vst.msk [vmem:[%s3823_s4 + $0xc8] sm:$0xf] %vm1512_vm4, %v1762_v10  ;;  %v4056_v9 = vmax.f32 %v3983_v2, 0.0 }
 0x24a   :  { %v1769_v56 = vpack.c.bf16 %v4053_v26, %v4053_v26  ;;  %v1770_v59 = vpack.c.bf16 %v4054_v6, %v4054_v6  ;;  %1564 = vst.msk [vmem:[%s3823_s4 + $0xcc] sm:$0xf] %vm1512_vm4, %v1763_v19  ;;  %v4057_v51 = vmax.f32 %v3984_v15, 0.0  ;;  %v4058_v42 = vmax.f32 %v3985_v34, 0.0  ;;  %1565 = vst.msk [vmem:[%s3823_s4 + $0xd0] sm:$0xf] %vm1512_vm4, %v1764_v43 }
 0x24b   :  { %v1771_v62 = vpack.c.bf16 %v4055_v48, %v4055_v48  ;;  %v1772_v22 = vpack.c.bf16 %v4056_v9, %v4056_v9  ;;  %v4059_v63 = vmax.f32 %v3305_v41, 0.0  ;;  %1566 = vst.msk [vmem:[%s3823_s4 + $0xd4] sm:$0xf] %vm1512_vm4, %v1765_v35  ;;  %1567 = vst.msk [vmem:[%s3823_s4 + $0xd8] sm:$0xf] %vm1512_vm4, %v1766_v31 }
 0x24c   :  { %v1773_v46 = vpack.c.bf16 %v4057_v51, %v4057_v51  ;;  %v1774_v55 = vpack.c.bf16 %v4058_v42, %v4058_v42  ;;  %1568 = vst.msk [vmem:[%s3823_s4 + $0xdc] sm:$0xf] %vm1512_vm4, %v1767_v32  ;;  %1569 = vst.msk [vmem:[%s3823_s4 + $0xe0] sm:$0xf] %vm1512_vm4, %v1768_v5 }
 0x24d   :  { %v1775_v1 = vpack.c.bf16 %v4059_v63, %v4059_v63  ;;  %1570 = vst.msk [vmem:[%s3823_s4 + $0xe4] sm:$0xf] %vm1512_vm4, %v1769_v56  ;;  %1571 = vst.msk [vmem:[%s3823_s4 + $0xe8] sm:$0xf] %vm1512_vm4, %v1770_v59 }
 0x24e   :  { %1572 = vst.msk [vmem:[%s3823_s4 + $0xec] sm:$0xf] %vm1512_vm4, %v1771_v62  ;;  %1573 = vst.msk [vmem:[%s3823_s4 + $0xf0] sm:$0xf] %vm1512_vm4, %v1772_v22 }
 0x24f   :  { %1574 = vst.msk [vmem:[%s3823_s4 + $0xf4] sm:$0xf] %vm1512_vm4, %v1773_v46  ;;  %1575 = vst.msk [vmem:[%s3823_s4 + $0xf8] sm:$0xf] %vm1512_vm4, %v1774_v55 }
 0x250   :  { %1576 = vst.msk [vmem:[%s3823_s4 + $0xfc] sm:$0xf] %vm1512_vm4, %v1775_v1 }

// kernel: convnet_forward.17
= control target key start
LH: loop header
LB: loop body
LE: loop exit
PB: predicated region body
PF: predicated region fallthrough
CT: control target
= control target key end

     0   :  { %vm135_vm0 = vcmask 1043456   ;;  %vm110_vm1 = vcmask 588800   ;;  %vm238_vm2 = vcmask 130048   ;;  %vm474_vm3 = vcmask 125952   ;;  %s868_s1 = inlined_call_operand.vmem [shape: bf16[72,16], index: 1, kind: input, shape index: {}]   ;;  %s869_s0 = inlined_call_operand.vmem [shape: bf16[128,72], index: 0, kind: input, shape index: {}]   ;;  %s870_s2 = inlined_call_operand.vmem [shape: f32[1,16], index: 2, kind: input, shape index: {}]   ;;  %s871_s3 = inlined_call_operand.vmem [shape: f32[1,16], index: 3, kind: input, shape index: {}]   ;;  %s872_s4 = inlined_call_operand.vmem [shape: bf16[128,16], index: 4, kind: output, shape index: {}]  }
   0x1   :  { %v600_v0 = vld [vmem:[%s868_s1 + $0x20] ss:$0 sps:$4 sm:$0xff]   ;;  %v601_v1 = vld [vmem:[%s868_s1 + $0x18] sm:$0xff]   ;;  %v602_v3 = vld [vmem:[%s868_s1 + $0x10] sm:$0xff]  }
   0x2   :  { %598 = vmatprep.subr.msk.bf16.mxu0 %vm135_vm0, %v600_v0  ;;  %v137_v2 = vsel %vm135_vm0, %v600_v0, 0  ;;  %599 = vmatprep.subr.msk.bf16.mxu1 %vm135_vm0, %v600_v0  ;;  %v605_v4 = vld [vmem:[%s869_s0] sm:$0xff]   ;;  %v603_v5 = vld [vmem:[%s868_s1 + $0x8] sm:$0xff]   ;;  %v607_v10 = vld [vmem:[%s869_s0 + $0x10] sm:$0xff]  }
   0x3   :  { %563 = vmatpush3.bf16.msra.mxu0 %v137_v2  ;;  %593 = vmatpush3.bf16.msra.mxu1 %v137_v2  ;;  %v609_v6 = vld [vmem:[%s869_s0 + $0x20] sm:$0xff]   ;;  %v606_v8 = vld [vmem:[%s869_s0 + $0x8] sm:$0xff]   ;;  %v611_v11 = vld [vmem:[%s869_s0 + $0x30] sm:$0xff]  }
   0x4   :  { %564 = vmatprep.subr.bf16.mxu0 %v601_v1  ;;  %589 = vmatprep.subr.bf16.mxu1 %v601_v1  ;;  %v604_v7 = vld [vmem:[%s868_s1] sm:$0xff]   ;;  %v610_v9 = vld [vmem:[%s869_s0 + $0x28] sm:$0xff]   ;;  %v608_v12 = vld [vmem:[%s869_s0 + $0x18] sm:$0xff]  }
   0x5   :  { %572 = vmatprep.mubr.msk.bf16.mxu0 %vm110_vm1, %v605_v4  ;;  %580 = vmatprep.mubr.msk.bf16.mxu1 %vm110_vm1, %v609_v6  ;;  %v612_v13 = vld [vmem:[%s869_s0 + $0x38] sm:$0xff]  }
   0x7   :  { %565 = vmatpush3.bf16.msra.mxu0 %v601_v1  ;;  %594 = vmatpush3.bf16.msra.mxu1 %v601_v1 }
   0x8   :  { %566 = vmatprep.subr.bf16.mxu0 %v602_v3  ;;  %590 = vmatprep.subr.bf16.mxu1 %v602_v3 }
   0xb   :  { %567 = vmatpush3.bf16.msra.mxu0 %v602_v3  ;;  %595 = vmatpush3.bf16.msra.mxu1 %v602_v3 }
   0xc   :  { %568 = vmatprep.subr.bf16.mxu0 %v603_v5  ;;  %591 = vmatprep.subr.bf16.mxu1 %v603_v5 }
   0xf   :  { %569 = vmatpush3.bf16.msra.mxu0 %v603_v5  ;;  %596 = vmatpush3.bf16.msra.mxu1 %v603_v5 }
  0x10   :  { %570 = vmatprep.subr.bf16.mxu0 %v604_v7  ;;  %592 = vmatprep.subr.bf16.mxu1 %v604_v7 }
  0x13   :  { %571 = vmatpush3.bf16.msra.mxu0 %v604_v7  ;;  %597 = vmatpush3.bf16.msra.mxu1 %v604_v7 }
  0x16   :  { %573 = vmatmul.mubr.msk.bf16.vlgmr.msra.gmra.mxu0 %vm110_vm1, %v606_v8  ;;  %581 = vmatmul.mubr.msk.bf16.vlgmr.msra.gmra.mxu1 %vm110_vm1, %v610_v9 }
  0x17   :  { %576 = vmatprep.mubr.msk.bf16.mxu0 %vm110_vm1, %v607_v10  ;;  %584 = vmatprep.mubr.msk.bf16.mxu1 %vm110_vm1, %v611_v11 }
  0x1e   :  { %577 = vmatmul.mubr.msk.bf16.gmra.mxu0 %vm110_vm1, %v608_v12  ;;  %585 = vmatmul.mubr.msk.bf16.gmra.mxu1 %vm110_vm1, %v612_v13 }
  0xd6   :  { %v574_v14 = vpop.f32.mrf.mxu0  ;;  %v687_v15 = vpop.f32.mrf.mxu1 }
  0xd7   :  { %v242_v25 = vsel %vm238_vm2, %v574_v14, 0.0  ;;  %v258_v48 = vsel %vm238_vm2, %v687_v15, 0.0 }
  0xd8   :  { %v173_v16 = vpop.f32.mrf.mxu0  ;;  %v689_v18 = vpop.f32.mrf.mxu1 }
  0xd9   :  { %v239_v20 = vsel %vm238_vm2, %v173_v16, 0.0  ;;  %v254_v43 = vsel %vm238_vm2, %v689_v18, 0.0 }
  0xda   :  { %v575_v17 = vpop.f32.mrf.mxu0  ;;  %v693_v24 = vpop.f32.mrf.mxu1 }
  0xdb   :  { %v244_v28 = vsel %vm238_vm2, %v575_v17, 0.0  ;;  %v260_v50 = vsel %vm238_vm2, %v693_v24, 0.0 }
  0xdc   :  { %v176_v19 = vpop.f32.mrf.mxu0  ;;  %v208_v31 = vpop.f32.mrf.mxu1 }
  0xdd   :  { %v240_v21 = vsel %vm238_vm2, %v176_v19, 0.0  ;;  %v256_v45 = vsel %vm238_vm2, %v208_v31, 0.0 }
  0xde   :  { %v241_v22 = vadd.f32 %v240_v21, %v239_v20  ;;  %v578_v23 = vpop.f32.mrf.mxu0  ;;  %v699_v37 = vpop.f32.mrf.mxu1 }
  0xdf   :  { %v250_v38 = vsel %vm238_vm2, %v578_v23, 0.0  ;;  %v266_v57 = vsel %vm238_vm2, %v699_v37, 0.0 }
  0xe0   :  { %v243_v26 = vadd.f32 %v242_v25, %v241_v22  ;;  %v189_v27 = vpop.f32.mrf.mxu0  ;;  %v703_v42 = vpop.f32.mrf.mxu1 }
  0xe1   :  { %v246_v32 = vsel %vm238_vm2, %v189_v27, 0.0  ;;  %v262_v53 = vsel %vm238_vm2, %v703_v42, 0.0 }
  0xe2   :  { %v245_v29 = vadd.f32 %v244_v28, %v243_v26  ;;  %v579_v30 = vpop.f32.mrf.mxu0  ;;  %v708_v47 = vpop.f32.mrf.mxu1 }
  0xe3   :  { %v252_v40 = vsel %vm238_vm2, %v579_v30, 0.0  ;;  %v268_v59 = vsel %vm238_vm2, %v708_v47, 0.0 }
  0xe4   :  { %v247_v33 = vadd.f32 %v246_v32, %v245_v29  ;;  %v192_v34 = vpop.f32.mrf.mxu0  ;;  %v224_v52 = vpop.f32.mrf.mxu1 }
  0xe5   :  { %v248_v35 = vsel %vm238_vm2, %v192_v34, 0.0  ;;  %v264_v55 = vsel %vm238_vm2, %v224_v52, 0.0 }
  0xe6   :  { %v249_v36 = vadd.f32 %v248_v35, %v247_v33 }
  0xe8   :  { %v251_v39 = vadd.f32 %v250_v38, %v249_v36 }
  0xea   :  { %v253_v41 = vadd.f32 %v252_v40, %v251_v39 }
  0xec   :  { %v255_v44 = vadd.f32 %v254_v43, %v253_v41 }
  0xee   :  { %v257_v46 = vadd.f32 %v256_v45, %v255_v44 }
  0xf0   :  { %v259_v49 = vadd.f32 %v258_v48, %v257_v46 }
  0xf2   :  { %v261_v51 = vadd.f32 %v260_v50, %v259_v49 }
  0xf4   :  { %v263_v54 = vadd.f32 %v262_v53, %v261_v51 }
  0xf6   :  { %v265_v56 = vadd.f32 %v264_v55, %v263_v54 }
  0xf8   :  { %v267_v58 = vadd.f32 %v266_v57, %v265_v56 }
  0xfa   :  { %v269_v60 = vadd.f32 %v268_v59, %v267_v58 }
  0xfc   :  { %v270_v61 = vrot.slane %v269_v60, 4 }
  0xfe   :  { %v271_v62 = vadd.f32 %v270_v61, %v269_v60 }
 0x100   :  { %v272_v63 = vrot.slane %v271_v62, 2 }
 0x102   :  { %v273_v0 = vadd.f32 %v272_v63, %v271_v62 }
 0x104   :  { %v274_v1 = vrot.slane %v273_v0, 1 }
 0x106   :  { %v275_v2 = vadd.f32 %v274_v1, %v273_v0 }
 0x108   :  { %v276_v3 = vmul.f32 0.0078125, %v275_v2 }
 0x10a   :  { %v721_v4 = vsub.f32 %v173_v16, %v276_v3  ;;  %v723_v5 = vsub.f32 %v176_v19, %v276_v3  ;;  %v725_v6 = vsub.f32 %v574_v14, %v276_v3  ;;  %v727_v7 = vsub.f32 %v575_v17, %v276_v3 }
 0x10b   :  { %v733_v10 = vsub.f32 %v189_v27, %v276_v3  ;;  %v737_v12 = vsub.f32 %v192_v34, %v276_v3  ;;  %v743_v19 = vsub.f32 %v578_v23, %v276_v3  ;;  %v748_v25 = vsub.f32 %v579_v30, %v276_v3 }
 0x10c   :  { %v293_v8 = vmul.f32 %v721_v4, %v721_v4  ;;  %v294_v9 = vmul.f32 %v723_v5, %v723_v5  ;;  %v295_v11 = vmul.f32 %v725_v6, %v725_v6  ;;  %v296_v13 = vmul.f32 %v727_v7, %v727_v7 }
 0x10d   :  { %v297_v20 = vmul.f32 %v733_v10, %v733_v10  ;;  %v298_v26 = vmul.f32 %v737_v12, %v737_v12  ;;  %v754_v29 = vsub.f32 %v689_v18, %v276_v3  ;;  %v299_v23 = vmul.f32 %v743_v19, %v743_v19 }
 0x10e   :  { %v309_v14 = vsel %vm238_vm2, %v293_v8, 0.0  ;;  %v310_v16 = vsel %vm238_vm2, %v294_v9, 0.0  ;;  %v312_v21 = vsel %vm238_vm2, %v295_v11, 0.0  ;;  %v314_v27 = vsel %vm238_vm2, %v296_v13, 0.0 }
 0x10f   :  { %v311_v17 = vadd.f32 %v310_v16, %v309_v14  ;;  %v316_v32 = vsel %vm238_vm2, %v297_v20, 0.0  ;;  %v759_v34 = vsub.f32 %v208_v31, %v276_v3  ;;  %v300_v30 = vmul.f32 %v748_v25, %v748_v25 }
 0x110   :  { %v318_v35 = vsel %vm238_vm2, %v298_v26, 0.0  ;;  %v765_v38 = vsub.f32 %v687_v15, %v276_v3  ;;  %v301_v18 = vmul.f32 %v754_v29, %v754_v29  ;;  %v320_v39 = vsel %vm238_vm2, %v299_v23, 0.0 }
 0x111   :  { %v313_v22 = vadd.f32 %v312_v21, %v311_v17  ;;  %v288_v41 = vsub.f32 %v693_v24, %v276_v3  ;;  %v302_v31 = vmul.f32 %v759_v34, %v759_v34  ;;  %v322_v43 = vsel %vm238_vm2, %v300_v30, 0.0 }
 0x112   :  { %v289_v45 = vsub.f32 %v703_v42, %v276_v3  ;;  %v303_v15 = vmul.f32 %v765_v38, %v765_v38  ;;  %v324_v46 = vsel %vm238_vm2, %v301_v18, 0.0  ;;  %v290_v49 = vsub.f32 %v224_v52, %v276_v3 }
 0x113   :  { %v315_v28 = vadd.f32 %v314_v27, %v313_v22  ;;  %v304_v50 = vmul.f32 %v288_v41, %v288_v41  ;;  %v326_v51 = vsel %vm238_vm2, %v302_v31, 0.0  ;;  %v291_v24 = vsub.f32 %v699_v37, %v276_v3  ;;  %v236_v22 = vld [vmem:[%s870_s2] sm:$0x1] }
 0x114   :  { %v305_v54 = vmul.f32 %v289_v45, %v289_v45  ;;  %v328_v55 = vsel %vm238_vm2, %v303_v15, 0.0  ;;  %v292_v57 = vsub.f32 %v708_v47, %v276_v3  ;;  %v306_v42 = vmul.f32 %v290_v49, %v290_v49 }
 0x115   :  { %v317_v33 = vadd.f32 %v316_v32, %v315_v28  ;;  %v330_v58 = vsel %vm238_vm2, %v304_v50, 0.0  ;;  %v307_v60 = vmul.f32 %v291_v24, %v291_v24  ;;  %v351_v20 = vlaneseq }
 0x116   :  { %v332_v61 = vsel %vm238_vm2, %v305_v54, 0.0  ;;  %v308_v62 = vmul.f32 %v292_v57, %v292_v57  ;;  %v334_v63 = vsel %vm238_vm2, %v306_v42, 0.0 }
 0x117   :  { %v319_v36 = vadd.f32 %v318_v35, %v317_v33  ;;  %v336_v37 = vsel %vm238_vm2, %v307_v60, 0.0  ;;  %v352_v21 = vshrl.u32 %v351_v20, 7 }
 0x118   :  { %v338_v2 = vsel %vm238_vm2, %v308_v62, 0.0 }
 0x119   :  { %v321_v40 = vadd.f32 %v320_v39, %v319_v36  ;;  %v353_v26 = vsub.s32 0, %v352_v21  ;;  %v516_v36 = vld [vmem:[%s871_s3] ss:$0 sm:$0xff] }
 0x11b   :  { %v323_v44 = vadd.f32 %v322_v43, %v321_v40 }
 0x11d   :  { %v325_v48 = vadd.f32 %v324_v46, %v323_v44 }
 0x11f   :  { %v327_v53 = vadd.f32 %v326_v51, %v325_v48 }
 0x121   :  { %v329_v56 = vadd.f32 %v328_v55, %v327_v53 }
 0x123   :  { %v331_v59 = vadd.f32 %v330_v58, %v329_v56 }
 0x125   :  { %v333_v52 = vadd.f32 %v332_v61, %v331_v59 }
 0x127   :  { %v335_v0 = vadd.f32 %v334_v63, %v333_v52 }
 0x129   :  { %v337_v1 = vadd.f32 %v336_v37, %v335_v0 }
 0x12b   :  { %v339_v8 = vadd.f32 %v338_v2, %v337_v1 }
 0x12d   :  { %v340_v9 = vrot.slane %v339_v8, 4 }
 0x12f   :  { %v341_v47 = vadd.f32 %v340_v9, %v339_v8 }
 0x131   :  { %v342_v3 = vrot.slane %v341_v47, 2 }
 0x133   :  { %v343_v11 = vadd.f32 %v342_v3, %v341_v47 }
 0x135   :  { %v344_v13 = vrot.slane %v343_v11, 1 }
 0x137   :  { %v345_v14 = vadd.f32 %v344_v13, %v343_v11 }
 0x139   :  { %v346_v16 = vmul.f32 0.0078125, %v345_v14 }
 0x13b   :  { %v347_v17 = vadd.f32 1e-05, %v346_v16 }
 0x13d   :  { %613 = vrsqrt.f32 %v347_v17 }
 0x14a   :  { %v614_v27 = vpop.eup %613 }
 0x14b   :  { %v349_v28 = vmul.f32 %v614_v27, %v236_v22 }
 0x14d   :  { %v354_v23 = vrot.slane %v349_v28, %v353_v26 }
 0x14f   :  { %v356_v32 = vmul.f32 %v354_v23, %v721_v4  ;;  %v357_v33 = vmul.f32 %v354_v23, %v723_v5  ;;  %v358_v30 = vmul.f32 %v354_v23, %v725_v6  ;;  %v359_v35 = vmul.f32 %v354_v23, %v727_v7 }
 0x150   :  { %v360_v18 = vmul.f32 %v354_v23, %v733_v10  ;;  %v361_v39 = vmul.f32 %v354_v23, %v737_v12  ;;  %v362_v40 = vmul.f32 %v354_v23, %v743_v19  ;;  %v363_v31 = vmul.f32 %v354_v23, %v748_v25 }
 0x151   :  { %v364_v4 = vmul.f32 %v354_v23, %v754_v29  ;;  %v365_v5 = vmul.f32 %v354_v23, %v759_v34  ;;  %v366_v6 = vmul.f32 %v354_v23, %v765_v38  ;;  %v367_v43 = vmul.f32 %v354_v23, %v288_v41 }
 0x152   :  { %v368_v7 = vmul.f32 %v354_v23, %v289_v45  ;;  %v369_v44 = vmul.f32 %v354_v23, %v290_v49  ;;  %v370_v15 = vmul.f32 %v354_v23, %v291_v24  ;;  %v371_v46 = vmul.f32 %v354_v23, %v292_v57 }
 0x153   :  { %v378_v48 = vadd.f32 %v516_v36, %v356_v32  ;;  %v379_v10 = vadd.f32 %v516_v36, %v357_v33  ;;  %v380_v50 = vadd.f32 %v516_v36, %v358_v30  ;;  %v381_v12 = vadd.f32 %v516_v36, %v359_v35 }
 0x154   :  { %v382_v51 = vadd.f32 %v516_v36, %v360_v18  ;;  %v383_v19 = vadd.f32 %v516_v36, %v361_v39  ;;  %v384_v53 = vadd.f32 %v516_v36, %v362_v40  ;;  %v385_v25 = vadd.f32 %v516_v36, %v363_v31 }
 0x155   :  { %v386_v54 = vadd.f32 %v516_v36, %v364_v4  ;;  %v387_v29 = vadd.f32 %v516_v36, %v365_v5  ;;  %v388_v55 = vadd.f32 %v516_v36, %v366_v6  ;;  %v389_v34 = vadd.f32 %v516_v36, %v367_v43 }
 0x156   :  { %v390_v56 = vadd.f32 %v516_v36, %v368_v7  ;;  %v391_v38 = vadd.f32 %v516_v36, %v369_v44  ;;  %v392_v41 = vadd.f32 %v516_v36, %v370_v15  ;;  %v393_v45 = vadd.f32 %v516_v36, %v371_v46 }
 0x157   :  { %v394_v49 = vmax.f32 %v378_v48, 0.0  ;;  %v395_v24 = vmax.f32 %v379_v10, 0.0  ;;  %v396_v57 = vmax.f32 %v380_v50, 0.0  ;;  %v397_v42 = vmax.f32 %v381_v12, 0.0 }
 0x158   :  { %v398_v58 = vmax.f32 %v382_v51, 0.0  ;;  %v399_v59 = vmax.f32 %v383_v19, 0.0  ;;  %v400_v60 = vmax.f32 %v384_v53, 0.0  ;;  %v401_v61 = vmax.f32 %v385_v25, 0.0 }
 0x159   :  { %v402_v52 = vmax.f32 %v386_v54, 0.0  ;;  %v403_v62 = vmax.f32 %v387_v29, 0.0  ;;  %v404_v63 = vmax.f32 %v388_v55, 0.0  ;;  %v405_v0 = vmax.f32 %v389_v34, 0.0 }
 0x15a   :  { %v406_v37 = vmax.f32 %v390_v56, 0.0  ;;  %v407_v1 = vmax.f32 %v391_v38, 0.0  ;;  %v408_v2 = vmax.f32 %v392_v41, 0.0  ;;  %v409_v8 = vmax.f32 %v393_v45, 0.0 }
 0x15b   :  { %v533_v9 = vpack.c.bf16 %v394_v49, %v394_v49  ;;  %v534_v47 = vpack.c.bf16 %v395_v24, %v395_v24  ;;  %v535_v3 = vpack.c.bf16 %v396_v57, %v396_v57  ;;  %v536_v11 = vpack.c.bf16 %v397_v42, %v397_v42 }
 0x15c   :  { %v537_v13 = vpack.c.bf16 %v398_v58, %v398_v58  ;;  %v538_v14 = vpack.c.bf16 %v399_v59, %v399_v59  ;;  %v539_v16 = vpack.c.bf16 %v400_v60, %v400_v60  ;;  %v540_v17 = vpack.c.bf16 %v401_v61, %v401_v61 }
 0x15d   :  { %v541_v20 = vpack.c.bf16 %v402_v52, %v402_v52  ;;  %v542_v21 = vpack.c.bf16 %v403_v62, %v403_v62  ;;  %v543_v22 = vpack.c.bf16 %v404_v63, %v404_v63  ;;  %v544_v26 = vpack.c.bf16 %v405_v0, %v405_v0  ;;  %475 = vst.msk [vmem:[%s872_s4] sm:$0xf] %vm474_vm3, %v533_v9 }
 0x15e   :  { %476 = vst.msk [vmem:[%s872_s4 + $0x4] sm:$0xf] %vm474_vm3, %v534_v47  ;;  %477 = vst.msk [vmem:[%s872_s4 + $0x8] sm:$0xf] %vm474_vm3, %v535_v3  ;;  %v545_v27 = vpack.c.bf16 %v406_v37, %v406_v37  ;;  %v546_v28 = vpack.c.bf16 %v407_v1, %v407_v1  ;;  %v547_v23 = vpack.c.bf16 %v408_v2, %v408_v2 }
 0x15f   :  { %478 = vst.msk [vmem:[%s872_s4 + $0xc] sm:$0xf] %vm474_vm3, %v536_v11  ;;  %v548_v32 = vpack.c.bf16 %v409_v8, %v409_v8  ;;  %479 = vst.msk [vmem:[%s872_s4 + $0x10] sm:$0xf] %vm474_vm3, %v537_v13 }
 0x160   :  { %480 = vst.msk [vmem:[%s872_s4 + $0x14] sm:$0xf] %vm474_vm3, %v538_v14  ;;  %481 = vst.msk [vmem:[%s872_s4 + $0x18] sm:$0xf] %vm474_vm3, %v539_v16 }
 0x161   :  { %482 = vst.msk [vmem:[%s872_s4 + $0x1c] sm:$0xf] %vm474_vm3, %v540_v17  ;;  %483 = vst.msk [vmem:[%s872_s4 + $0x20] sm:$0xf] %vm474_vm3, %v541_v20 }
 0x162   :  { %484 = vst.msk [vmem:[%s872_s4 + $0x24] sm:$0xf] %vm474_vm3, %v542_v21  ;;  %485 = vst.msk [vmem:[%s872_s4 + $0x28] sm:$0xf] %vm474_vm3, %v543_v22 }
 0x163   :  { %486 = vst.msk [vmem:[%s872_s4 + $0x2c] sm:$0xf] %vm474_vm3, %v544_v26  ;;  %487 = vst.msk [vmem:[%s872_s4 + $0x30] sm:$0xf] %vm474_vm3, %v545_v27 }
 0x164   :  { %488 = vst.msk [vmem:[%s872_s4 + $0x34] sm:$0xf] %vm474_vm3, %v546_v28  ;;  %489 = vst.msk [vmem:[%s872_s4 + $0x38] sm:$0xf] %vm474_vm3, %v547_v23 }
 0x165   :  { %490 = vst.msk [vmem:[%s872_s4 + $0x3c] sm:$0xf] %vm474_vm3, %v548_v32 }

// kernel: convnet_forward.18
= control target key start
LH: loop header
LB: loop body
LE: loop exit
PB: predicated region body
PF: predicated region fallthrough
CT: control target
= control target key end

     0   :  { %vm45_vm0 = vcmask 125952   ;;  %s143_s0 = inlined_call_operand.vmem [shape: bf16[32,16], index: 0, kind: input, shape index: {}]   ;;  %s144_s1 = inlined_call_operand.vmem [shape: bf16[32,16], index: 1, kind: input, shape index: {}]   ;;  %s145_s2 = inlined_call_operand.vmem [shape: bf16[32,16], index: 2, kind: input, shape index: {}]   ;;  %s146_s3 = inlined_call_operand.vmem [shape: bf16[32,16], index: 3, kind: input, shape index: {}]   ;;  %s147_s4 = inlined_call_operand.vmem [shape: bf16[32,16], index: 4, kind: output, shape index: {}]  }
   0x1   :  { %v17_v0 = vld [vmem:[%s143_s0] sm:$0xf]  ;;  %v18_v5 = vld [vmem:[%s143_s0 + $0x4] sm:$0xf]  ;;  %v19_v11 = vld [vmem:[%s143_s0 + $0x8] sm:$0xf] }
   0x2   :  { %v21_v1 = vld [vmem:[%s144_s1] sm:$0xf]  ;;  %v22_v6 = vld [vmem:[%s144_s1 + $0x4] sm:$0xf]  ;;  %v23_v13 = vld [vmem:[%s144_s1 + $0x8] sm:$0xf] }
   0x3   :  { %v29_v2 = vld [vmem:[%s145_s2] sm:$0xf]  ;;  %v25_v3 = vmax.bf16 %v21_v1, %v17_v0  ;;  %v26_v8 = vmax.bf16 %v22_v6, %v18_v5  ;;  %v30_v9 = vld [vmem:[%s145_s2 + $0x4] sm:$0xf]  ;;  %v31_v14 = vld [vmem:[%s145_s2 + $0x8] sm:$0xf]  ;;  %v27_v17 = vmax.bf16 %v23_v13, %v19_v11 }
   0x4   :  { %v33_v4 = vld [vmem:[%s146_s3] sm:$0xf]  ;;  %v34_v10 = vld [vmem:[%s146_s3 + $0x4] sm:$0xf]  ;;  %v35_v15 = vld [vmem:[%s146_s3 + $0x8] sm:$0xf] }
   0x5   :  { %v37_v7 = vmax.bf16 %v33_v4, %v29_v2  ;;  %v38_v12 = vmax.bf16 %v34_v10, %v30_v9  ;;  %v39_v18 = vmax.bf16 %v35_v15, %v31_v14  ;;  %v20_v19 = vld [vmem:[%s143_s0 + $0xc] sm:$0xf] }
   0x6   :  { %v24_v20 = vld [vmem:[%s144_s1 + $0xc] sm:$0xf] }
   0x7   :  { %v41_v16 = vmax.bf16 %v37_v7, %v25_v3  ;;  %v32_v21 = vld [vmem:[%s145_s2 + $0xc] sm:$0xf]  ;;  %v42_v22 = vmax.bf16 %v38_v12, %v26_v8  ;;  %v28_v23 = vmax.bf16 %v24_v20, %v20_v19  ;;  %v43_v25 = vmax.bf16 %v39_v18, %v27_v17 }
   0x8   :  { %v36_v24 = vld [vmem:[%s146_s3 + $0xc] sm:$0xf] }
   0x9   :  { %46 = vst.msk [vmem:[%s147_s4] sm:$0xf] %vm45_vm0, %v41_v16  ;;  %v40_v26 = vmax.bf16 %v36_v24, %v32_v21  ;;  %47 = vst.msk [vmem:[%s147_s4 + $0x4] sm:$0xf] %vm45_vm0, %v42_v22 }
   0xa   :  { %48 = vst.msk [vmem:[%s147_s4 + $0x8] sm:$0xf] %vm45_vm0, %v43_v25 }
   0xb   :  { %v44_v27 = vmax.bf16 %v40_v26, %v28_v23 }
   0xd   :  { %49 = vst.msk [vmem:[%s147_s4 + $0xc] sm:$0xf] %vm45_vm0, %v44_v27 }

// kernel: convnet_forward.19
= control target key start
LH: loop header
LB: loop body
LE: loop exit
PB: predicated region body
PF: predicated region fallthrough
CT: control target
= control target key end

     0   :  { %v319_v0 = vmov 0   ;;  %vm112_vm0 = vcmask 130048   ;;  %vm170_vm1 = vcmask 261120   ;;  %v211_v59 = vlaneseq  ;;  %s410_s1 = inlined_call_operand.vmem [shape: bf16[144,32], index: 1, kind: input, shape index: {}]   ;;  %s411_s0 = inlined_call_operand.vmem [shape: bf16[32,144], index: 0, kind: input, shape index: {}]   ;;  %s412_s2 = inlined_call_operand.vmem [shape: f32[1,32], index: 2, kind: input, shape index: {}]   ;;  %s413_s3 = inlined_call_operand.vmem [shape: f32[1,32], index: 3, kind: input, shape index: {}]   ;;  %s414_s4 = inlined_call_operand.vmem [shape: bf16[32,32], index: 4, kind: output, shape index: {}]  }
   0x1   :  { %119 = vmatprep.subr.bf16.mxu0 %v319_v0  ;;  %283 = vmatprep.subr.bf16.mxu1 %v319_v0  ;;  %v302_v1 = vld [vmem:[%s410_s1 + $0x38] sm:$0xff]   ;;  %v303_v2 = vld [vmem:[%s410_s1 + $0x30] sm:$0xff]   ;;  %v304_v3 = vld [vmem:[%s410_s1 + $0x28] sm:$0xff]   ;;  %vm250_vm2 = vcmask 257024  }
   0x2   :  { %120 = vmatpush1.bf16.msra.mxu0 %v302_v1  ;;  %292 = vmatpush1.bf16.msra.mxu1 %v302_v1  ;;  %v305_v4 = vld [vmem:[%s410_s1 + $0x20] sm:$0xff]   ;;  %v316_v6 = vld [vmem:[%s411_s0 + $0x14] ss:$8 sps:$4 sm:$0xff]   ;;  %v308_v9 = vld [vmem:[%s410_s1 + $0x8] sm:$0xff]   ;;  %v212_v60 = vshrl.u32 %v211_v59, 7 }
   0x3   :  { %121 = vmatprep.subr.bf16.mxu0 %v319_v0  ;;  %284 = vmatprep.subr.bf16.mxu1 %v319_v0  ;;  %v313_v5 = vld [vmem:[%s411_s0 + $0x4] ss:$8 sps:$4 sm:$0xff]   ;;  %v306_v7 = vld [vmem:[%s410_s1 + $0x18] sm:$0xff]   ;;  %v307_v8 = vld [vmem:[%s410_s1 + $0x10] sm:$0xff]  }
   0x4   :  { %272 = vmatprep.mubr.msk.bf16.mxu0 %vm112_vm0, %v313_v5  ;;  %273 = vmatprep.mubr.msk.bf16.mxu1 %vm112_vm0, %v316_v6  ;;  %v309_v10 = vld [vmem:[%s410_s1] sm:$0xff]   ;;  %v314_v13 = vld [vmem:[%s411_s0 + $0x10] ss:$8 sps:$4 sm:$0xff]   ;;  %v213_v62 = vsub.s32 0, %v212_v60 }
   0x5   :  { %v310_v11 = vld [vmem:[%s410_s1 + $0x40] sm:$0xff]  }
   0x6   :  { %122 = vmatpush1.bf16.msra.mxu0 %v303_v2  ;;  %293 = vmatpush1.bf16.msra.mxu1 %v303_v2  ;;  %v311_v12 = vld [vmem:[%s411_s0] ss:$8 sps:$4 sm:$0xff]  }
   0x7   :  { %123 = vmatprep.subr.bf16.mxu0 %v319_v0  ;;  %285 = vmatprep.subr.bf16.mxu1 %v319_v0  ;;  %v168_v61 = vld [vmem:[%s412_s2] sm:$0x1] }
   0x8   :  { %v274_v2 = vld [vmem:[%s413_s3] ss:$0 sm:$0xff] }
   0xa   :  { %124 = vmatpush1.bf16.msra.mxu0 %v304_v3  ;;  %294 = vmatpush1.bf16.msra.mxu1 %v304_v3 }
   0xb   :  { %125 = vmatprep.subr.bf16.mxu0 %v319_v0  ;;  %286 = vmatprep.subr.bf16.mxu1 %v319_v0 }
   0xe   :  { %126 = vmatpush1.bf16.msra.mxu0 %v305_v4  ;;  %295 = vmatpush1.bf16.msra.mxu1 %v305_v4 }
   0xf   :  { %127 = vmatprep.subr.bf16.mxu0 %v319_v0  ;;  %287 = vmatprep.subr.bf16.mxu1 %v319_v0 }
  0x12   :  { %128 = vmatpush1.bf16.msra.mxu0 %v306_v7  ;;  %296 = vmatpush1.bf16.msra.mxu1 %v306_v7 }
  0x13   :  { %129 = vmatprep.subr.bf16.mxu0 %v319_v0  ;;  %288 = vmatprep.subr.bf16.mxu1 %v319_v0 }
  0x16   :  { %130 = vmatpush1.bf16.msra.mxu0 %v307_v8  ;;  %297 = vmatpush1.bf16.msra.mxu1 %v307_v8 }
  0x17   :  { %131 = vmatprep.subr.bf16.mxu0 %v319_v0  ;;  %289 = vmatprep.subr.bf16.mxu1 %v319_v0 }
  0x1a   :  { %132 = vmatpush1.bf16.msra.mxu0 %v308_v9  ;;  %298 = vmatpush1.bf16.msra.mxu1 %v308_v9 }
  0x1b   :  { %133 = vmatprep.subr.bf16.mxu0 %v319_v0  ;;  %290 = vmatprep.subr.bf16.mxu1 %v319_v0 }
  0x1e   :  { %134 = vmatpush1.bf16.msra.mxu0 %v309_v10  ;;  %299 = vmatpush1.bf16.msra.mxu1 %v309_v10 }
  0x1f   :  { %149 = vmatprep.subr.bf16.mxu0 %v319_v0  ;;  %291 = vmatprep.subr.bf16.mxu1 %v319_v0 }
  0x22   :  { %150 = vmatpush2.bf16.msra.mxu0 %v310_v11  ;;  %300 = vmatpush2.bf16.msra.mxu1 %v310_v11 }
  0x25   :  { %152 = vmatmul.mubr.bf16.vlgmr.msra.gmra.mxu0 %v311_v12  ;;  %160 = vmatmul.mubr.bf16.vlgmr.msra.gmra.mxu1 %v314_v13 }
  0xe5   :  { %v153_v14 = vpop.f32.mrf.mxu0  ;;  %v161_v15 = vpop.f32.mrf.mxu1 }
  0xe6   :  { %v171_v20 = vsel %vm170_vm1, %v153_v14, 0.0  ;;  %v174_v25 = vsel %vm170_vm1, %v161_v15, 0.0 }
  0xe7   :  { %v155_v16 = vpop.f32.mrf.mxu0  ;;  %v163_v17 = vpop.f32.mrf.mxu1 }
  0xe9   :  { %v156_v18 = vpop.f32.mrf.mxu0  ;;  %v164_v19 = vpop.f32.mrf.mxu1 }
  0xea   :  { %v172_v21 = vsel %vm170_vm1, %v156_v18, 0.0  ;;  %v176_v27 = vsel %vm170_vm1, %v164_v19, 0.0 }
  0xeb   :  { %v173_v22 = vadd.f32 %v172_v21, %v171_v20  ;;  %v158_v23 = vpop.f32.mrf.mxu0  ;;  %v166_v24 = vpop.f32.mrf.mxu1 }
  0xed   :  { %v175_v26 = vadd.f32 %v174_v25, %v173_v22 }
  0xef   :  { %v177_v28 = vadd.f32 %v176_v27, %v175_v26 }
  0xf1   :  { %v178_v29 = vrot.slane %v177_v28, 4 }
  0xf3   :  { %v179_v30 = vadd.f32 %v178_v29, %v177_v28 }
  0xf5   :  { %v180_v31 = vrot.slane %v179_v30, 2 }
  0xf7   :  { %v181_v32 = vadd.f32 %v180_v31, %v179_v30 }
  0xf9   :  { %v182_v33 = vrot.slane %v181_v32, 1 }
  0xfb   :  { %v183_v34 = vadd.f32 %v182_v33, %v181_v32 }
  0xfd   :  { %v184_v35 = vmul.f32 0.03125, %v183_v34 }
  0xff   :  { %v185_v36 = vsub.f32 %v153_v14, %v184_v35  ;;  %v186_v37 = vsub.f32 %v156_v18, %v184_v35  ;;  %v187_v38 = vsub.f32 %v161_v15, %v184_v35  ;;  %v188_v39 = vsub.f32 %v164_v19, %v184_v35 }
 0x101   :  { %v189_v40 = vmul.f32 %v185_v36, %v185_v36  ;;  %v190_v41 = vmul.f32 %v186_v37, %v186_v37  ;;  %v191_v42 = vmul.f32 %v187_v38, %v187_v38  ;;  %v192_v43 = vmul.f32 %v188_v39, %v188_v39 }
 0x103   :  { %v193_v44 = vsel %vm170_vm1, %v189_v40, 0.0  ;;  %v194_v45 = vsel %vm170_vm1, %v190_v41, 0.0  ;;  %v196_v47 = vsel %vm170_vm1, %v191_v42, 0.0  ;;  %v198_v49 = vsel %vm170_vm1, %v192_v43, 0.0 }
 0x104   :  { %v195_v46 = vadd.f32 %v194_v45, %v193_v44 }
 0x106   :  { %v197_v48 = vadd.f32 %v196_v47, %v195_v46 }
 0x108   :  { %v199_v50 = vadd.f32 %v198_v49, %v197_v48 }
 0x10a   :  { %v200_v51 = vrot.slane %v199_v50, 4 }
 0x10c   :  { %v201_v52 = vadd.f32 %v200_v51, %v199_v50 }
 0x10e   :  { %v202_v53 = vrot.slane %v201_v52, 2 }
 0x110   :  { %v203_v54 = vadd.f32 %v202_v53, %v201_v52 }
 0x112   :  { %v204_v55 = vrot.slane %v203_v54, 1 }
 0x114   :  { %v205_v56 = vadd.f32 %v204_v55, %v203_v54 }
 0x116   :  { %v206_v57 = vmul.f32 0.03125, %v205_v56 }
 0x118   :  { %v207_v58 = vadd.f32 1e-05, %v206_v57 }
 0x11a   :  { %317 = vrsqrt.f32 %v207_v58 }
 0x127   :  { %v318_v63 = vpop.eup %317 }
 0x128   :  { %v209_v0 = vmul.f32 %v318_v63, %v168_v61 }
 0x12a   :  { %v214_v1 = vrot.slane %v209_v0, %v213_v62 }
 0x12c   :  { %v216_v3 = vmul.f32 %v214_v1, %v185_v36  ;;  %v217_v4 = vmul.f32 %v214_v1, %v186_v37  ;;  %v218_v5 = vmul.f32 %v214_v1, %v187_v38  ;;  %v219_v6 = vmul.f32 %v214_v1, %v188_v39 }
 0x12e   :  { %v226_v7 = vadd.f32 %v274_v2, %v216_v3  ;;  %v227_v8 = vadd.f32 %v274_v2, %v217_v4  ;;  %v228_v9 = vadd.f32 %v274_v2, %v218_v5  ;;  %v229_v10 = vadd.f32 %v274_v2, %v219_v6 }
 0x130   :  { %v230_v11 = vmax.f32 %v226_v7, 0.0  ;;  %v231_v12 = vmax.f32 %v227_v8, 0.0  ;;  %v232_v13 = vmax.f32 %v228_v9, 0.0  ;;  %v233_v14 = vmax.f32 %v229_v10, 0.0 }
 0x132   :  { %v279_v15 = vpack.c.bf16 %v230_v11, %v230_v11  ;;  %v280_v16 = vpack.c.bf16 %v231_v12, %v231_v12  ;;  %v281_v17 = vpack.c.bf16 %v232_v13, %v232_v13  ;;  %v282_v18 = vpack.c.bf16 %v233_v14, %v233_v14 }
 0x134   :  { %251 = vst.msk [vmem:[%s414_s4] sm:$0xf] %vm250_vm2, %v279_v15  ;;  %252 = vst.msk [vmem:[%s414_s4 + $0x4] sm:$0xf] %vm250_vm2, %v280_v16 }
 0x135   :  { %253 = vst.msk [vmem:[%s414_s4 + $0x8] sm:$0xf] %vm250_vm2, %v281_v17  ;;  %254 = vst.msk [vmem:[%s414_s4 + $0xc] sm:$0xf] %vm250_vm2, %v282_v18 }

// kernel: convnet_forward.20
= control target key start
LH: loop header
LB: loop body
LE: loop exit
PB: predicated region body
PF: predicated region fallthrough
CT: control target
= control target key end

     0   :  { %vm24_vm0 = vcmask 257024   ;;  %s70_s0 = inlined_call_operand.vmem [shape: bf16[8,32], index: 0, kind: input, shape index: {}]   ;;  %s71_s1 = inlined_call_operand.vmem [shape: bf16[8,32], index: 1, kind: input, shape index: {}]   ;;  %s72_s2 = inlined_call_operand.vmem [shape: bf16[8,32], index: 2, kind: input, shape index: {}]   ;;  %s73_s3 = inlined_call_operand.vmem [shape: bf16[8,32], index: 3, kind: input, shape index: {}]   ;;  %s74_s4 = inlined_call_operand.vmem [shape: bf16[8,32], index: 4, kind: output, shape index: {}]  }
   0x1   :  { %v17_v0 = vld [vmem:[%s70_s0] sm:$0xf] }
   0x2   :  { %v18_v1 = vld [vmem:[%s71_s1] sm:$0xf] }
   0x3   :  { %v20_v2 = vld [vmem:[%s72_s2] sm:$0xf]  ;;  %v19_v3 = vmax.bf16 %v18_v1, %v17_v0 }
   0x4   :  { %v21_v4 = vld [vmem:[%s73_s3] sm:$0xf] }
   0x5   :  { %v22_v5 = vmax.bf16 %v21_v4, %v20_v2 }
   0x7   :  { %v23_v6 = vmax.bf16 %v22_v5, %v19_v3 }
   0x9   :  { %25 = vst.msk [vmem:[%s74_s4] sm:$0xf] %vm24_vm0, %v23_v6 }

// kernel: convnet_forward.22
= control target key start
LH: loop header
LB: loop body
LE: loop exit
PB: predicated region body
PF: predicated region fallthrough
CT: control target
= control target key end

     0   :  { %vm24_vm0 = vcmask 253952   ;;  %s70_s0 = inlined_call_operand.vmem [shape: bf16[2,32], index: 0, kind: input, shape index: {}]   ;;  %s71_s1 = inlined_call_operand.vmem [shape: bf16[2,32], index: 1, kind: input, shape index: {}]   ;;  %s72_s2 = inlined_call_operand.vmem [shape: bf16[2,32], index: 2, kind: input, shape index: {}]   ;;  %s73_s3 = inlined_call_operand.vmem [shape: bf16[2,32], index: 3, kind: input, shape index: {}]   ;;  %s74_s4 = inlined_call_operand.vmem [shape: bf16[2,32], index: 4, kind: output, shape index: {}]  }
   0x1   :  { %v17_v0 = vld [vmem:[%s70_s0] sm:$0x1] }
   0x2   :  { %v18_v1 = vld [vmem:[%s71_s1] sm:$0x1] }
   0x3   :  { %v20_v2 = vld [vmem:[%s72_s2] sm:$0x1]  ;;  %v19_v3 = vmax.bf16 %v18_v1, %v17_v0 }
   0x4   :  { %v21_v4 = vld [vmem:[%s73_s3] sm:$0x1] }
   0x5   :  { %v22_v5 = vmax.bf16 %v21_v4, %v20_v2 }
   0x7   :  { %v23_v6 = vmax.bf16 %v22_v5, %v19_v3 }
   0x9   :  { %25 = vst.msk [vmem:[%s74_s4] sm:$0x1] %vm24_vm0, %v23_v6 }

// kernel: convnet_forward.21
= control target key start
LH: loop header
LB: loop body
LE: loop exit
PB: predicated region body
PF: predicated region fallthrough
CT: control target
= control target key end

     0   :  { %v384_v1 = vmov 0.0   ;;  %vm385_vm0 = vmmov 0   ;;  %vm174_vm1 = vcmask 261120   ;;  %v282_v52 = vlaneseq  ;;  %s483_s1 = inlined_call_operand.vmem [shape: bf16[288,32], index: 1, kind: input, shape index: {}]   ;;  %s484_s0 = inlined_call_operand.vmem [shape: bf16[8,288], index: 0, kind: input, shape index: {}]   ;;  %s485_s2 = inlined_call_operand.vmem [shape: f32[1,32], index: 2, kind: input, shape index: {}]   ;;  %s486_s3 = inlined_call_operand.vmem [shape: f32[1,32], index: 3, kind: input, shape index: {}]   ;;  %s487_s4 = inlined_call_operand.vmem [shape: bf16[8,32], index: 4, kind: output, shape index: {}]  }
   0x1   :  { %v361_v0 = vld [vmem:[%s483_s1 + $0x78] sm:$0xff]   ;;  %351 = vmatprep.subr.bf16.mxu1 %v384_v1  ;;  %355 = vmatprep.mubr.msk.bf16.mxu1 %vm385_vm0, %v384_v1  ;;  %v363_v3 = vld [vmem:[%s483_s1 + $0x70] sm:$0xff]   ;;  %v365_v5 = vld [vmem:[%s483_s1 + $0x68] sm:$0xff]   ;;  %vm297_vm2 = vcmask 257024  }
   0x2   :  { %v362_v2 = vld [vmem:[%s483_s1 + $0x38] sm:$0xff]   ;;  %326 = vmatprep.subr.bf16.mxu0 %v361_v0  ;;  %v364_v4 = vld [vmem:[%s483_s1 + $0x30] sm:$0xff]   ;;  %v366_v6 = vld [vmem:[%s483_s1 + $0x28] sm:$0xff]   ;;  %v283_v53 = vshrl.u32 %v282_v52, 7 }
   0x3   :  { %327 = vmatpush3.bf16.msra.mxu0 %v362_v2  ;;  %v367_v7 = vld [vmem:[%s483_s1 + $0x60] sm:$0xff]   ;;  %v369_v9 = vld [vmem:[%s483_s1 + $0x58] sm:$0xff]   ;;  %v373_v10 = vld [vmem:[%s483_s1 + $0x88] sm:$0xff]  }
   0x4   :  { %328 = vmatprep.subr.bf16.mxu0 %v363_v3  ;;  %v368_v8 = vld [vmem:[%s483_s1 + $0x20] sm:$0xff]   ;;  %v370_v11 = vld [vmem:[%s483_s1 + $0x18] sm:$0xff]   ;;  %352 = vmatpush3.bf16.msra.mxu1 %v373_v10  ;;  %v371_v13 = vld [vmem:[%s483_s1 + $0x50] sm:$0xff]   ;;  %v284_v55 = vsub.s32 0, %v283_v53 }
   0x5   :  { %353 = vmatprep.subr.bf16.mxu1 %v384_v1  ;;  %v376_v12 = vld [vmem:[%s483_s1 + $0x80] sm:$0xff]   ;;  %v379_v14 = vld [vmem:[%s484_s0 + $0x8] ss:$0 sps:$4 sm:$0xff]   ;;  %v372_v16 = vld [vmem:[%s483_s1 + $0x10] sm:$0xff]  }
   0x6   :  { %v18_v15 = vld [vmem:[%s484_s0] sm:$0xff]  ;;  %v374_v18 = vld [vmem:[%s483_s1 + $0x48] sm:$0xff]  }
   0x7   :  { %329 = vmatpush3.bf16.msra.mxu0 %v364_v4  ;;  %v304_v17 = vcombine.high %v18_v15, %v18_v15  ;;  %v375_v19 = vld [vmem:[%s483_s1 + $0x8] sm:$0xff]   ;;  %v377_v20 = vld [vmem:[%s483_s1 + $0x40] sm:$0xff]   ;;  %v303_v22 = vcombine.low %v18_v15, %v18_v15 }
   0x8   :  { %330 = vmatprep.subr.bf16.mxu0 %v365_v5  ;;  %354 = vmatpush3.bf16.msra.mxu1 %v376_v12  ;;  %v378_v21 = vld [vmem:[%s483_s1] sm:$0xff]  }
   0x9   :  { %210 = vmatprep.mubr.bf16.mxu0 %v304_v17  ;;  %v258_v54 = vld [vmem:[%s485_s2] sm:$0x1] }
   0xa   :  { %v325_v59 = vld [vmem:[%s486_s3] ss:$0 sm:$0xff] }
   0xb   :  { %331 = vmatpush3.bf16.msra.mxu0 %v366_v6  ;;  %356 = vmatmul.mubr.msk.bf16.vlgmr.msra.gmra.mxu1 %vm174_vm1, %v379_v14 }
   0xc   :  { %332 = vmatprep.subr.bf16.mxu0 %v367_v7 }
   0xf   :  { %333 = vmatpush3.bf16.msra.mxu0 %v368_v8 }
  0x10   :  { %334 = vmatprep.subr.bf16.mxu0 %v369_v9 }
  0x13   :  { %335 = vmatpush3.bf16.msra.mxu0 %v370_v11 }
  0x14   :  { %336 = vmatprep.subr.bf16.mxu0 %v371_v13 }
  0x17   :  { %337 = vmatpush3.bf16.msra.mxu0 %v372_v16 }
  0x18   :  { %338 = vmatprep.subr.bf16.mxu0 %v374_v18 }
  0x1b   :  { %339 = vmatpush3.bf16.msra.mxu0 %v375_v19 }
  0x1c   :  { %340 = vmatprep.subr.bf16.mxu0 %v377_v20 }
  0x1f   :  { %341 = vmatpush3.bf16.msra.mxu0 %v378_v21 }
  0x22   :  { %211 = vmatmul.mubr.bf16.vlgmr.msra.gmra.mxu0 %v303_v22 }
  0xcb   :  { %v252_v23 = vpop.f32.mrf.mxu1 }
  0xcd   :  { %v357_v24 = vpop.f32.mrf.mxu1 }
  0xcf   :  { %v255_v25 = vpop.f32.mrf.mxu1 }
  0xd1   :  { %v358_v26 = vpop.f32.mrf.mxu1 }
  0xe2   :  { %v342_v27 = vpop.f32.mrf.mxu0 }
  0xe4   :  { %v343_v28 = vpop.f32.mrf.mxu0 }
  0xe5   :  { %v344_v29 = vadd.f32 %v343_v28, %v342_v27 }
  0xe6   :  { %v345_v30 = vpop.f32.mrf.mxu0 }
  0xe7   :  { %v253_v31 = vadd.f32 %v344_v29, %v252_v23 }
  0xe8   :  { %v346_v32 = vpop.f32.mrf.mxu0 }
  0xe9   :  { %v260_v33 = vsel %vm174_vm1, %v253_v31, 0.0 }
  0xea   :  { %v261_v34 = vrot.slane %v260_v33, 4 }
  0xec   :  { %v262_v35 = vadd.f32 %v261_v34, %v260_v33 }
  0xee   :  { %v263_v36 = vrot.slane %v262_v35, 2 }
  0xf0   :  { %v264_v37 = vadd.f32 %v263_v36, %v262_v35 }
  0xf2   :  { %v265_v38 = vrot.slane %v264_v37, 1 }
  0xf4   :  { %v266_v39 = vadd.f32 %v265_v38, %v264_v37 }
  0xf6   :  { %v267_v40 = vmul.f32 0.125, %v266_v39 }
  0xf8   :  { %v268_v41 = vsub.f32 %v253_v31, %v267_v40 }
  0xfa   :  { %v269_v42 = vmul.f32 %v268_v41, %v268_v41 }
  0xfc   :  { %v270_v43 = vsel %vm174_vm1, %v269_v42, 0.0 }
  0xfd   :  { %v271_v44 = vrot.slane %v270_v43, 4 }
  0xff   :  { %v272_v45 = vadd.f32 %v271_v44, %v270_v43 }
 0x101   :  { %v273_v46 = vrot.slane %v272_v45, 2 }
 0x103   :  { %v274_v47 = vadd.f32 %v273_v46, %v272_v45 }
 0x105   :  { %v275_v48 = vrot.slane %v274_v47, 1 }
 0x107   :  { %v276_v49 = vadd.f32 %v275_v48, %v274_v47 }
 0x109   :  { %v277_v50 = vmul.f32 0.125, %v276_v49 }
 0x10b   :  { %v278_v51 = vadd.f32 1e-05, %v277_v50 }
 0x10d   :  { %382 = vrsqrt.f32 %v278_v51 }
 0x11a   :  { %v383_v56 = vpop.eup %382 }
 0x11b   :  { %v280_v57 = vmul.f32 %v383_v56, %v258_v54 }
 0x11d   :  { %v285_v58 = vrot.slane %v280_v57, %v284_v55 }
 0x11f   :  { %v287_v60 = vmul.f32 %v285_v58, %v268_v41 }
 0x121   :  { %v294_v61 = vadd.f32 %v325_v59, %v287_v60 }
 0x123   :  { %v295_v62 = vmax.f32 %v294_v61, 0.0 }
 0x125   :  { %v296_v63 = vpack.c.bf16 %v295_v62, %v295_v62 }
 0x127   :  { %298 = vst.msk [vmem:[%s487_s4] sm:$0xf] %vm297_vm2, %v296_v63 }

// kernel: convnet_forward.23
= control target key start
LH: loop header
LB: loop body
LE: loop exit
PB: predicated region body
PF: predicated region fallthrough
CT: control target
= control target key end

     0   :  { %v272_v0 = vmov 0.0   ;;  %vm273_vm0 = vmmov 0   ;;  %vm44_vm1 = vcmask 261120   ;;  %vm90_vm2 = vcmask 254976   ;;  %s350_s1 = inlined_call_operand.vmem [shape: bf16[32,32], index: 1, kind: input, shape index: {}]   ;;  %s351_s0 = inlined_call_operand.vmem [shape: bf16[2,32], index: 0, kind: input, shape index: {}]   ;;  %s352_s4 = inlined_call_operand.vmem [shape: bf16[32,32], index: 4, kind: input, shape index: {}]   ;;  %s353_s2 = inlined_call_operand.vmem [shape: f32[1,32], index: 2, kind: input, shape index: {}]   ;;  %s354_s3 = inlined_call_operand.vmem [shape: f32[1,32], index: 3, kind: input, shape index: {}]   ;;  %s355_s5 = inlined_call_operand.vmem [shape: f32[1,32], index: 5, kind: input, shape index: {}]   ;;  %s356_s6 = inlined_call_operand.vmem [shape: f32[1,32], index: 6, kind: input, shape index: {}]   ;;  %s357_s7 = inlined_call_operand.vmem [shape: bf16[2,32], index: 7, kind: output, shape index: {}]  }
   0x1   :  { %246 = vmatprep.subr.bf16.mxu0 %v272_v0  ;;  %v264_v1 = vld [vmem:[%s350_s1 + $0x8] sm:$0xff]   ;;  %250 = vmatprep.mubr.msk.bf16.mxu0 %vm273_vm0, %v272_v0  ;;  %v265_v2 = vld [vmem:[%s350_s1] sm:$0xff]   ;;  %v113_v29 = vlaneseq  ;;  %vm226_vm3 = vcmask 253952  }
   0x2   :  { %254 = vmatprep.subr.bf16.mxu1 %v272_v0  ;;  %258 = vmatprep.mubr.msk.bf16.mxu1 %vm273_vm0, %v272_v0  ;;  %v27_v3 = vld [vmem:[%s351_s0] sm:$0x1]  ;;  %v266_v4 = vld [vmem:[%s352_s4 + $0x8] sm:$0xff]  }
   0x3   :  { %247 = vmatpush3.bf16.msra.mxu0 %v264_v1  ;;  %255 = vmatpush3.bf16.msra.mxu1 %v266_v4  ;;  %v267_v5 = vld [vmem:[%s352_s4] sm:$0xff]   ;;  %v114_v30 = vshrl.u32 %v113_v29, 7 }
   0x4   :  { %248 = vmatprep.subr.bf16.mxu0 %v272_v0  ;;  %256 = vmatprep.subr.bf16.mxu1 %v272_v0  ;;  %v88_v31 = vld [vmem:[%s353_s2] sm:$0x1] }
   0x5   :  { %v115_v32 = vsub.s32 0, %v114_v30  ;;  %v235_v36 = vld [vmem:[%s354_s3] ss:$0 sm:$0xff] }
   0x6   :  { %v187_v0 = vld [vmem:[%s355_s5] sm:$0x1] }
   0x7   :  { %249 = vmatpush3.bf16.msra.mxu0 %v265_v2  ;;  %257 = vmatpush3.bf16.msra.mxu1 %v267_v5  ;;  %v239_v4 = vld [vmem:[%s356_s6] ss:$0 sm:$0xff] }
   0xa   :  { %251 = vmatmul.mubr.msk.bf16.vlgmr.msra.gmra.mxu0 %vm44_vm1, %v27_v3 }
  0xca   :  { %v82_v6 = vpop.f32.mrf.mxu0 }
  0xcb   :  { %v91_v7 = vsel %vm90_vm2, %v82_v6, 0.0 }
  0xcc   :  { %v92_v8 = vrot.slane %v91_v7, 4  ;;  %v252_v9 = vpop.f32.mrf.mxu0 }
  0xce   :  { %v93_v10 = vadd.f32 %v92_v8, %v91_v7  ;;  %v85_v11 = vpop.f32.mrf.mxu0 }
  0xd0   :  { %v94_v12 = vrot.slane %v93_v10, 2  ;;  %v253_v13 = vpop.f32.mrf.mxu0 }
  0xd2   :  { %v95_v14 = vadd.f32 %v94_v12, %v93_v10 }
  0xd4   :  { %v96_v15 = vrot.slane %v95_v14, 1 }
  0xd6   :  { %v97_v16 = vadd.f32 %v96_v15, %v95_v14 }
  0xd8   :  { %v98_v17 = vmul.f32 0.5, %v97_v16 }
  0xda   :  { %v99_v18 = vsub.f32 %v82_v6, %v98_v17 }
  0xdc   :  { %v100_v19 = vmul.f32 %v99_v18, %v99_v18 }
  0xde   :  { %v101_v20 = vsel %vm90_vm2, %v100_v19, 0.0 }
  0xdf   :  { %v102_v21 = vrot.slane %v101_v20, 4 }
  0xe1   :  { %v103_v22 = vadd.f32 %v102_v21, %v101_v20 }
  0xe3   :  { %v104_v23 = vrot.slane %v103_v22, 2 }
  0xe5   :  { %v105_v24 = vadd.f32 %v104_v23, %v103_v22 }
  0xe7   :  { %v106_v25 = vrot.slane %v105_v24, 1 }
  0xe9   :  { %v107_v26 = vadd.f32 %v106_v25, %v105_v24 }
  0xeb   :  { %v108_v27 = vmul.f32 0.5, %v107_v26 }
  0xed   :  { %v109_v28 = vadd.f32 1e-05, %v108_v27 }
  0xef   :  { %268 = vrsqrt.f32 %v109_v28 }
  0xfc   :  { %v269_v33 = vpop.eup %268 }
  0xfd   :  { %v111_v34 = vmul.f32 %v269_v33, %v88_v31 }
  0xff   :  { %v116_v35 = vrot.slane %v111_v34, %v115_v32 }
 0x101   :  { %v118_v37 = vmul.f32 %v116_v35, %v99_v18 }
 0x103   :  { %v125_v38 = vadd.f32 %v235_v36, %v118_v37 }
 0x105   :  { %v126_v39 = vmax.f32 %v125_v38, 0.0 }
 0x107   :  { %v127_v40 = vpack.c.bf16 %v126_v39, %v126_v39 }
 0x109   :  { %259 = vmatmul.mubr.msk.bf16.vlgmr.msra.gmra.mxu1 %vm44_vm1, %v127_v40 }
 0x1c9   :  { %v181_v41 = vpop.f32.mrf.mxu1 }
 0x1ca   :  { %v189_v42 = vsel %vm90_vm2, %v181_v41, 0.0 }
 0x1cb   :  { %v190_v43 = vrot.slane %v189_v42, 4  ;;  %v260_v44 = vpop.f32.mrf.mxu1 }
 0x1cd   :  { %v191_v45 = vadd.f32 %v190_v43, %v189_v42  ;;  %v184_v46 = vpop.f32.mrf.mxu1 }
 0x1cf   :  { %v192_v47 = vrot.slane %v191_v45, 2  ;;  %v261_v48 = vpop.f32.mrf.mxu1 }
 0x1d1   :  { %v193_v49 = vadd.f32 %v192_v47, %v191_v45 }
 0x1d3   :  { %v194_v50 = vrot.slane %v193_v49, 1 }
 0x1d5   :  { %v195_v51 = vadd.f32 %v194_v50, %v193_v49 }
 0x1d7   :  { %v196_v52 = vmul.f32 0.5, %v195_v51 }
 0x1d9   :  { %v197_v53 = vsub.f32 %v181_v41, %v196_v52 }
 0x1db   :  { %v198_v54 = vmul.f32 %v197_v53, %v197_v53 }
 0x1dd   :  { %v199_v55 = vsel %vm90_vm2, %v198_v54, 0.0 }
 0x1de   :  { %v200_v56 = vrot.slane %v199_v55, 4 }
 0x1e0   :  { %v201_v57 = vadd.f32 %v200_v56, %v199_v55 }
 0x1e2   :  { %v202_v58 = vrot.slane %v201_v57, 2 }
 0x1e4   :  { %v203_v59 = vadd.f32 %v202_v58, %v201_v57 }
 0x1e6   :  { %v204_v60 = vrot.slane %v203_v59, 1 }
 0x1e8   :  { %v205_v61 = vadd.f32 %v204_v60, %v203_v59 }
 0x1ea   :  { %v206_v62 = vmul.f32 0.5, %v205_v61 }
 0x1ec   :  { %v207_v63 = vadd.f32 1e-05, %v206_v62 }
 0x1ee   :  { %270 = vrsqrt.f32 %v207_v63 }
 0x1fb   :  { %v271_v1 = vpop.eup %270 }
 0x1fc   :  { %v209_v2 = vmul.f32 %v271_v1, %v187_v0 }
 0x1fe   :  { %v214_v3 = vrot.slane %v209_v2, %v115_v32 }
 0x200   :  { %v216_v5 = vmul.f32 %v214_v3, %v197_v53 }
 0x202   :  { %v223_v6 = vadd.f32 %v239_v4, %v216_v5 }
 0x204   :  { %v224_v7 = vmax.f32 %v223_v6, 0.0 }
 0x206   :  { %v225_v8 = vpack.c.bf16 %v224_v7, %v224_v7 }
 0x208   :  { %227 = vst.msk [vmem:[%s357_s7] sm:$0x1] %vm226_vm3, %v225_v8 }

// kernel: convnet_forward.25
= control target key start
LH: loop header
LB: loop body
LE: loop exit
PB: predicated region body
PF: predicated region fallthrough
CT: control target
= control target key end

     0   :  { %vm200_vm0 = vcmask 261120   ;;  %vm307_vm1 = vcmask 130048   ;;  %vm387_vm2 = vcmask 125952   ;;  %s622_s1 = inlined_call_operand.vmem [shape: bf16[288,16], index: 1, kind: input, shape index: {}]   ;;  %s623_s0 = inlined_call_operand.vmem [shape: bf16[32,288], index: 0, kind: input, shape index: {}]   ;;  %s624_s2 = inlined_call_operand.vmem [shape: f32[1,16], index: 2, kind: input, shape index: {}]   ;;  %s625_s3 = inlined_call_operand.vmem [shape: f32[1,16], index: 3, kind: input, shape index: {}]   ;;  %s626_s4 = inlined_call_operand.vmem [shape: bf16[32,16], index: 4, kind: output, shape index: {}]  }
   0x1   :  { %v471_v0 = vld [vmem:[%s622_s1 + $0x78] sm:$0xff]   ;;  %v473_v2 = vld [vmem:[%s622_s1 + $0x70] sm:$0xff]   ;;  %v475_v4 = vld [vmem:[%s622_s1 + $0x68] sm:$0xff]  }
   0x2   :  { %v472_v1 = vld [vmem:[%s622_s1 + $0x38] sm:$0xff]   ;;  %431 = vmatprep.subr.bf16.mxu0 %v471_v0  ;;  %v474_v3 = vld [vmem:[%s622_s1 + $0x30] sm:$0xff]   ;;  %v476_v5 = vld [vmem:[%s622_s1 + $0x28] sm:$0xff]  }
   0x3   :  { %432 = vmatpush3.bf16.msra.mxu0 %v472_v1  ;;  %v477_v6 = vld [vmem:[%s622_s1 + $0x60] sm:$0xff]   ;;  %v479_v8 = vld [vmem:[%s622_s1 + $0x58] sm:$0xff]   ;;  %v484_v9 = vld [vmem:[%s622_s1 + $0x88] sm:$0xff]  }
   0x4   :  { %433 = vmatprep.subr.bf16.mxu0 %v473_v2  ;;  %v478_v7 = vld [vmem:[%s622_s1 + $0x20] sm:$0xff]   ;;  %v480_v10 = vld [vmem:[%s622_s1 + $0x18] sm:$0xff]   ;;  %v481_v11 = vld [vmem:[%s622_s1 + $0x50] sm:$0xff]   ;;  %463 = vmatprep.subr.bf16.mxu1 %v484_v9 }
   0x5   :  { %464 = vmatpush3.bf16.msra.mxu1 %v484_v9  ;;  %v487_v12 = vld [vmem:[%s622_s1 + $0x80] sm:$0xff]   ;;  %v482_v13 = vld [vmem:[%s622_s1 + $0x10] sm:$0xff]   ;;  %v483_v14 = vld [vmem:[%s622_s1 + $0x48] sm:$0xff]  }
   0x6   :  { %465 = vmatprep.subr.bf16.mxu1 %v487_v12  ;;  %v491_v15 = vld [vmem:[%s623_s0 + $0x4] ss:$12 sps:$4 sm:$0xff]   ;;  %v492_v16 = vld [vmem:[%s623_s0 + $0x8] ss:$12 sps:$4 sm:$0xff]   ;;  %v493_v17 = vld [vmem:[%s623_s0 + $0x20] ss:$12 sps:$4 sm:$0xff]  }
   0x7   :  { %434 = vmatpush3.bf16.msra.mxu0 %v474_v3  ;;  %239 = vmatprep.mubr.bf16.mxu0 %v491_v15  ;;  %v485_v18 = vld [vmem:[%s622_s1 + $0x8] sm:$0xff]   ;;  %v486_v19 = vld [vmem:[%s622_s1 + $0x40] sm:$0xff]  }
   0x8   :  { %435 = vmatprep.subr.bf16.mxu0 %v475_v4  ;;  %467 = vmatprep.mubr.msk.bf16.mxu1 %vm200_vm0, %v492_v16  ;;  %v488_v20 = vld [vmem:[%s622_s1] sm:$0xff]   ;;  %v494_v22 = vld [vmem:[%s623_s0 + $0x1c] ss:$12 sps:$4 sm:$0xff]  }
   0x9   :  { %466 = vmatpush3.bf16.msra.mxu1 %v487_v12  ;;  %v489_v21 = vld [vmem:[%s623_s0] ss:$12 sps:$4 sm:$0xff]   ;;  %v496_v23 = vld [vmem:[%s623_s0 + $0x18] ss:$12 sps:$4 sm:$0xff]  }
   0xb   :  { %436 = vmatpush3.bf16.msra.mxu0 %v476_v5 }
   0xc   :  { %437 = vmatprep.subr.bf16.mxu0 %v477_v6  ;;  %468 = vmatmul.mubr.msk.bf16.vlgmr.msra.gmra.mxu1 %vm200_vm0, %v493_v17  ;;  %v348_v17 = vlaneseq }
   0xf   :  { %438 = vmatpush3.bf16.msra.mxu0 %v478_v7 }
  0x10   :  { %439 = vmatprep.subr.bf16.mxu0 %v479_v8 }
  0x13   :  { %440 = vmatpush3.bf16.msra.mxu0 %v480_v10 }
  0x14   :  { %441 = vmatprep.subr.bf16.mxu0 %v481_v11 }
  0x17   :  { %442 = vmatpush3.bf16.msra.mxu0 %v482_v13 }
  0x18   :  { %443 = vmatprep.subr.bf16.mxu0 %v483_v14 }
  0x1b   :  { %444 = vmatpush3.bf16.msra.mxu0 %v485_v18  ;;  %v349_v18 = vshrl.u32 %v348_v17, 7 }
  0x1c   :  { %445 = vmatprep.subr.bf16.mxu0 %v486_v19  ;;  %v305_v19 = vld [vmem:[%s624_s2] sm:$0x1] }
  0x1f   :  { %446 = vmatpush3.bf16.msra.mxu0 %v488_v20  ;;  %v350_v20 = vsub.s32 0, %v349_v18 }
  0x22   :  { %240 = vmatmul.mubr.bf16.vlgmr.msra.gmra.mxu0 %v489_v21 }
  0x23   :  { %247 = vmatprep.mubr.bf16.mxu0 %v494_v22 }
  0x2a   :  { %248 = vmatmul.mubr.bf16.gmra.mxu0 %v496_v23 }
  0xcc   :  { %v469_v24 = vpop.f32.mrf.mxu1 }
  0xce   :  { %v290_v26 = vpop.f32.mrf.mxu1 }
  0xd0   :  { %v470_v29 = vpop.f32.mrf.mxu1 }
  0xd2   :  { %v293_v33 = vpop.f32.mrf.mxu1 }
  0xe2   :  { %v447_v25 = vpop.f32.mrf.mxu0 }
  0xe4   :  { %v448_v27 = vpop.f32.mrf.mxu0 }
  0xe5   :  { %v449_v31 = vadd.f32 %v448_v27, %v447_v25 }
  0xe6   :  { %v450_v28 = vpop.f32.mrf.mxu0 }
  0xe7   :  { %v291_v37 = vadd.f32 %v449_v31, %v290_v26 }
  0xe8   :  { %v451_v30 = vpop.f32.mrf.mxu0 }
  0xe9   :  { %v452_v32 = vadd.f32 %v451_v30, %v450_v28  ;;  %v308_v43 = vsel %vm307_vm1, %v291_v37, 0.0 }
  0xea   :  { %v453_v34 = vpop.f32.mrf.mxu0 }
  0xeb   :  { %v294_v35 = vadd.f32 %v452_v32, %v293_v33 }
  0xec   :  { %v454_v36 = vpop.f32.mrf.mxu0 }
  0xed   :  { %v455_v38 = vadd.f32 %v454_v36, %v453_v34  ;;  %v309_v40 = vsel %vm307_vm1, %v294_v35, 0.0 }
  0xee   :  { %v456_v39 = vpop.f32.mrf.mxu0  ;;  %v310_v46 = vadd.f32 %v309_v40, %v308_v43 }
  0xef   :  { %v299_v41 = vadd.f32 %v469_v24, %v455_v38  ;;  %v422_v24 = vld [vmem:[%s625_s3] ss:$0 sm:$0xff] }
  0xf0   :  { %v457_v42 = vpop.f32.mrf.mxu0 }
  0xf1   :  { %v311_v44 = vsel %vm307_vm1, %v299_v41, 0.0  ;;  %v458_v45 = vadd.f32 %v457_v42, %v456_v39 }
  0xf2   :  { %v312_v48 = vadd.f32 %v311_v44, %v310_v46 }
  0xf3   :  { %v302_v47 = vadd.f32 %v470_v29, %v458_v45 }
  0xf5   :  { %v313_v49 = vsel %vm307_vm1, %v302_v47, 0.0 }
  0xf6   :  { %v314_v50 = vadd.f32 %v313_v49, %v312_v48 }
  0xf8   :  { %v315_v51 = vrot.slane %v314_v50, 4 }
  0xfa   :  { %v316_v52 = vadd.f32 %v315_v51, %v314_v50 }
  0xfc   :  { %v317_v53 = vrot.slane %v316_v52, 2 }
  0xfe   :  { %v318_v54 = vadd.f32 %v317_v53, %v316_v52 }
 0x100   :  { %v319_v55 = vrot.slane %v318_v54, 1 }
 0x102   :  { %v320_v56 = vadd.f32 %v319_v55, %v318_v54 }
 0x104   :  { %v321_v57 = vmul.f32 0.03125, %v320_v56 }
 0x106   :  { %v322_v58 = vsub.f32 %v291_v37, %v321_v57  ;;  %v323_v59 = vsub.f32 %v294_v35, %v321_v57  ;;  %v324_v60 = vsub.f32 %v299_v41, %v321_v57  ;;  %v325_v61 = vsub.f32 %v302_v47, %v321_v57 }
 0x108   :  { %v326_v62 = vmul.f32 %v322_v58, %v322_v58  ;;  %v327_v63 = vmul.f32 %v323_v59, %v323_v59  ;;  %v328_v0 = vmul.f32 %v324_v60, %v324_v60  ;;  %v329_v1 = vmul.f32 %v325_v61, %v325_v61 }
 0x10a   :  { %v330_v2 = vsel %vm307_vm1, %v326_v62, 0.0  ;;  %v331_v3 = vsel %vm307_vm1, %v327_v63, 0.0  ;;  %v333_v5 = vsel %vm307_vm1, %v328_v0, 0.0  ;;  %v335_v7 = vsel %vm307_vm1, %v329_v1, 0.0 }
 0x10b   :  { %v332_v4 = vadd.f32 %v331_v3, %v330_v2 }
 0x10d   :  { %v334_v6 = vadd.f32 %v333_v5, %v332_v4 }
 0x10f   :  { %v336_v8 = vadd.f32 %v335_v7, %v334_v6 }
 0x111   :  { %v337_v9 = vrot.slane %v336_v8, 4 }
 0x113   :  { %v338_v10 = vadd.f32 %v337_v9, %v336_v8 }
 0x115   :  { %v339_v11 = vrot.slane %v338_v10, 2 }
 0x117   :  { %v340_v12 = vadd.f32 %v339_v11, %v338_v10 }
 0x119   :  { %v341_v13 = vrot.slane %v340_v12, 1 }
 0x11b   :  { %v342_v14 = vadd.f32 %v341_v13, %v340_v12 }
 0x11d   :  { %v343_v15 = vmul.f32 0.03125, %v342_v14 }
 0x11f   :  { %v344_v16 = vadd.f32 1e-05, %v343_v15 }
 0x121   :  { %497 = vrsqrt.f32 %v344_v16 }
 0x12e   :  { %v498_v21 = vpop.eup %497 }
 0x12f   :  { %v346_v22 = vmul.f32 %v498_v21, %v305_v19 }
 0x131   :  { %v351_v23 = vrot.slane %v346_v22, %v350_v20 }
 0x133   :  { %v353_v25 = vmul.f32 %v351_v23, %v322_v58  ;;  %v354_v26 = vmul.f32 %v351_v23, %v323_v59  ;;  %v355_v27 = vmul.f32 %v351_v23, %v324_v60  ;;  %v356_v28 = vmul.f32 %v351_v23, %v325_v61 }
 0x135   :  { %v363_v29 = vadd.f32 %v422_v24, %v353_v25  ;;  %v364_v30 = vadd.f32 %v422_v24, %v354_v26  ;;  %v365_v31 = vadd.f32 %v422_v24, %v355_v27  ;;  %v366_v32 = vadd.f32 %v422_v24, %v356_v28 }
 0x137   :  { %v367_v33 = vmax.f32 %v363_v29, 0.0  ;;  %v368_v34 = vmax.f32 %v364_v30, 0.0  ;;  %v369_v35 = vmax.f32 %v365_v31, 0.0  ;;  %v370_v36 = vmax.f32 %v366_v32, 0.0 }
 0x139   :  { %v427_v37 = vpack.c.bf16 %v367_v33, %v367_v33  ;;  %v428_v38 = vpack.c.bf16 %v368_v34, %v368_v34  ;;  %v429_v39 = vpack.c.bf16 %v369_v35, %v369_v35  ;;  %v430_v40 = vpack.c.bf16 %v370_v36, %v370_v36 }
 0x13b   :  { %388 = vst.msk [vmem:[%s626_s4] sm:$0xf] %vm387_vm2, %v427_v37  ;;  %389 = vst.msk [vmem:[%s626_s4 + $0x4] sm:$0xf] %vm387_vm2, %v428_v38 }
 0x13c   :  { %390 = vst.msk [vmem:[%s626_s4 + $0x8] sm:$0xf] %vm387_vm2, %v429_v39  ;;  %391 = vst.msk [vmem:[%s626_s4 + $0xc] sm:$0xf] %vm387_vm2, %v430_v40 }

// kernel: convnet_forward.26
= control target key start
LH: loop header
LB: loop body
LE: loop exit
PB: predicated region body
PF: predicated region fallthrough
CT: control target
= control target key end

     0   :  { %v679_v0 = vmov 0   ;;  %vm178_vm0 = vcmask 130048   ;;  %vm302_vm1 = vcmask 64512   ;;  %vm538_vm2 = vcmask 60416   ;;  %s989_s1 = inlined_call_operand.vmem [shape: bf16[144,8], index: 1, kind: input, shape index: {}]   ;;  %s990_s0 = inlined_call_operand.vmem [shape: bf16[128,144], index: 0, kind: input, shape index: {}]   ;;  %s991_s2 = inlined_call_operand.vmem [shape: f32[1,8], index: 2, kind: input, shape index: {}]   ;;  %s992_s3 = inlined_call_operand.vmem [shape: f32[1,8], index: 3, kind: input, shape index: {}]   ;;  %s993_s4 = inlined_call_operand.vmem [shape: bf16[128,8], index: 4, kind: output, shape index: {}]  }
   0x1   :  { %203 = vmatprep.subr.bf16.mxu0 %v679_v0  ;;  %v644_v1 = vld [vmem:[%s989_s1 + $0x38] sm:$0xff]   ;;  %625 = vmatprep.subr.bf16.mxu1 %v679_v0  ;;  %v645_v2 = vld [vmem:[%s989_s1 + $0x30] sm:$0xff]   ;;  %v646_v3 = vld [vmem:[%s989_s1 + $0x28] sm:$0xff]  }
   0x2   :  { %204 = vmatpush1.bf16.msra.mxu0 %v644_v1  ;;  %634 = vmatpush1.bf16.msra.mxu1 %v644_v1  ;;  %v647_v4 = vld [vmem:[%s989_s1 + $0x20] sm:$0xff]   ;;  %v648_v7 = vld [vmem:[%s989_s1 + $0x18] sm:$0xff]   ;;  %v649_v8 = vld [vmem:[%s989_s1 + $0x10] sm:$0xff]  }
   0x3   :  { %205 = vmatprep.subr.bf16.mxu0 %v679_v0  ;;  %626 = vmatprep.subr.bf16.mxu1 %v679_v0  ;;  %v655_v5 = vld [vmem:[%s990_s0 + $0x4] ss:$8 sps:$4 sm:$0xff]   ;;  %v653_v12 = vld [vmem:[%s990_s0] ss:$8 sps:$4 sm:$0xff]   ;;  %v656_v14 = vld [vmem:[%s990_s0 + $0x14] ss:$8 sps:$4 sm:$0xff]  }
   0x4   :  { %584 = vmatprep.mubr.msk.bf16.mxu0 %vm178_vm0, %v655_v5  ;;  %v661_v6 = vld [vmem:[%s990_s0 + $0x44] ss:$8 sps:$4 sm:$0xff]   ;;  %v659_v13 = vld [vmem:[%s990_s0 + $0x40] ss:$8 sps:$4 sm:$0xff]   ;;  %v665_v15 = vld [vmem:[%s990_s0 + $0x54] ss:$8 sps:$4 sm:$0xff]  }
   0x5   :  { %588 = vmatprep.mubr.msk.bf16.mxu1 %vm178_vm0, %v661_v6  ;;  %v650_v9 = vld [vmem:[%s989_s1 + $0x8] sm:$0xff]   ;;  %v651_v10 = vld [vmem:[%s989_s1] sm:$0xff]   ;;  %v658_v16 = vld [vmem:[%s990_s0 + $0x10] ss:$8 sps:$4 sm:$0xff]  }
   0x6   :  { %206 = vmatpush1.bf16.msra.mxu0 %v645_v2  ;;  %635 = vmatpush1.bf16.msra.mxu1 %v645_v2  ;;  %v652_v11 = vld [vmem:[%s989_s1 + $0x40] sm:$0xff]   ;;  %v667_v17 = vld [vmem:[%s990_s0 + $0x50] ss:$8 sps:$4 sm:$0xff]   ;;  %v668_v22 = vld [vmem:[%s990_s0 + $0x34] ss:$8 sps:$4 sm:$0xff]  }
   0x7   :  { %207 = vmatprep.subr.bf16.mxu0 %v679_v0  ;;  %627 = vmatprep.subr.bf16.mxu1 %v679_v0  ;;  %v662_v18 = vld [vmem:[%s990_s0 + $0x24] ss:$8 sps:$4 sm:$0xff]   ;;  %v664_v20 = vld [vmem:[%s990_s0 + $0x20] ss:$8 sps:$4 sm:$0xff]   ;;  %v674_v23 = vld [vmem:[%s990_s0 + $0x74] ss:$8 sps:$4 sm:$0xff]  }
   0x8   :  { %v671_v19 = vld [vmem:[%s990_s0 + $0x64] ss:$8 sps:$4 sm:$0xff]   ;;  %v673_v21 = vld [vmem:[%s990_s0 + $0x60] ss:$8 sps:$4 sm:$0xff]   ;;  %v670_v24 = vld [vmem:[%s990_s0 + $0x30] ss:$8 sps:$4 sm:$0xff]  }
   0x9   :  { %v676_v25 = vld [vmem:[%s990_s0 + $0x70] ss:$8 sps:$4 sm:$0xff]  }
   0xa   :  { %208 = vmatpush1.bf16.msra.mxu0 %v646_v3  ;;  %636 = vmatpush1.bf16.msra.mxu1 %v646_v3 }
   0xb   :  { %209 = vmatprep.subr.bf16.mxu0 %v679_v0  ;;  %628 = vmatprep.subr.bf16.mxu1 %v679_v0 }
   0xe   :  { %210 = vmatpush1.bf16.msra.mxu0 %v647_v4  ;;  %637 = vmatpush1.bf16.msra.mxu1 %v647_v4 }
   0xf   :  { %211 = vmatprep.subr.bf16.mxu0 %v679_v0  ;;  %629 = vmatprep.subr.bf16.mxu1 %v679_v0 }
  0x12   :  { %212 = vmatpush1.bf16.msra.mxu0 %v648_v7  ;;  %638 = vmatpush1.bf16.msra.mxu1 %v648_v7 }
  0x13   :  { %213 = vmatprep.subr.bf16.mxu0 %v679_v0  ;;  %630 = vmatprep.subr.bf16.mxu1 %v679_v0 }
  0x16   :  { %214 = vmatpush1.bf16.msra.mxu0 %v649_v8  ;;  %639 = vmatpush1.bf16.msra.mxu1 %v649_v8 }
  0x17   :  { %215 = vmatprep.subr.bf16.mxu0 %v679_v0  ;;  %631 = vmatprep.subr.bf16.mxu1 %v679_v0 }
  0x1a   :  { %216 = vmatpush1.bf16.msra.mxu0 %v650_v9  ;;  %640 = vmatpush1.bf16.msra.mxu1 %v650_v9 }
  0x1b   :  { %217 = vmatprep.subr.bf16.mxu0 %v679_v0  ;;  %632 = vmatprep.subr.bf16.mxu1 %v679_v0 }
  0x1e   :  { %218 = vmatpush1.bf16.msra.mxu0 %v651_v10  ;;  %641 = vmatpush1.bf16.msra.mxu1 %v651_v10 }
  0x1f   :  { %233 = vmatprep.subr.bf16.mxu0 %v679_v0  ;;  %633 = vmatprep.subr.bf16.mxu1 %v679_v0 }
  0x22   :  { %234 = vmatpush2.bf16.msra.mxu0 %v652_v11  ;;  %642 = vmatpush2.bf16.msra.mxu1 %v652_v11 }
  0x25   :  { %236 = vmatmul.mubr.bf16.vlgmr.msra.gmra.mxu0 %v653_v12  ;;  %268 = vmatmul.mubr.bf16.vlgmr.msra.gmra.mxu1 %v659_v13 }
  0x26   :  { %585 = vmatprep.mubr.msk.bf16.mxu0 %vm178_vm0, %v656_v14  ;;  %589 = vmatprep.mubr.msk.bf16.mxu1 %vm178_vm0, %v665_v15 }
  0x2d   :  { %244 = vmatmul.mubr.bf16.gmra.mxu0 %v658_v16  ;;  %276 = vmatmul.mubr.bf16.gmra.mxu1 %v667_v17 }
  0x2e   :  { %586 = vmatprep.mubr.msk.bf16.mxu0 %vm178_vm0, %v662_v18  ;;  %590 = vmatprep.mubr.msk.bf16.mxu1 %vm178_vm0, %v671_v19 }
  0x35   :  { %252 = vmatmul.mubr.bf16.gmra.mxu0 %v664_v20  ;;  %284 = vmatmul.mubr.bf16.gmra.mxu1 %v673_v21 }
  0x36   :  { %587 = vmatprep.mubr.msk.bf16.mxu0 %vm178_vm0, %v668_v22  ;;  %591 = vmatprep.mubr.msk.bf16.mxu1 %vm178_vm0, %v674_v23 }
  0x3d   :  { %260 = vmatmul.mubr.bf16.gmra.mxu0 %v670_v24  ;;  %292 = vmatmul.mubr.bf16.gmra.mxu1 %v676_v25 }
  0xe5   :  { %v788_v26 = vpop.f32.mrf.mxu0  ;;  %v790_v27 = vpop.f32.mrf.mxu1 }
  0xe6   :  { %v303_v45 = vsel %vm302_vm1, %v788_v26, 0.0  ;;  %v318_v9 = vsel %vm302_vm1, %v790_v27, 0.0 }
  0xe7   :  { %v239_v28 = vpop.f32.mrf.mxu0  ;;  %v271_v29 = vpop.f32.mrf.mxu1 }
  0xe9   :  { %v792_v30 = vpop.f32.mrf.mxu0  ;;  %v794_v31 = vpop.f32.mrf.mxu1 }
  0xea   :  { %v304_v42 = vsel %vm302_vm1, %v792_v30, 0.0  ;;  %v320_v11 = vsel %vm302_vm1, %v794_v31, 0.0 }
  0xeb   :  { %v242_v32 = vpop.f32.mrf.mxu0  ;;  %v274_v33 = vpop.f32.mrf.mxu1  ;;  %v305_v47 = vadd.f32 %v304_v42, %v303_v45 }
  0xed   :  { %v796_v34 = vpop.f32.mrf.mxu0  ;;  %v798_v35 = vpop.f32.mrf.mxu1 }
  0xee   :  { %v306_v46 = vsel %vm302_vm1, %v796_v34, 0.0  ;;  %v322_v13 = vsel %vm302_vm1, %v798_v35, 0.0 }
  0xef   :  { %v247_v36 = vpop.f32.mrf.mxu0  ;;  %v279_v37 = vpop.f32.mrf.mxu1  ;;  %v307_v51 = vadd.f32 %v306_v46, %v305_v47 }
  0xf1   :  { %v248_v38 = vpop.f32.mrf.mxu0  ;;  %v800_v39 = vpop.f32.mrf.mxu1 }
  0xf2   :  { %v308_v50 = vsel %vm302_vm1, %v248_v38, 0.0  ;;  %v324_v15 = vsel %vm302_vm1, %v800_v39, 0.0 }
  0xf3   :  { %v250_v40 = vpop.f32.mrf.mxu0  ;;  %v282_v41 = vpop.f32.mrf.mxu1  ;;  %v309_v55 = vadd.f32 %v308_v50, %v307_v51 }
  0xf5   :  { %v253_v43 = vpop.f32.mrf.mxu0  ;;  %v804_v44 = vpop.f32.mrf.mxu1 }
  0xf6   :  { %v310_v54 = vsel %vm302_vm1, %v253_v43, 0.0  ;;  %v326_v17 = vsel %vm302_vm1, %v804_v44, 0.0 }
  0xf7   :  { %v255_v48 = vpop.f32.mrf.mxu0  ;;  %v287_v49 = vpop.f32.mrf.mxu1  ;;  %v311_v59 = vadd.f32 %v310_v54, %v309_v55 }
  0xf9   :  { %v256_v52 = vpop.f32.mrf.mxu0  ;;  %v811_v53 = vpop.f32.mrf.mxu1 }
  0xfa   :  { %v312_v58 = vsel %vm302_vm1, %v256_v52, 0.0  ;;  %v328_v19 = vsel %vm302_vm1, %v811_v53, 0.0 }
  0xfb   :  { %v258_v56 = vpop.f32.mrf.mxu0  ;;  %v290_v57 = vpop.f32.mrf.mxu1  ;;  %v313_v63 = vadd.f32 %v312_v58, %v311_v59 }
  0xfd   :  { %v261_v60 = vpop.f32.mrf.mxu0  ;;  %v815_v61 = vpop.f32.mrf.mxu1 }
  0xfe   :  { %v314_v62 = vsel %vm302_vm1, %v261_v60, 0.0  ;;  %v330_v21 = vsel %vm302_vm1, %v815_v61, 0.0 }
  0xff   :  { %v263_v0 = vpop.f32.mrf.mxu0  ;;  %v295_v1 = vpop.f32.mrf.mxu1  ;;  %v315_v2 = vadd.f32 %v314_v62, %v313_v63 }
 0x101   :  { %v264_v3 = vpop.f32.mrf.mxu0  ;;  %v818_v4 = vpop.f32.mrf.mxu1 }
 0x102   :  { %v316_v5 = vsel %vm302_vm1, %v264_v3, 0.0  ;;  %v332_v23 = vsel %vm302_vm1, %v818_v4, 0.0 }
 0x103   :  { %v317_v6 = vadd.f32 %v316_v5, %v315_v2  ;;  %v266_v7 = vpop.f32.mrf.mxu0  ;;  %v298_v8 = vpop.f32.mrf.mxu1 }
 0x105   :  { %v319_v10 = vadd.f32 %v318_v9, %v317_v6 }
 0x107   :  { %v321_v12 = vadd.f32 %v320_v11, %v319_v10 }
 0x109   :  { %v323_v14 = vadd.f32 %v322_v13, %v321_v12 }
 0x10b   :  { %v325_v16 = vadd.f32 %v324_v15, %v323_v14 }
 0x10d   :  { %v327_v18 = vadd.f32 %v326_v17, %v325_v16 }
 0x10f   :  { %v329_v20 = vadd.f32 %v328_v19, %v327_v18 }
 0x111   :  { %v331_v22 = vadd.f32 %v330_v21, %v329_v20 }
 0x113   :  { %v333_v24 = vadd.f32 %v332_v23, %v331_v22 }
 0x115   :  { %v334_v25 = vrot.slane %v333_v24, 4 }
 0x117   :  { %v335_v28 = vadd.f32 %v334_v25, %v333_v24 }
 0x119   :  { %v336_v29 = vrot.slane %v335_v28, 2 }
 0x11b   :  { %v337_v32 = vadd.f32 %v336_v29, %v335_v28 }
 0x11d   :  { %v338_v33 = vrot.slane %v337_v32, 1 }
 0x11f   :  { %v339_v36 = vadd.f32 %v338_v33, %v337_v32 }
 0x121   :  { %v340_v37 = vmul.f32 0.0078125, %v339_v36 }
 0x123   :  { %v838_v40 = vsub.f32 %v788_v26, %v340_v37  ;;  %v841_v41 = vsub.f32 %v792_v30, %v340_v37  ;;  %v844_v42 = vsub.f32 %v796_v34, %v340_v37  ;;  %v846_v45 = vsub.f32 %v248_v38, %v340_v37 }
 0x124   :  { %v852_v48 = vsub.f32 %v253_v43, %v340_v37  ;;  %v856_v49 = vsub.f32 %v256_v52, %v340_v37  ;;  %v862_v51 = vsub.f32 %v261_v60, %v340_v37  ;;  %v867_v56 = vsub.f32 %v264_v3, %v340_v37 }
 0x125   :  { %v357_v46 = vmul.f32 %v838_v40, %v838_v40  ;;  %v358_v47 = vmul.f32 %v841_v41, %v841_v41  ;;  %v359_v26 = vmul.f32 %v844_v42, %v844_v42  ;;  %v360_v30 = vmul.f32 %v846_v45, %v846_v45 }
 0x126   :  { %v361_v54 = vmul.f32 %v852_v48, %v852_v48  ;;  %v362_v52 = vmul.f32 %v856_v49, %v856_v49  ;;  %v873_v59 = vsub.f32 %v790_v27, %v340_v37  ;;  %v363_v60 = vmul.f32 %v862_v51, %v862_v51 }
 0x127   :  { %v373_v34 = vsel %vm302_vm1, %v357_v46, 0.0  ;;  %v374_v38 = vsel %vm302_vm1, %v358_v47, 0.0  ;;  %v376_v43 = vsel %vm302_vm1, %v359_v26, 0.0  ;;  %v378_v57 = vsel %vm302_vm1, %v360_v30, 0.0 }
 0x128   :  { %v375_v50 = vadd.f32 %v374_v38, %v373_v34  ;;  %v380_v62 = vsel %vm302_vm1, %v361_v54, 0.0  ;;  %v879_v0 = vsub.f32 %v794_v31, %v340_v37  ;;  %v364_v1 = vmul.f32 %v867_v56, %v867_v56 }
 0x129   :  { %v382_v2 = vsel %vm302_vm1, %v362_v52, 0.0  ;;  %v885_v5 = vsub.f32 %v798_v35, %v340_v37  ;;  %v365_v27 = vmul.f32 %v873_v59, %v873_v59  ;;  %v384_v6 = vsel %vm302_vm1, %v363_v60, 0.0 }
 0x12a   :  { %v377_v55 = vadd.f32 %v376_v43, %v375_v50  ;;  %v352_v8 = vsub.f32 %v800_v39, %v340_v37  ;;  %v366_v31 = vmul.f32 %v879_v0, %v879_v0  ;;  %v386_v9 = vsel %vm302_vm1, %v364_v1, 0.0 }
 0x12b   :  { %v353_v11 = vsub.f32 %v804_v44, %v340_v37  ;;  %v367_v35 = vmul.f32 %v885_v5, %v885_v5  ;;  %v388_v12 = vsel %vm302_vm1, %v365_v27, 0.0  ;;  %v354_v14 = vsub.f32 %v811_v53, %v340_v37 }
 0x12c   :  { %v379_v58 = vadd.f32 %v378_v57, %v377_v55  ;;  %v368_v15 = vmul.f32 %v352_v8, %v352_v8  ;;  %v390_v16 = vsel %vm302_vm1, %v366_v31, 0.0  ;;  %v355_v17 = vsub.f32 %v815_v61, %v340_v37  ;;  %v300_v55 = vld [vmem:[%s991_s2] sm:$0x1] }
 0x12d   :  { %v369_v18 = vmul.f32 %v353_v11, %v353_v11  ;;  %v392_v19 = vsel %vm302_vm1, %v367_v35, 0.0  ;;  %v356_v44 = vsub.f32 %v818_v4, %v340_v37  ;;  %v370_v21 = vmul.f32 %v354_v14, %v354_v14 }
 0x12e   :  { %v381_v63 = vadd.f32 %v380_v62, %v379_v58  ;;  %v394_v22 = vsel %vm302_vm1, %v368_v15, 0.0  ;;  %v371_v24 = vmul.f32 %v355_v17, %v355_v17  ;;  %v415_v54 = vlaneseq }
 0x12f   :  { %v396_v25 = vsel %vm302_vm1, %v369_v18, 0.0  ;;  %v372_v28 = vmul.f32 %v356_v44, %v356_v44  ;;  %v398_v29 = vsel %vm302_vm1, %v370_v21, 0.0 }
 0x130   :  { %v383_v3 = vadd.f32 %v382_v2, %v381_v63  ;;  %v400_v61 = vsel %vm302_vm1, %v371_v24, 0.0  ;;  %v416_v43 = vshrl.u32 %v415_v54, 7 }
 0x131   :  { %v402_v36 = vsel %vm302_vm1, %v372_v28, 0.0 }
 0x132   :  { %v385_v7 = vadd.f32 %v384_v6, %v383_v3  ;;  %v417_v52 = vsub.s32 0, %v416_v43  ;;  %v592_v3 = vld [vmem:[%s992_s3] ss:$0 sm:$0xff] }
 0x134   :  { %v387_v10 = vadd.f32 %v386_v9, %v385_v7 }
 0x136   :  { %v389_v13 = vadd.f32 %v388_v12, %v387_v10 }
 0x138   :  { %v391_v39 = vadd.f32 %v390_v16, %v389_v13 }
 0x13a   :  { %v393_v20 = vadd.f32 %v392_v19, %v391_v39 }
 0x13c   :  { %v395_v23 = vadd.f32 %v394_v22, %v393_v20 }
 0x13e   :  { %v397_v53 = vadd.f32 %v396_v25, %v395_v23 }
 0x140   :  { %v399_v32 = vadd.f32 %v398_v29, %v397_v53 }
 0x142   :  { %v401_v33 = vadd.f32 %v400_v61, %v399_v32 }
 0x144   :  { %v403_v46 = vadd.f32 %v402_v36, %v401_v33 }
 0x146   :  { %v404_v47 = vrot.slane %v403_v46, 4 }
 0x148   :  { %v405_v4 = vadd.f32 %v404_v47, %v403_v46 }
 0x14a   :  { %v406_v37 = vrot.slane %v405_v4, 2 }
 0x14c   :  { %v407_v26 = vadd.f32 %v406_v37, %v405_v4 }
 0x14e   :  { %v408_v30 = vrot.slane %v407_v26, 1 }
 0x150   :  { %v409_v34 = vadd.f32 %v408_v30, %v407_v26 }
 0x152   :  { %v410_v38 = vmul.f32 0.0078125, %v409_v34 }
 0x154   :  { %v411_v50 = vadd.f32 1e-05, %v410_v38 }
 0x156   :  { %677 = vrsqrt.f32 %v411_v50 }
 0x163   :  { %v678_v57 = vpop.eup %677 }
 0x164   :  { %v413_v58 = vmul.f32 %v678_v57, %v300_v55 }
 0x166   :  { %v418_v60 = vrot.slane %v413_v58, %v417_v52 }
 0x168   :  { %v420_v62 = vmul.f32 %v418_v60, %v838_v40  ;;  %v421_v63 = vmul.f32 %v418_v60, %v841_v41  ;;  %v422_v1 = vmul.f32 %v418_v60, %v844_v42  ;;  %v423_v2 = vmul.f32 %v418_v60, %v846_v45 }
 0x169   :  { %v424_v27 = vmul.f32 %v418_v60, %v852_v48  ;;  %v425_v6 = vmul.f32 %v418_v60, %v856_v49  ;;  %v426_v7 = vmul.f32 %v418_v60, %v862_v51  ;;  %v427_v31 = vmul.f32 %v418_v60, %v867_v56 }
 0x16a   :  { %v428_v40 = vmul.f32 %v418_v60, %v873_v59  ;;  %v429_v41 = vmul.f32 %v418_v60, %v879_v0  ;;  %v430_v42 = vmul.f32 %v418_v60, %v885_v5  ;;  %v431_v9 = vmul.f32 %v418_v60, %v352_v8 }
 0x16b   :  { %v432_v45 = vmul.f32 %v418_v60, %v353_v11  ;;  %v433_v10 = vmul.f32 %v418_v60, %v354_v14  ;;  %v434_v35 = vmul.f32 %v418_v60, %v355_v17  ;;  %v435_v12 = vmul.f32 %v418_v60, %v356_v44 }
 0x16c   :  { %v442_v13 = vadd.f32 %v592_v3, %v420_v62  ;;  %v443_v48 = vadd.f32 %v592_v3, %v421_v63  ;;  %v444_v15 = vadd.f32 %v592_v3, %v422_v1  ;;  %v445_v49 = vadd.f32 %v592_v3, %v423_v2 }
 0x16d   :  { %v446_v16 = vadd.f32 %v592_v3, %v424_v27  ;;  %v447_v51 = vadd.f32 %v592_v3, %v425_v6  ;;  %v448_v39 = vadd.f32 %v592_v3, %v426_v7  ;;  %v449_v56 = vadd.f32 %v592_v3, %v427_v31 }
 0x16e   :  { %v450_v18 = vadd.f32 %v592_v3, %v428_v40  ;;  %v451_v59 = vadd.f32 %v592_v3, %v429_v41  ;;  %v452_v19 = vadd.f32 %v592_v3, %v430_v42  ;;  %v453_v0 = vadd.f32 %v592_v3, %v431_v9 }
 0x16f   :  { %v454_v20 = vadd.f32 %v592_v3, %v432_v45  ;;  %v455_v5 = vadd.f32 %v592_v3, %v433_v10  ;;  %v456_v8 = vadd.f32 %v592_v3, %v434_v35  ;;  %v457_v11 = vadd.f32 %v592_v3, %v435_v12 }
 0x170   :  { %v458_v14 = vmax.f32 %v442_v13, 0.0  ;;  %v459_v17 = vmax.f32 %v443_v48, 0.0  ;;  %v460_v44 = vmax.f32 %v444_v15, 0.0  ;;  %v461_v21 = vmax.f32 %v445_v49, 0.0 }
 0x171   :  { %v462_v22 = vmax.f32 %v446_v16, 0.0  ;;  %v463_v23 = vmax.f32 %v447_v51, 0.0  ;;  %v464_v24 = vmax.f32 %v448_v39, 0.0  ;;  %v465_v25 = vmax.f32 %v449_v56, 0.0 }
 0x172   :  { %v466_v53 = vmax.f32 %v450_v18, 0.0  ;;  %v467_v28 = vmax.f32 %v451_v59, 0.0  ;;  %v468_v29 = vmax.f32 %v452_v19, 0.0  ;;  %v469_v32 = vmax.f32 %v453_v0, 0.0 }
 0x173   :  { %v470_v61 = vmax.f32 %v454_v20, 0.0  ;;  %v471_v33 = vmax.f32 %v455_v5, 0.0  ;;  %v472_v36 = vmax.f32 %v456_v8, 0.0  ;;  %v473_v46 = vmax.f32 %v457_v11, 0.0 }
 0x174   :  { %v609_v47 = vpack.c.bf16 %v458_v14, %v458_v14  ;;  %v610_v4 = vpack.c.bf16 %v459_v17, %v459_v17  ;;  %v611_v37 = vpack.c.bf16 %v460_v44, %v460_v44  ;;  %v612_v26 = vpack.c.bf16 %v461_v21, %v461_v21 }
 0x175   :  { %v613_v30 = vpack.c.bf16 %v462_v22, %v462_v22  ;;  %v614_v34 = vpack.c.bf16 %v463_v23, %v463_v23  ;;  %v615_v38 = vpack.c.bf16 %v464_v24, %v464_v24  ;;  %v616_v50 = vpack.c.bf16 %v465_v25, %v465_v25 }
 0x176   :  { %v617_v54 = vpack.c.bf16 %v466_v53, %v466_v53  ;;  %v618_v43 = vpack.c.bf16 %v467_v28, %v467_v28  ;;  %v619_v55 = vpack.c.bf16 %v468_v29, %v468_v29  ;;  %v620_v52 = vpack.c.bf16 %v469_v32, %v469_v32  ;;  %539 = vst.msk [vmem:[%s993_s4] sm:$0xf] %vm538_vm2, %v609_v47 }
 0x177   :  { %540 = vst.msk [vmem:[%s993_s4 + $0x4] sm:$0xf] %vm538_vm2, %v610_v4  ;;  %541 = vst.msk [vmem:[%s993_s4 + $0x8] sm:$0xf] %vm538_vm2, %v611_v37  ;;  %v621_v57 = vpack.c.bf16 %v470_v61, %v470_v61  ;;  %v622_v58 = vpack.c.bf16 %v471_v33, %v471_v33  ;;  %v623_v60 = vpack.c.bf16 %v472_v36, %v472_v36 }
 0x178   :  { %542 = vst.msk [vmem:[%s993_s4 + $0xc] sm:$0xf] %vm538_vm2, %v612_v26  ;;  %v624_v62 = vpack.c.bf16 %v473_v46, %v473_v46  ;;  %543 = vst.msk [vmem:[%s993_s4 + $0x10] sm:$0xf] %vm538_vm2, %v613_v30 }
 0x179   :  { %544 = vst.msk [vmem:[%s993_s4 + $0x14] sm:$0xf] %vm538_vm2, %v614_v34  ;;  %545 = vst.msk [vmem:[%s993_s4 + $0x18] sm:$0xf] %vm538_vm2, %v615_v38 }
 0x17a   :  { %546 = vst.msk [vmem:[%s993_s4 + $0x1c] sm:$0xf] %vm538_vm2, %v616_v50  ;;  %547 = vst.msk [vmem:[%s993_s4 + $0x20] sm:$0xf] %vm538_vm2, %v617_v54 }
 0x17b   :  { %548 = vst.msk [vmem:[%s993_s4 + $0x24] sm:$0xf] %vm538_vm2, %v618_v43  ;;  %549 = vst.msk [vmem:[%s993_s4 + $0x28] sm:$0xf] %vm538_vm2, %v619_v55 }
 0x17c   :  { %550 = vst.msk [vmem:[%s993_s4 + $0x2c] sm:$0xf] %vm538_vm2, %v620_v52  ;;  %551 = vst.msk [vmem:[%s993_s4 + $0x30] sm:$0xf] %vm538_vm2, %v621_v57 }
 0x17d   :  { %552 = vst.msk [vmem:[%s993_s4 + $0x34] sm:$0xf] %vm538_vm2, %v622_v58  ;;  %553 = vst.msk [vmem:[%s993_s4 + $0x38] sm:$0xf] %vm538_vm2, %v623_v60 }
 0x17e   :  { %554 = vst.msk [vmem:[%s993_s4 + $0x3c] sm:$0xf] %vm538_vm2, %v624_v62 }

// kernel: convnet_forward.27
= control target key start
LH: loop header
LB: loop body
LE: loop exit
PB: predicated region body
PF: predicated region fallthrough
CT: control target
= control target key end

     0   :  { %v210_v0 = vlaneseq  ;;  %vm348_vm0 = vcmask 588800   ;;  %vm1060_vm1 = vcmask 7168   ;;  %s2117_s0 = inlined_call_operand.vmem [shape: bf16[512,200], index: 0, kind: input, shape index: {}]   ;;  %s2118_s1 = inlined_call_operand.vmem [shape: f32[1,200], index: 1, kind: input, shape index: {}]   ;;  %s2119_s2 = inlined_call_operand.<no memory space> [shape: f32[1,1], index: 2, kind: input, shape index: {}]   ;;  %s2120_s3 = inlined_call_operand.vmem [shape: f32[512,1], index: 3, kind: output, shape index: {}]  }
   0x1   :  { %v18_v1 = vld [vmem:[%s2117_s0 + $0x10] sm:$0xff]  ;;  %v16_v2 = vld [vmem:[%s2117_s0] sm:$0xff]  ;;  %v19_v4 = vld [vmem:[%s2117_s0 + $0x18] sm:$0xff] }
   0x2   :  { %v211_v3 = vshrl.u32 %v210_v0, 7  ;;  %v17_v5 = vld [vmem:[%s2117_s0 + $0x8] sm:$0xff]  ;;  %v84_v7 = vunpack.c.l.bf16 %v18_v1  ;;  %v85_v8 = vunpack.c.h.bf16 %v18_v1  ;;  %v208_v9 = vld [vmem:[%s2118_s1] sm:$0x3]  ;;  %v80_v10 = vunpack.c.l.bf16 %v16_v2  ;;  %v23_v16 = vld [vmem:[%s2117_s0 + $0x38] sm:$0xff] }
   0x3   :  { %v21_v6 = vld [vmem:[%s2117_s0 + $0x28] sm:$0xff]  ;;  %v20_v11 = vld [vmem:[%s2117_s0 + $0x20] sm:$0xff]  ;;  %v81_v14 = vunpack.c.h.bf16 %v16_v2  ;;  %v86_v15 = vunpack.c.l.bf16 %v19_v4  ;;  %v22_v17 = vld [vmem:[%s2117_s0 + $0x30] sm:$0xff]  ;;  %v87_v18 = vunpack.c.h.bf16 %v19_v4  ;;  %v82_v19 = vunpack.c.l.bf16 %v17_v5 }
   0x4   :  { %v212_v12 = vsub.s32 0, %v211_v3  ;;  %v216_v13 = vsub.s32 1, %v211_v3  ;;  %v83_v20 = vunpack.c.h.bf16 %v17_v5  ;;  %v90_v21 = vunpack.c.l.bf16 %v21_v6  ;;  %v25_v38 = vld [vmem:[%s2117_s0 + $0x48] sm:$0xff]  ;;  %v24_v43 = vld [vmem:[%s2117_s0 + $0x40] sm:$0xff]  ;;  %v27_v61 = vld [vmem:[%s2117_s0 + $0x58] sm:$0xff] }
   0x5   :  { %v91_v24 = vunpack.c.h.bf16 %v21_v6  ;;  %v88_v25 = vunpack.c.l.bf16 %v20_v11  ;;  %v89_v26 = vunpack.c.h.bf16 %v20_v11  ;;  %v94_v27 = vunpack.c.l.bf16 %v23_v16  ;;  %v26_v2 = vld [vmem:[%s2117_s0 + $0x50] sm:$0xff] }
   0x6   :  { %v1434_v22 = vrot.slane %v208_v9, %v212_v12  ;;  %v1436_v23 = vrot.slane %v208_v9, %v216_v13  ;;  %v95_v28 = vunpack.c.h.bf16 %v23_v16  ;;  %v92_v29 = vunpack.c.l.bf16 %v22_v17  ;;  %v28_v12 = vld [vmem:[%s2117_s0 + $0x60] sm:$0xff] }
   0x7   :  { %v93_v42 = vunpack.c.h.bf16 %v22_v17  ;;  %v99_v51 = vunpack.c.h.bf16 %v25_v38  ;;  %v97_v55 = vunpack.c.h.bf16 %v24_v43  ;;  %v98_v59 = vunpack.c.l.bf16 %v25_v38 }
   0x8   :  { %v224_v30 = vmul.f32 %v1434_v22, %v84_v7  ;;  %v225_v31 = vmul.f32 %v1436_v23, %v85_v8  ;;  %v220_v32 = vmul.f32 %v1434_v22, %v80_v10  ;;  %v221_v33 = vmul.f32 %v1436_v23, %v81_v14  ;;  %v29_v8 = vld [vmem:[%s2117_s0 + $0x68] sm:$0xff] }
   0x9   :  { %v226_v34 = vmul.f32 %v1434_v22, %v86_v15  ;;  %v227_v35 = vmul.f32 %v1436_v23, %v87_v18  ;;  %v222_v36 = vmul.f32 %v1434_v22, %v82_v19  ;;  %v223_v37 = vmul.f32 %v1436_v23, %v83_v20 }
   0xa   :  { %v357_v39 = vsel %vm348_vm0, %v225_v31, 0.0  ;;  %v349_v40 = vsel %vm348_vm0, %v221_v33, 0.0  ;;  %v231_v41 = vmul.f32 %v1436_v23, %v91_v24  ;;  %v230_v50 = vmul.f32 %v1434_v22, %v90_v21 }
   0xb   :  { %v358_v44 = vadd.f32 %v357_v39, %v224_v30  ;;  %v350_v45 = vadd.f32 %v349_v40, %v220_v32  ;;  %v361_v46 = vsel %vm348_vm0, %v227_v35, 0.0  ;;  %v353_v47 = vsel %vm348_vm0, %v223_v37, 0.0 }
   0xc   :  { %v362_v48 = vadd.f32 %v361_v46, %v226_v34  ;;  %v354_v49 = vadd.f32 %v353_v47, %v222_v36  ;;  %v369_v52 = vsel %vm348_vm0, %v231_v41, 0.0  ;;  %v228_v53 = vmul.f32 %v1434_v22, %v88_v25  ;;  %v31_v25 = vld [vmem:[%s2117_s0 + $0x78] sm:$0xff]  ;;  %v33_v36 = vld [vmem:[%s2117_s0 + $0x88] sm:$0xff]  ;;  %v32_v41 = vld [vmem:[%s2117_s0 + $0x80] sm:$0xff] }
   0xd   :  { %359 = vadd.xlane.f32.xlu1 %v358_v44  ;;  %351 = vadd.xlane.f32.xlu0 %v350_v45  ;;  %v229_v54 = vmul.f32 %v1436_v23, %v89_v26  ;;  %v235_v56 = vmul.f32 %v1436_v23, %v95_v28  ;;  %v233_v57 = vmul.f32 %v1436_v23, %v93_v42  ;;  %v96_v60 = vunpack.c.l.bf16 %v24_v43 }
   0xe   :  { %v370_v62 = vadd.f32 %v369_v52, %v230_v50  ;;  %v234_v63 = vmul.f32 %v1434_v22, %v94_v27  ;;  %v232_v0 = vmul.f32 %v1434_v22, %v92_v29  ;;  %v239_v1 = vmul.f32 %v1436_v23, %v99_v51  ;;  %v30_v27 = vld [vmem:[%s2117_s0 + $0x70] sm:$0xff]  ;;  %v35_v50 = vld [vmem:[%s2117_s0 + $0x98] sm:$0xff] }
   0xf   :  { %v365_v58 = vsel %vm348_vm0, %v229_v54, 0.0  ;;  %v377_v4 = vsel %vm348_vm0, %v235_v56, 0.0  ;;  %v373_v5 = vsel %vm348_vm0, %v233_v57, 0.0  ;;  %v237_v6 = vmul.f32 %v1436_v23, %v97_v55  ;;  %v34_v55 = vld [vmem:[%s2117_s0 + $0x90] sm:$0xff] }
  0x10   :  { %v366_v3 = vadd.f32 %v365_v58, %v228_v53  ;;  %v103_v7 = vunpack.c.h.bf16 %v27_v61  ;;  %v238_v9 = vmul.f32 %v1434_v22, %v98_v59  ;;  %v236_v10 = vmul.f32 %v1434_v22, %v96_v60 }
  0x11   :  { %363 = vadd.xlane.f32.xlu1 %v362_v48  ;;  %355 = vadd.xlane.f32.xlu0 %v354_v49  ;;  %v101_v11 = vunpack.c.h.bf16 %v26_v2  ;;  %v378_v13 = vadd.f32 %v377_v4, %v234_v63  ;;  %v374_v14 = vadd.f32 %v373_v5, %v232_v0  ;;  %v385_v15 = vsel %vm348_vm0, %v239_v1, 0.0  ;;  %v37_v0 = vld [vmem:[%s2117_s0 + $0xa8] sm:$0xff]  ;;  %v36_v4 = vld [vmem:[%s2117_s0 + $0xa0] sm:$0xff] }
  0x12   :  { %v102_v16 = vunpack.c.l.bf16 %v27_v61  ;;  %v381_v17 = vsel %vm348_vm0, %v237_v6, 0.0  ;;  %v243_v18 = vmul.f32 %v1436_v23, %v103_v7  ;;  %v100_v19 = vunpack.c.l.bf16 %v26_v2 }
  0x13   :  { %v107_v20 = vunpack.c.h.bf16 %v29_v8  ;;  %v241_v21 = vmul.f32 %v1436_v23, %v101_v11  ;;  %v105_v24 = vunpack.c.h.bf16 %v28_v12  ;;  %v386_v26 = vadd.f32 %v385_v15, %v238_v9  ;;  %v39_v15 = vld [vmem:[%s2117_s0 + $0xb8] sm:$0xff] }
  0x14   :  { %v382_v28 = vadd.f32 %v381_v17, %v236_v10  ;;  %v242_v29 = vmul.f32 %v1434_v22, %v102_v16  ;;  %v106_v30 = vunpack.c.l.bf16 %v29_v8  ;;  %v104_v31 = vunpack.c.l.bf16 %v28_v12 }
  0x15   :  { %371 = vadd.xlane.f32.xlu1 %v370_v62  ;;  %367 = vadd.xlane.f32.xlu0 %v366_v3  ;;  %v393_v32 = vsel %vm348_vm0, %v243_v18, 0.0  ;;  %v240_v33 = vmul.f32 %v1434_v22, %v100_v19  ;;  %v247_v34 = vmul.f32 %v1436_v23, %v107_v20  ;;  %v111_v35 = vunpack.c.h.bf16 %v31_v25  ;;  %v38_v18 = vld [vmem:[%s2117_s0 + $0xb0] sm:$0xff] }
  0x16   :  { %v389_v37 = vsel %vm348_vm0, %v241_v21, 0.0  ;;  %v245_v38 = vmul.f32 %v1436_v23, %v105_v24  ;;  %v109_v39 = vunpack.c.h.bf16 %v30_v27  ;;  %v110_v40 = vunpack.c.l.bf16 %v31_v25 }
  0x17   :  { %v394_v42 = vadd.f32 %v393_v32, %v242_v29  ;;  %v246_v43 = vmul.f32 %v1434_v22, %v106_v30  ;;  %v244_v44 = vmul.f32 %v1434_v22, %v104_v31  ;;  %v115_v45 = vunpack.c.h.bf16 %v33_v36 }
  0x18   :  { %v390_v46 = vadd.f32 %v389_v37, %v240_v33  ;;  %v401_v47 = vsel %vm348_vm0, %v247_v34, 0.0  ;;  %v251_v48 = vmul.f32 %v1436_v23, %v111_v35  ;;  %v108_v49 = vunpack.c.l.bf16 %v30_v27  ;;  %v41_v33 = vld [vmem:[%s2117_s0 + $0xc8] sm:$0xff]  ;;  %v40_v37 = vld [vmem:[%s2117_s0 + $0xc0] sm:$0xff] }
  0x19   :  { %379 = vadd.xlane.f32.xlu1 %v378_v13  ;;  %375 = vadd.xlane.f32.xlu0 %v374_v14  ;;  %v397_v51 = vsel %vm348_vm0, %v245_v38, 0.0  ;;  %v249_v52 = vmul.f32 %v1436_v23, %v109_v39  ;;  %v113_v53 = vunpack.c.h.bf16 %v32_v41  ;;  %v114_v54 = vunpack.c.l.bf16 %v33_v36 }
  0x1a   :  { %v402_v56 = vadd.f32 %v401_v47, %v246_v43  ;;  %v250_v57 = vmul.f32 %v1434_v22, %v110_v40  ;;  %v255_v58 = vmul.f32 %v1436_v23, %v115_v45  ;;  %v119_v59 = vunpack.c.h.bf16 %v35_v50  ;;  %v43_v47 = vld [vmem:[%s2117_s0 + $0xd8] sm:$0xff] }
  0x1b   :  { %v398_v60 = vadd.f32 %v397_v51, %v244_v44  ;;  %v409_v61 = vsel %vm348_vm0, %v251_v48, 0.0  ;;  %v248_v62 = vmul.f32 %v1434_v22, %v108_v49  ;;  %v112_v63 = vunpack.c.l.bf16 %v32_v41 }
  0x1c   :  { %v405_v1 = vsel %vm348_vm0, %v249_v52, 0.0  ;;  %v253_v2 = vmul.f32 %v1436_v23, %v113_v53  ;;  %v117_v3 = vunpack.c.h.bf16 %v34_v55  ;;  %v254_v5 = vmul.f32 %v1434_v22, %v114_v54 }
  0x1d   :  { %387 = vadd.xlane.f32.xlu1 %v386_v26  ;;  %383 = vadd.xlane.f32.xlu0 %v382_v28  ;;  %v118_v6 = vunpack.c.l.bf16 %v35_v50  ;;  %v410_v7 = vadd.f32 %v409_v61, %v250_v57  ;;  %v417_v8 = vsel %vm348_vm0, %v255_v58, 0.0  ;;  %v259_v9 = vmul.f32 %v1436_v23, %v119_v59  ;;  %v42_v50 = vld [vmem:[%s2117_s0 + $0xd0] sm:$0xff]  ;;  %v45_v59 = vld [vmem:[%s2117_s0 + $0xe8] sm:$0xff] }
  0x1e   :  { %v123_v10 = vunpack.c.h.bf16 %v37_v0  ;;  %v406_v11 = vadd.f32 %v405_v1, %v248_v62  ;;  %v252_v12 = vmul.f32 %v1434_v22, %v112_v63  ;;  %v116_v13 = vunpack.c.l.bf16 %v34_v55  ;;  %v44_v63 = vld [vmem:[%s2117_s0 + $0xe0] sm:$0xff] }
  0x1f   :  { %v121_v14 = vunpack.c.h.bf16 %v36_v4  ;;  %v413_v16 = vsel %vm348_vm0, %v253_v2, 0.0  ;;  %v257_v17 = vmul.f32 %v1436_v23, %v117_v3  ;;  %v418_v19 = vadd.f32 %v417_v8, %v254_v5  ;;  %v47_v8 = vld [vmem:[%s2117_s0 + $0xf8] sm:$0xff] }
  0x20   :  { %v258_v20 = vmul.f32 %v1434_v22, %v118_v6  ;;  %v122_v21 = vunpack.c.l.bf16 %v37_v0  ;;  %v425_v24 = vsel %vm348_vm0, %v259_v9, 0.0  ;;  %v263_v25 = vmul.f32 %v1436_v23, %v123_v10 }
  0x21   :  { %395 = vadd.xlane.f32.xlu1 %v394_v42  ;;  %391 = vadd.xlane.f32.xlu0 %v390_v46  ;;  %v120_v26 = vunpack.c.l.bf16 %v36_v4  ;;  %v127_v27 = vunpack.c.h.bf16 %v39_v15  ;;  %v414_v28 = vadd.f32 %v413_v16, %v252_v12  ;;  %v256_v29 = vmul.f32 %v1434_v22, %v116_v13  ;;  %v46_v13 = vld [vmem:[%s2117_s0 + $0xf0] sm:$0xff] }
  0x22   :  { %v261_v30 = vmul.f32 %v1436_v23, %v121_v14  ;;  %v125_v31 = vunpack.c.h.bf16 %v38_v18  ;;  %v421_v32 = vsel %vm348_vm0, %v257_v17, 0.0  ;;  %v426_v34 = vadd.f32 %v425_v24, %v258_v20  ;;  %v49_v24 = vld [vmem:[%s2117_s0 + $0x108] sm:$0xff] }
  0x23   :  { %v262_v35 = vmul.f32 %v1434_v22, %v122_v21  ;;  %v126_v36 = vunpack.c.l.bf16 %v39_v15  ;;  %v433_v38 = vsel %vm348_vm0, %v263_v25, 0.0  ;;  %v260_v39 = vmul.f32 %v1434_v22, %v120_v26 }
  0x24   :  { %v267_v40 = vmul.f32 %v1436_v23, %v127_v27  ;;  %v124_v41 = vunpack.c.l.bf16 %v38_v18  ;;  %v422_v42 = vadd.f32 %v421_v32, %v256_v29  ;;  %v429_v43 = vsel %vm348_vm0, %v261_v30, 0.0 }
  0x25   :  { %403 = vadd.xlane.f32.xlu1 %v402_v56  ;;  %399 = vadd.xlane.f32.xlu0 %v398_v60  ;;  %v265_v44 = vmul.f32 %v1436_v23, %v125_v31  ;;  %v131_v45 = vunpack.c.h.bf16 %v41_v33  ;;  %v129_v46 = vunpack.c.h.bf16 %v40_v37  ;;  %v434_v48 = vadd.f32 %v433_v38, %v262_v35 }
  0x26   :  { %v266_v49 = vmul.f32 %v1434_v22, %v126_v36  ;;  %v430_v51 = vadd.f32 %v429_v43, %v260_v39  ;;  %v441_v52 = vsel %vm348_vm0, %v267_v40, 0.0  ;;  %v264_v53 = vmul.f32 %v1434_v22, %v124_v41  ;;  %v51_v39 = vld [vmem:[%s2117_s0 + $0x118] sm:$0xff] }
  0x27   :  { %v130_v54 = vunpack.c.l.bf16 %v41_v33  ;;  %v437_v55 = vsel %vm348_vm0, %v265_v44, 0.0  ;;  %v271_v56 = vmul.f32 %v1436_v23, %v131_v45  ;;  %v128_v57 = vunpack.c.l.bf16 %v40_v37 }
  0x28   :  { %v135_v58 = vunpack.c.h.bf16 %v43_v47  ;;  %v269_v60 = vmul.f32 %v1436_v23, %v129_v46  ;;  %v133_v61 = vunpack.c.h.bf16 %v42_v50  ;;  %v442_v62 = vadd.f32 %v441_v52, %v266_v49 }
  0x29   :  { %411 = vadd.xlane.f32.xlu1 %v410_v7  ;;  %407 = vadd.xlane.f32.xlu0 %v406_v11  ;;  %v438_v0 = vadd.f32 %v437_v55, %v264_v53  ;;  %v270_v1 = vmul.f32 %v1434_v22, %v130_v54  ;;  %v134_v2 = vunpack.c.l.bf16 %v43_v47  ;;  %v139_v3 = vunpack.c.h.bf16 %v45_v59  ;;  %v53_v55 = vld [vmem:[%s2117_s0 + $0x128] sm:$0xff] }
  0x2a   :  { %v449_v4 = vsel %vm348_vm0, %v271_v56, 0.0  ;;  %v268_v5 = vmul.f32 %v1434_v22, %v128_v57  ;;  %v275_v6 = vmul.f32 %v1436_v23, %v135_v58  ;;  %v132_v7 = vunpack.c.l.bf16 %v42_v50 }
  0x2b   :  { %v445_v9 = vsel %vm348_vm0, %v269_v60, 0.0  ;;  %v273_v10 = vmul.f32 %v1436_v23, %v133_v61  ;;  %v137_v11 = vunpack.c.h.bf16 %v44_v63  ;;  %v138_v12 = vunpack.c.l.bf16 %v45_v59  ;;  %v52_v59 = vld [vmem:[%s2117_s0 + $0x120] sm:$0xff] }
  0x2c   :  { %v450_v14 = vadd.f32 %v449_v4, %v270_v1  ;;  %v274_v15 = vmul.f32 %v1434_v22, %v134_v2  ;;  %v279_v16 = vmul.f32 %v1436_v23, %v139_v3  ;;  %v143_v17 = vunpack.c.h.bf16 %v47_v8 }
  0x2d   :  { %419 = vadd.xlane.f32.xlu1 %v418_v19  ;;  %415 = vadd.xlane.f32.xlu0 %v414_v28  ;;  %v446_v18 = vadd.f32 %v445_v9, %v268_v5  ;;  %v457_v19 = vsel %vm348_vm0, %v275_v6, 0.0  ;;  %v272_v20 = vmul.f32 %v1434_v22, %v132_v7  ;;  %v136_v21 = vunpack.c.l.bf16 %v44_v63  ;;  %v48_v28 = vld [vmem:[%s2117_s0 + $0x100] sm:$0xff]  ;;  %v55_v5 = vld [vmem:[%s2117_s0 + $0x138] sm:$0xff] }
  0x2e   :  { %v453_v25 = vsel %vm348_vm0, %v273_v10, 0.0  ;;  %v277_v26 = vmul.f32 %v1436_v23, %v137_v11  ;;  %v141_v27 = vunpack.c.h.bf16 %v46_v13  ;;  %v278_v29 = vmul.f32 %v1434_v22, %v138_v12 }
  0x2f   :  { %v142_v30 = vunpack.c.l.bf16 %v47_v8  ;;  %v458_v31 = vadd.f32 %v457_v19, %v274_v15  ;;  %v465_v32 = vsel %vm348_vm0, %v279_v16, 0.0  ;;  %v283_v33 = vmul.f32 %v1436_v23, %v143_v17  ;;  %v54_v8 = vld [vmem:[%s2117_s0 + $0x130] sm:$0xff]  ;;  %v57_v17 = vld [vmem:[%s2117_s0 + $0x148] sm:$0xff] }
  0x30   :  { %v454_v35 = vadd.f32 %v453_v25, %v272_v20  ;;  %v276_v36 = vmul.f32 %v1434_v22, %v136_v21  ;;  %v140_v37 = vunpack.c.l.bf16 %v46_v13  ;;  %v145_v38 = vunpack.c.h.bf16 %v48_v28  ;;  %v56_v21 = vld [vmem:[%s2117_s0 + $0x140] sm:$0xff] }
  0x31   :  { %427 = vadd.xlane.f32.xlu1 %v426_v34  ;;  %423 = vadd.xlane.f32.xlu0 %v422_v42  ;;  %v147_v34 = vunpack.c.h.bf16 %v49_v24  ;;  %v461_v40 = vsel %vm348_vm0, %v277_v26, 0.0  ;;  %v281_v41 = vmul.f32 %v1436_v23, %v141_v27  ;;  %v50_v42 = vld [vmem:[%s2117_s0 + $0x110] sm:$0xff]  ;;  %v466_v43 = vadd.f32 %v465_v32, %v278_v29  ;;  %v59_v32 = vld [vmem:[%s2117_s0 + $0x158] sm:$0xff] }
  0x32   :  { %v282_v44 = vmul.f32 %v1434_v22, %v142_v30  ;;  %v146_v45 = vunpack.c.l.bf16 %v49_v24  ;;  %v473_v46 = vsel %vm348_vm0, %v283_v33, 0.0  ;;  %v151_v49 = vunpack.c.h.bf16 %v51_v39 }
  0x33   :  { %v287_v47 = vmul.f32 %v1436_v23, %v147_v34  ;;  %v462_v50 = vadd.f32 %v461_v40, %v276_v36  ;;  %v285_v52 = vmul.f32 %v1436_v23, %v145_v38  ;;  %v149_v53 = vunpack.c.h.bf16 %v50_v42 }
  0x34   :  { %v469_v54 = vsel %vm348_vm0, %v281_v41, 0.0  ;;  %v474_v56 = vadd.f32 %v473_v46, %v282_v44  ;;  %v286_v57 = vmul.f32 %v1434_v22, %v146_v45  ;;  %v150_v58 = vunpack.c.l.bf16 %v51_v39 }
  0x35   :  { %435 = vadd.xlane.f32.xlu1 %v434_v48  ;;  %431 = vadd.xlane.f32.xlu0 %v430_v51  ;;  %v144_v48 = vunpack.c.l.bf16 %v48_v28  ;;  %v280_v51 = vmul.f32 %v1434_v22, %v140_v37  ;;  %v481_v60 = vsel %vm348_vm0, %v287_v47, 0.0  ;;  %v148_v63 = vunpack.c.l.bf16 %v50_v42  ;;  %v58_v37 = vld [vmem:[%s2117_s0 + $0x150] sm:$0xff] }
  0x36   :  { %v477_v1 = vsel %vm348_vm0, %v285_v52, 0.0  ;;  %v289_v2 = vmul.f32 %v1436_v23, %v149_v53  ;;  %v155_v3 = vunpack.c.h.bf16 %v53_v55  ;;  %v153_v4 = vunpack.c.h.bf16 %v52_v59 }
  0x37   :  { %v284_v61 = vmul.f32 %v1434_v22, %v144_v48  ;;  %v482_v6 = vadd.f32 %v481_v60, %v286_v57  ;;  %v290_v7 = vmul.f32 %v1434_v22, %v150_v58  ;;  %v288_v11 = vmul.f32 %v1434_v22, %v148_v63  ;;  %v63_v63 = vld [vmem:[%s2117_s0 + $0x178] sm:$0xff] }
  0x38   :  { %v154_v12 = vunpack.c.l.bf16 %v53_v55  ;;  %v485_v13 = vsel %vm348_vm0, %v289_v2, 0.0  ;;  %v152_v15 = vunpack.c.l.bf16 %v52_v59  ;;  %v159_v16 = vunpack.c.h.bf16 %v55_v5  ;;  %v62_v2 = vld [vmem:[%s2117_s0 + $0x170] sm:$0xff] }
  0x39   :  { %443 = vadd.xlane.f32.xlu1 %v442_v62  ;;  %439 = vadd.xlane.f32.xlu0 %v438_v0  ;;  %v291_v62 = vmul.f32 %v1436_v23, %v151_v49  ;;  %v470_v0 = vadd.f32 %v469_v54, %v280_v51  ;;  %v478_v9 = vadd.f32 %v477_v1, %v284_v61  ;;  %v157_v19 = vunpack.c.h.bf16 %v54_v8  ;;  %v61_v49 = vld [vmem:[%s2117_s0 + $0x168] sm:$0xff] }
  0x3a   :  { %v486_v24 = vadd.f32 %v485_v13, %v288_v11  ;;  %v294_v25 = vmul.f32 %v1434_v22, %v154_v12  ;;  %v158_v26 = vunpack.c.l.bf16 %v55_v5  ;;  %v163_v27 = vunpack.c.h.bf16 %v57_v17  ;;  %v65_v11 = vld [vmem:[%s2117_s0 + $0x188] sm:$0xff] }
  0x3b   :  { %v489_v10 = vsel %vm348_vm0, %v291_v62, 0.0  ;;  %v292_v29 = vmul.f32 %v1434_v22, %v152_v15  ;;  %v299_v30 = vmul.f32 %v1436_v23, %v159_v16  ;;  %v297_v34 = vmul.f32 %v1436_v23, %v157_v19  ;;  %v64_v16 = vld [vmem:[%s2117_s0 + $0x180] sm:$0xff] }
  0x3c   :  { %v490_v20 = vadd.f32 %v489_v10, %v290_v7  ;;  %v162_v36 = vunpack.c.l.bf16 %v57_v17  ;;  %v298_v39 = vmul.f32 %v1434_v22, %v158_v26  ;;  %v303_v40 = vmul.f32 %v1436_v23, %v163_v27 }
  0x3d   :  { %451 = vadd.xlane.f32.xlu1 %v450_v14  ;;  %447 = vadd.xlane.f32.xlu0 %v446_v18  ;;  %v295_v14 = vmul.f32 %v1436_v23, %v155_v3  ;;  %v293_v18 = vmul.f32 %v1436_v23, %v153_v4  ;;  %v167_v41 = vunpack.c.h.bf16 %v59_v32  ;;  %v160_v45 = vunpack.c.l.bf16 %v56_v21 }
  0x3e   :  { %v501_v46 = vsel %vm348_vm0, %v297_v34, 0.0  ;;  %v165_v48 = vunpack.c.h.bf16 %v58_v37  ;;  %v302_v51 = vmul.f32 %v1434_v22, %v162_v36  ;;  %v166_v52 = vunpack.c.l.bf16 %v59_v32  ;;  %v66_v32 = vld [vmem:[%s2117_s0 + $0x190] sm:$0xff] }
  0x3f   :  { %v497_v28 = vsel %vm348_vm0, %v295_v14, 0.0  ;;  %v493_v33 = vsel %vm348_vm0, %v293_v18, 0.0  ;;  %v513_v54 = vsel %vm348_vm0, %v303_v40, 0.0  ;;  %v307_v55 = vmul.f32 %v1436_v23, %v167_v41  ;;  %v69_v40 = vld [vmem:[%s2117_s0 + $0x1a8] sm:$0xff] }
  0x40   :  { %v498_v38 = vadd.f32 %v497_v28, %v294_v25  ;;  %v494_v42 = vadd.f32 %v493_v33, %v292_v29  ;;  %v300_v58 = vmul.f32 %v1434_v22, %v160_v45  ;;  %v171_v59 = vunpack.c.h.bf16 %v61_v49  ;;  %v67_v29 = vld [vmem:[%s2117_s0 + $0x198] sm:$0xff]  ;;  %v68_v45 = vld [vmem:[%s2117_s0 + $0x1a0] sm:$0xff] }
  0x41   :  { %459 = vadd.xlane.f32.xlu1 %v458_v31  ;;  %455 = vadd.xlane.f32.xlu0 %v454_v35  ;;  %v156_v31 = vunpack.c.l.bf16 %v54_v8  ;;  %v161_v35 = vunpack.c.h.bf16 %v56_v21  ;;  %v305_v62 = vmul.f32 %v1436_v23, %v165_v48  ;;  %v306_v1 = vmul.f32 %v1434_v22, %v166_v52 }
  0x42   :  { %v521_v3 = vsel %vm348_vm0, %v307_v55, 0.0  ;;  %v170_v5 = vunpack.c.l.bf16 %v61_v49  ;;  %v311_v8 = vmul.f32 %v1436_v23, %v171_v59  ;;  %v175_v10 = vunpack.c.h.bf16 %v63_v63  ;;  %v70_v59 = vld [vmem:[%s2117_s0 + $0x1b0] sm:$0xff] }
  0x43   :  { %v296_v44 = vmul.f32 %v1434_v22, %v156_v31  ;;  %v301_v47 = vmul.f32 %v1436_v23, %v161_v35  ;;  %v517_v12 = vsel %vm348_vm0, %v305_v62, 0.0  ;;  %v173_v13 = vunpack.c.h.bf16 %v62_v2 }
  0x44   :  { %v522_v14 = vadd.f32 %v521_v3, %v306_v1  ;;  %v174_v15 = vunpack.c.l.bf16 %v63_v63  ;;  %v310_v17 = vmul.f32 %v1434_v22, %v170_v5  ;;  %v172_v19 = vunpack.c.l.bf16 %v62_v2 }
  0x45   :  { %467 = vadd.xlane.f32.xlu1 %v466_v43  ;;  %463 = vadd.xlane.f32.xlu0 %v462_v50  ;;  %v505_v43 = vsel %vm348_vm0, %v299_v30, 0.0  ;;  %v60_v50 = vld [vmem:[%s2117_s0 + $0x160] sm:$0xff]  ;;  %v502_v57 = vadd.f32 %v501_v46, %v296_v44  ;;  %v509_v61 = vsel %vm348_vm0, %v301_v47, 0.0  ;;  %v315_v26 = vmul.f32 %v1436_v23, %v175_v10 }
  0x46   :  { %v506_v53 = vadd.f32 %v505_v43, %v298_v39  ;;  %v169_v60 = vunpack.c.h.bf16 %v60_v50  ;;  %v510_v7 = vadd.f32 %v509_v61, %v300_v58  ;;  %v313_v27 = vmul.f32 %v1436_v23, %v173_v13 }
  0x47   :  { %v177_v28 = vunpack.c.h.bf16 %v64_v16  ;;  %v314_v30 = vmul.f32 %v1434_v22, %v174_v15  ;;  %v178_v31 = vunpack.c.l.bf16 %v65_v11  ;;  %v312_v35 = vmul.f32 %v1434_v22, %v172_v19 }
  0x48   :  { %v183_v39 = vunpack.c.h.bf16 %v67_v29  ;;  %v8_v41 = vstv %s2119_s2  ;;  %v181_v44 = vunpack.c.h.bf16 %v66_v32  ;;  %v182_v47 = vunpack.c.l.bf16 %v67_v29 }
  0x49   :  { %475 = vadd.xlane.f32.xlu1 %v474_v56  ;;  %471 = vadd.xlane.f32.xlu0 %v470_v0  ;;  %v164_v56 = vunpack.c.l.bf16 %v58_v37  ;;  %v514_v0 = vadd.f32 %v513_v54, %v302_v51  ;;  %v537_v37 = vsel %vm348_vm0, %v315_v26, 0.0  ;;  %v317_v43 = vmul.f32 %v1436_v23, %v177_v28  ;;  %9 = vst [vmem:[#allocation2] sm:$0x1] %v8_v41 }
  0x4a   :  { %v318_v46 = vmul.f32 %v1434_v22, %v178_v31  ;;  %v538_v48 = vadd.f32 %v537_v37, %v314_v30  ;;  %v187_v51 = vunpack.c.h.bf16 %v69_v40  ;;  %v323_v54 = vmul.f32 %v1436_v23, %v183_v39  ;;  %v77_v39 = vld [vmem:[%s2117_s0 + $0x1e8] sm:$0xff] }
  0x4b   :  { %v304_v4 = vmul.f32 %v1434_v22, %v164_v56  ;;  %v185_v55 = vunpack.c.h.bf16 %v68_v45  ;;  %v71_v56 = vld [vmem:[%s2117_s0 + $0x1b8] sm:$0xff]  ;;  %v321_v58 = vmul.f32 %v1436_v23, %v181_v44  ;;  %v322_v61 = vmul.f32 %v1434_v22, %v182_v47 }
  0x4c   :  { %v186_v62 = vunpack.c.l.bf16 %v69_v40  ;;  %v184_v1 = vunpack.c.l.bf16 %v68_v45  ;;  %v191_v2 = vunpack.c.h.bf16 %v71_v56  ;;  %v190_v10 = vunpack.c.l.bf16 %v71_v56  ;;  %v76_v40 = vld [vmem:[%s2117_s0 + $0x1e0] sm:$0xff] }
  0x4d   :  { %483 = vadd.xlane.f32.xlu1 %v482_v6  ;;  %479 = vadd.xlane.f32.xlu0 %v478_v9  ;;  %v168_v6 = vunpack.c.l.bf16 %v60_v50  ;;  %v309_v9 = vmul.f32 %v1436_v23, %v169_v60  ;;  %v518_v21 = vadd.f32 %v517_v12, %v304_v4  ;;  %v180_v50 = vunpack.c.l.bf16 %v66_v32  ;;  %v72_v12 = vld [vmem:[%s2117_s0 + $0x1c0] sm:$0xff] }
  0x4e   :  { %v553_v4 = vsel %vm348_vm0, %v323_v54, 0.0  ;;  %v325_v5 = vmul.f32 %v1436_v23, %v185_v55  ;;  %v324_v15 = vmul.f32 %v1434_v22, %v184_v1  ;;  %v192_v32 = vunpack.c.l.bf16 %v72_v12 }
  0x4f   :  { %v308_v18 = vmul.f32 %v1434_v22, %v168_v6  ;;  %v525_v25 = vsel %vm348_vm0, %v309_v9, 0.0  ;;  %v320_v63 = vmul.f32 %v1434_v22, %v180_v50  ;;  %v189_v6 = vunpack.c.h.bf16 %v70_v59 }
  0x50   :  { %v326_v9 = vmul.f32 %v1434_v22, %v186_v62  ;;  %v554_v13 = vadd.f32 %v553_v4, %v322_v61  ;;  %v203_v50 = vunpack.c.h.bf16 %v77_v39  ;;  %v200_v61 = vunpack.c.l.bf16 %v76_v40 }
  0x51   :  { %491 = vadd.xlane.f32.xlu1 %v490_v20  ;;  %487 = vadd.xlane.f32.xlu0 %v486_v24  ;;  %v179_v20 = vunpack.c.h.bf16 %v65_v11  ;;  %v529_v24 = vsel %vm348_vm0, %v311_v8, 0.0  ;;  %v526_v34 = vadd.f32 %v525_v25, %v308_v18  ;;  %v73_v8 = vld [vmem:[%s2117_s0 + $0x1c8] sm:$0xff]  ;;  %v188_v11 = vunpack.c.l.bf16 %v70_v59  ;;  %v74_v25 = vld [vmem:[%s2117_s0 + $0x1d0] sm:$0xff] }
  0x52   :  { %v530_v33 = vadd.f32 %v529_v24, %v310_v17  ;;  %v557_v18 = vsel %vm348_vm0, %v325_v5, 0.0  ;;  %v329_v19 = vmul.f32 %v1436_v23, %v189_v6  ;;  %v75_v24 = vld [vmem:[%s2117_s0 + $0x1d8] sm:$0xff]  ;;  %v194_v31 = vunpack.c.l.bf16 %v73_v8 }
  0x53   :  { %v319_v36 = vmul.f32 %v1436_v23, %v179_v20  ;;  %v195_v20 = vunpack.c.h.bf16 %v73_v8  ;;  %v328_v28 = vmul.f32 %v1434_v22, %v188_v11  ;;  %v558_v29 = vadd.f32 %v557_v18, %v324_v15 }
  0x54   :  { %v196_v44 = vunpack.c.l.bf16 %v74_v25  ;;  %v343_v62 = vmul.f32 %v1436_v23, %v203_v50  ;;  %v340_v6 = vmul.f32 %v1434_v22, %v200_v61 }
  0x55   :  { %499 = vadd.xlane.f32.xlu1 %v498_v38  ;;  %495 = vadd.xlane.f32.xlu0 %v494_v42  ;;  %v176_v38 = vunpack.c.l.bf16 %v64_v16  ;;  %v533_v42 = vsel %vm348_vm0, %v313_v27, 0.0  ;;  %v545_v49 = vsel %vm348_vm0, %v319_v36, 0.0  ;;  %v331_v16 = vmul.f32 %v1436_v23, %v191_v2 }
  0x56   :  { %v534_v52 = vadd.f32 %v533_v42, %v312_v35  ;;  %v546_v60 = vadd.f32 %v545_v49, %v318_v46  ;;  %v330_v27 = vmul.f32 %v1434_v22, %v190_v10  ;;  %v199_v35 = vunpack.c.h.bf16 %v75_v24 }
  0x57   :  { %v569_v30 = vsel %vm348_vm0, %v331_v16, 0.0  ;;  %v197_v36 = vunpack.c.h.bf16 %v74_v25  ;;  %v334_v42 = vmul.f32 %v1434_v22, %v194_v31  ;;  %v332_v46 = vmul.f32 %v1434_v22, %v192_v32 }
  0x58   :  { %v339_v47 = vmul.f32 %v1436_v23, %v199_v35  ;;  %v336_v56 = vmul.f32 %v1434_v22, %v196_v44  ;;  %v593_v8 = vsel %vm348_vm0, %v343_v62, 0.0 }
  0x59   :  { %507 = vadd.xlane.f32.xlu1 %v506_v53  ;;  %503 = vadd.xlane.f32.xlu0 %v502_v57  ;;  %v316_v53 = vmul.f32 %v1434_v22, %v176_v38  ;;  %v541_v57 = vsel %vm348_vm0, %v317_v43, 0.0  ;;  %v570_v38 = vadd.f32 %v569_v30, %v330_v27  ;;  %v198_v43 = vunpack.c.l.bf16 %v75_v24 }
  0x5a   :  { %v585_v59 = vsel %vm348_vm0, %v339_v47, 0.0 }
  0x5b   :  { %v542_v3 = vadd.f32 %v541_v57, %v316_v53  ;;  %v78_v53 = vld [vmem:[%s2117_s0 + $0x1f0] sm:$0xff]  ;;  %v338_v55 = vmul.f32 %v1434_v22, %v198_v43  ;;  %v202_v57 = vunpack.c.l.bf16 %v77_v39 }
  0x5c   :  { %v205_v1 = vunpack.c.h.bf16 %v78_v53 }
  0x5d   :  { %515 = vadd.xlane.f32.xlu1 %v514_v0  ;;  %511 = vadd.xlane.f32.xlu0 %v510_v7  ;;  %v327_v0 = vmul.f32 %v1436_v23, %v187_v51  ;;  %v549_v7 = vsel %vm348_vm0, %v321_v58, 0.0  ;;  %v201_v51 = vunpack.c.h.bf16 %v76_v40  ;;  %v586_v2 = vadd.f32 %v585_v59, %v338_v55 }
  0x5e   :  { %v550_v17 = vadd.f32 %v549_v7, %v320_v63  ;;  %v342_v5 = vmul.f32 %v1434_v22, %v202_v57  ;;  %v204_v7 = vunpack.c.l.bf16 %v78_v53  ;;  %v345_v11 = vmul.f32 %v1436_v23, %v205_v1 }
  0x5f   :  { %v341_v63 = vmul.f32 %v1436_v23, %v201_v51 }
  0x60   :  { %v344_v15 = vmul.f32 %v1434_v22, %v204_v7 }
  0x61   :  { %523 = vadd.xlane.f32.xlu1 %v522_v14  ;;  %519 = vadd.xlane.f32.xlu0 %v518_v21  ;;  %v561_v14 = vsel %vm348_vm0, %v327_v0, 0.0  ;;  %v193_v21 = vunpack.c.h.bf16 %v72_v12 }
  0x62   :  { %v562_v26 = vadd.f32 %v561_v14, %v326_v9  ;;  %v589_v9 = vsel %vm348_vm0, %v341_v63, 0.0 }
  0x63   :  { %v333_v37 = vmul.f32 %v1436_v23, %v193_v21  ;;  %v590_v14 = vadd.f32 %v589_v9, %v340_v6 }
  0x65   :  { %531 = vadd.xlane.f32.xlu1 %v530_v33  ;;  %527 = vadd.xlane.f32.xlu0 %v526_v34  ;;  %v565_v33 = vsel %vm348_vm0, %v329_v19, 0.0  ;;  %v335_v34 = vmul.f32 %v1436_v23, %v195_v20  ;;  %v573_v49 = vsel %vm348_vm0, %v333_v37, 0.0  ;;  %v1801_v20 = vld [vmem:[#allocation2] ss:$0 sm:$0xff] }
  0x66   :  { %v566_v41 = vadd.f32 %v565_v33, %v328_v28  ;;  %v574_v58 = vadd.f32 %v573_v49, %v332_v46 }
  0x67   :  { %v577_v45 = vsel %vm348_vm0, %v335_v34, 0.0 }
  0x68   :  { %v578_v54 = vadd.f32 %v577_v45, %v334_v42 }
  0x69   :  { %539 = vadd.xlane.f32.xlu1 %v538_v48  ;;  %535 = vadd.xlane.f32.xlu0 %v534_v52  ;;  %v337_v48 = vmul.f32 %v1436_v23, %v197_v36  ;;  %v79_v52 = vld [vmem:[%s2117_s0 + $0x1f8] sm:$0xff] }
  0x6a   :  { %v207_v0 = vunpack.c.h.bf16 %v79_v52 }
  0x6c   :  { %v347_v10 = vmul.f32 %v1436_v23, %v207_v0 }
  0x6d   :  { %547 = vadd.xlane.f32.xlu1 %v546_v60  ;;  %543 = vadd.xlane.f32.xlu0 %v542_v3  ;;  %v581_v60 = vsel %vm348_vm0, %v337_v48, 0.0  ;;  %v206_v3 = vunpack.c.l.bf16 %v79_v52 }
  0x6e   :  { %v582_v4 = vadd.f32 %v581_v60, %v336_v56  ;;  %v601_v16 = vsel %vm348_vm0, %v347_v10, 0.0 }
  0x6f   :  { %v346_v12 = vmul.f32 %v1434_v22, %v206_v3 }
  0x71   :  { %555 = vadd.xlane.f32.xlu1 %v554_v13  ;;  %551 = vadd.xlane.f32.xlu0 %v550_v17  ;;  %v594_v13 = vadd.f32 %v593_v8, %v342_v5  ;;  %v597_v17 = vsel %vm348_vm0, %v345_v11, 0.0  ;;  %v602_v18 = vadd.f32 %v601_v16, %v346_v12 }
  0x72   :  { %v598_v19 = vadd.f32 %v597_v17, %v344_v15 }
  0x75   :  { %563 = vadd.xlane.f32.xlu1 %v562_v26  ;;  %559 = vadd.xlane.f32.xlu0 %v558_v29 }
  0x79   :  { %571 = vadd.xlane.f32.xlu1 %v570_v38  ;;  %567 = vadd.xlane.f32.xlu0 %v566_v41 }
  0x7d   :  { %579 = vadd.xlane.f32.xlu1 %v578_v54  ;;  %575 = vadd.xlane.f32.xlu0 %v574_v58 }
  0x81   :  { %587 = vadd.xlane.f32.xlu1 %v586_v2  ;;  %583 = vadd.xlane.f32.xlu0 %v582_v4 }
  0x85   :  { %595 = vadd.xlane.f32.xlu1 %v594_v13  ;;  %591 = vadd.xlane.f32.xlu0 %v590_v14 }
  0x89   :  { %603 = vadd.xlane.f32.xlu1 %v602_v18  ;;  %599 = vadd.xlane.f32.xlu0 %v598_v19 }
  0x96   :  { %v360_v23 = vpop.xlane.xlu1 %359  ;;  %v352_v21 = vpop.xlane.xlu0 %351 }
  0x97   :  { %v614_v24 = vadd.f32 %v1801_v20, %v360_v23  ;;  %v612_v25 = vadd.f32 %v1801_v20, %v352_v21 }
  0x99   :  { %v678_v26 = vsub.f32 0.0, %v614_v24  ;;  %v676_v22 = vsub.f32 0.0, %v612_v25 }
  0x9a   :  { %v364_v27 = vpop.xlane.xlu1 %363  ;;  %v356_v28 = vpop.xlane.xlu0 %355 }
  0x9b   :  { %v744_v29 = vmul.f32 1.442695, %v678_v26  ;;  %v740_v30 = vmul.f32 1.442695, %v676_v22  ;;  %v615_v31 = vadd.f32 %v1801_v20, %v364_v27  ;;  %v613_v32 = vadd.f32 %v1801_v20, %v356_v28 }
  0x9d   :  { %1130 = vpow2.f32 %v744_v29  ;;  %v679_v33 = vsub.f32 0.0, %v615_v31  ;;  %v677_v34 = vsub.f32 0.0, %v613_v32 }
  0x9e   :  { %1132 = vpow2.f32 %v740_v30  ;;  %v372_v35 = vpop.xlane.xlu1 %371  ;;  %v368_v36 = vpop.xlane.xlu0 %367 }
  0x9f   :  { %v746_v37 = vmul.f32 1.442695, %v679_v33  ;;  %v742_v38 = vmul.f32 1.442695, %v677_v34  ;;  %v617_v39 = vadd.f32 %v1801_v20, %v372_v35  ;;  %v616_v40 = vadd.f32 %v1801_v20, %v368_v36 }
  0xa1   :  { %1134 = vpow2.f32 %v746_v37  ;;  %v681_v41 = vsub.f32 0.0, %v617_v39  ;;  %v680_v42 = vsub.f32 0.0, %v616_v40 }
  0xa2   :  { %1136 = vpow2.f32 %v742_v38  ;;  %v380_v43 = vpop.xlane.xlu1 %379  ;;  %v376_v44 = vpop.xlane.xlu0 %375 }
  0xa3   :  { %v750_v45 = vmul.f32 1.442695, %v681_v41  ;;  %v748_v46 = vmul.f32 1.442695, %v680_v42  ;;  %v619_v47 = vadd.f32 %v1801_v20, %v380_v43  ;;  %v618_v48 = vadd.f32 %v1801_v20, %v376_v44 }
  0xa5   :  { %1138 = vpow2.f32 %v750_v45  ;;  %v683_v49 = vsub.f32 0.0, %v619_v47  ;;  %v682_v50 = vsub.f32 0.0, %v618_v48 }
  0xa6   :  { %1140 = vpow2.f32 %v748_v46  ;;  %v388_v51 = vpop.xlane.xlu1 %387  ;;  %v384_v52 = vpop.xlane.xlu0 %383 }
  0xa7   :  { %v754_v53 = vmul.f32 1.442695, %v683_v49  ;;  %v752_v54 = vmul.f32 1.442695, %v682_v50  ;;  %v621_v55 = vadd.f32 %v1801_v20, %v388_v51  ;;  %v620_v56 = vadd.f32 %v1801_v20, %v384_v52 }
  0xa9   :  { %1142 = vpow2.f32 %v754_v53  ;;  %v685_v57 = vsub.f32 0.0, %v621_v55  ;;  %v684_v58 = vsub.f32 0.0, %v620_v56 }
  0xaa   :  { %v1131_v59 = vpop.eup %1130  ;;  %1144 = vpow2.f32 %v752_v54  ;;  %v396_v60 = vpop.xlane.xlu1 %395 }
  0xab   :  { %v392_v61 = vpop.xlane.xlu0 %391  ;;  %v1133_v62 = vpop.eup %1132  ;;  %v870_v63 = vadd.f32 1.0, %v1131_v59  ;;  %v758_v0 = vmul.f32 1.442695, %v685_v57  ;;  %v623_v1 = vadd.f32 %v1801_v20, %v396_v60  ;;  %v756_v3 = vmul.f32 1.442695, %v684_v58 }
  0xac   :  { %v868_v2 = vadd.f32 1.0, %v1133_v62  ;;  %v622_v4 = vadd.f32 %v1801_v20, %v392_v61 }
  0xad   :  { %1146 = vrcp.f32 %v870_v63  ;;  %v687_v5 = vsub.f32 0.0, %v623_v1 }
  0xae   :  { %v1135_v6 = vpop.eup %1134  ;;  %1148 = vrcp.f32 %v868_v2  ;;  %v686_v7 = vsub.f32 0.0, %v622_v4  ;;  %v404_v8 = vpop.xlane.xlu1 %403 }
  0xaf   :  { %v400_v9 = vpop.xlane.xlu0 %399  ;;  %v1137_v10 = vpop.eup %1136  ;;  %v871_v11 = vadd.f32 1.0, %v1135_v6  ;;  %1150 = vpow2.f32 %v758_v0  ;;  %v762_v12 = vmul.f32 1.442695, %v687_v5  ;;  %v625_v13 = vadd.f32 %v1801_v20, %v404_v8 }
  0xb0   :  { %v869_v14 = vadd.f32 1.0, %v1137_v10  ;;  %1152 = vpow2.f32 %v756_v3  ;;  %v760_v15 = vmul.f32 1.442695, %v686_v7  ;;  %v624_v16 = vadd.f32 %v1801_v20, %v400_v9 }
  0xb1   :  { %1154 = vrcp.f32 %v871_v11  ;;  %v689_v17 = vsub.f32 0.0, %v625_v13 }
  0xb2   :  { %v1139_v18 = vpop.eup %1138  ;;  %1156 = vrcp.f32 %v869_v14  ;;  %v688_v19 = vsub.f32 0.0, %v624_v16  ;;  %v412_v23 = vpop.xlane.xlu1 %411 }
  0xb3   :  { %v408_v21 = vpop.xlane.xlu0 %407  ;;  %v1141_v24 = vpop.eup %1140  ;;  %v873_v25 = vadd.f32 1.0, %v1139_v18  ;;  %1158 = vpow2.f32 %v762_v12  ;;  %v766_v26 = vmul.f32 1.442695, %v689_v17  ;;  %v627_v22 = vadd.f32 %v1801_v20, %v412_v23 }
  0xb4   :  { %v872_v27 = vadd.f32 1.0, %v1141_v24  ;;  %1160 = vpow2.f32 %v760_v15  ;;  %v764_v28 = vmul.f32 1.442695, %v688_v19  ;;  %v626_v29 = vadd.f32 %v1801_v20, %v408_v21 }
  0xb5   :  { %1162 = vrcp.f32 %v873_v25  ;;  %v691_v30 = vsub.f32 0.0, %v627_v22 }
  0xb6   :  { %v1143_v31 = vpop.eup %1142  ;;  %1164 = vrcp.f32 %v872_v27  ;;  %v690_v32 = vsub.f32 0.0, %v626_v29  ;;  %v420_v33 = vpop.xlane.xlu1 %419 }
  0xb7   :  { %v416_v34 = vpop.xlane.xlu0 %415  ;;  %v1145_v35 = vpop.eup %1144  ;;  %v875_v36 = vadd.f32 1.0, %v1143_v31  ;;  %1166 = vpow2.f32 %v766_v26  ;;  %v770_v37 = vmul.f32 1.442695, %v691_v30  ;;  %v629_v38 = vadd.f32 %v1801_v20, %v420_v33 }
  0xb8   :  { %v874_v39 = vadd.f32 1.0, %v1145_v35  ;;  %1168 = vpow2.f32 %v764_v28  ;;  %v768_v40 = vmul.f32 1.442695, %v690_v32  ;;  %v628_v41 = vadd.f32 %v1801_v20, %v416_v34 }
  0xb9   :  { %1170 = vrcp.f32 %v875_v36  ;;  %v693_v42 = vsub.f32 0.0, %v629_v38 }
  0xba   :  { %v1147_v43 = vpop.eup %1146  ;;  %1172 = vrcp.f32 %v874_v39  ;;  %v692_v44 = vsub.f32 0.0, %v628_v41  ;;  %v428_v45 = vpop.xlane.xlu1 %427 }
  0xbb   :  { %v424_v46 = vpop.xlane.xlu0 %423  ;;  %v1149_v47 = vpop.eup %1148  ;;  %1063 = vst.msk [vmem:[%s2120_s3 + $0x10] sm:$0xff] %vm1060_vm1, %v1147_v43  ;;  %1174 = vpow2.f32 %v770_v37  ;;  %v774_v48 = vmul.f32 1.442695, %v693_v42  ;;  %v631_v49 = vadd.f32 %v1801_v20, %v428_v45 }
  0xbc   :  { %v630_v50 = vadd.f32 %v1801_v20, %v424_v46  ;;  %v1151_v51 = vpop.eup %1150  ;;  %1061 = vst.msk [vmem:[%s2120_s3] sm:$0xff] %vm1060_vm1, %v1149_v47  ;;  %1176 = vpow2.f32 %v768_v40  ;;  %v772_v52 = vmul.f32 1.442695, %v692_v44 }
  0xbd   :  { %v1153_v53 = vpop.eup %1152  ;;  %v877_v54 = vadd.f32 1.0, %v1151_v51  ;;  %1178 = vpow2.f32 %v774_v48  ;;  %v695_v55 = vsub.f32 0.0, %v631_v49 }
  0xbe   :  { %v694_v56 = vsub.f32 0.0, %v630_v50  ;;  %v1155_v57 = vpop.eup %1154  ;;  %v876_v58 = vadd.f32 1.0, %v1153_v53  ;;  %1180 = vpow2.f32 %v772_v52  ;;  %v436_v59 = vpop.xlane.xlu1 %435 }
  0xbf   :  { %v432_v60 = vpop.xlane.xlu0 %431  ;;  %v1157_v61 = vpop.eup %1156  ;;  %1064 = vst.msk [vmem:[%s2120_s3 + $0x18] sm:$0xff] %vm1060_vm1, %v1155_v57  ;;  %1182 = vrcp.f32 %v877_v54  ;;  %v778_v62 = vmul.f32 1.442695, %v695_v55  ;;  %v633_v0 = vadd.f32 %v1801_v20, %v436_v59 }
  0xc0   :  { %v776_v63 = vmul.f32 1.442695, %v694_v56  ;;  %v1159_v1 = vpop.eup %1158  ;;  %1062 = vst.msk [vmem:[%s2120_s3 + $0x8] sm:$0xff] %vm1060_vm1, %v1157_v61  ;;  %1184 = vrcp.f32 %v876_v58  ;;  %v632_v2 = vadd.f32 %v1801_v20, %v432_v60 }
  0xc1   :  { %v1161_v3 = vpop.eup %1160  ;;  %v879_v4 = vadd.f32 1.0, %v1159_v1  ;;  %1186 = vpow2.f32 %v778_v62  ;;  %v697_v5 = vsub.f32 0.0, %v633_v0 }
  0xc2   :  { %v1163_v6 = vpop.eup %1162  ;;  %v878_v7 = vadd.f32 1.0, %v1161_v3  ;;  %1188 = vpow2.f32 %v776_v63  ;;  %v696_v8 = vsub.f32 0.0, %v632_v2  ;;  %v444_v9 = vpop.xlane.xlu1 %443 }
  0xc3   :  { %v440_v10 = vpop.xlane.xlu0 %439  ;;  %v1165_v11 = vpop.eup %1164  ;;  %1066 = vst.msk [vmem:[%s2120_s3 + $0x28] sm:$0xff] %vm1060_vm1, %v1163_v6  ;;  %1190 = vrcp.f32 %v879_v4  ;;  %v782_v12 = vmul.f32 1.442695, %v697_v5  ;;  %v635_v13 = vadd.f32 %v1801_v20, %v444_v9 }
  0xc4   :  { %v634_v14 = vadd.f32 %v1801_v20, %v440_v10  ;;  %v1167_v15 = vpop.eup %1166  ;;  %1065 = vst.msk [vmem:[%s2120_s3 + $0x20] sm:$0xff] %vm1060_vm1, %v1165_v11  ;;  %1192 = vrcp.f32 %v878_v7  ;;  %v780_v16 = vmul.f32 1.442695, %v696_v8 }
  0xc5   :  { %v1169_v17 = vpop.eup %1168  ;;  %v881_v18 = vadd.f32 1.0, %v1167_v15  ;;  %1194 = vpow2.f32 %v782_v12  ;;  %v699_v19 = vsub.f32 0.0, %v635_v13 }
  0xc6   :  { %v698_v23 = vsub.f32 0.0, %v634_v14  ;;  %v1171_v21 = vpop.eup %1170  ;;  %v880_v24 = vadd.f32 1.0, %v1169_v17  ;;  %1196 = vpow2.f32 %v780_v16  ;;  %v452_v25 = vpop.xlane.xlu1 %451 }
  0xc7   :  { %v448_v26 = vpop.xlane.xlu0 %447  ;;  %v1173_v22 = vpop.eup %1172  ;;  %1068 = vst.msk [vmem:[%s2120_s3 + $0x38] sm:$0xff] %vm1060_vm1, %v1171_v21  ;;  %1198 = vrcp.f32 %v881_v18  ;;  %v786_v27 = vmul.f32 1.442695, %v699_v19  ;;  %v637_v29 = vadd.f32 %v1801_v20, %v452_v25 }
  0xc8   :  { %v784_v28 = vmul.f32 1.442695, %v698_v23  ;;  %v1175_v30 = vpop.eup %1174  ;;  %1067 = vst.msk [vmem:[%s2120_s3 + $0x30] sm:$0xff] %vm1060_vm1, %v1173_v22  ;;  %1200 = vrcp.f32 %v880_v24  ;;  %v636_v31 = vadd.f32 %v1801_v20, %v448_v26 }
  0xc9   :  { %v1177_v32 = vpop.eup %1176  ;;  %v883_v33 = vadd.f32 1.0, %v1175_v30  ;;  %1202 = vpow2.f32 %v786_v27  ;;  %v701_v34 = vsub.f32 0.0, %v637_v29 }
  0xca   :  { %v1179_v35 = vpop.eup %1178  ;;  %v882_v36 = vadd.f32 1.0, %v1177_v32  ;;  %1204 = vpow2.f32 %v784_v28  ;;  %v700_v37 = vsub.f32 0.0, %v636_v31  ;;  %v460_v38 = vpop.xlane.xlu1 %459 }
  0xcb   :  { %v456_v39 = vpop.xlane.xlu0 %455  ;;  %v1181_v40 = vpop.eup %1180  ;;  %1206 = vrcp.f32 %v883_v33  ;;  %v885_v41 = vadd.f32 1.0, %v1179_v35  ;;  %v790_v42 = vmul.f32 1.442695, %v701_v34  ;;  %v639_v43 = vadd.f32 %v1801_v20, %v460_v38 }
  0xcc   :  { %v1183_v44 = vpop.eup %1182  ;;  %1208 = vrcp.f32 %v882_v36  ;;  %v884_v45 = vadd.f32 1.0, %v1181_v40  ;;  %v788_v46 = vmul.f32 1.442695, %v700_v37  ;;  %v638_v47 = vadd.f32 %v1801_v20, %v456_v39 }
  0xcd   :  { %v1185_v48 = vpop.eup %1184  ;;  %1070 = vst.msk [vmem:[%s2120_s3 + $0x48] sm:$0xff] %vm1060_vm1, %v1183_v44  ;;  %1210 = vrcp.f32 %v885_v41  ;;  %v703_v49 = vsub.f32 0.0, %v639_v43 }
  0xce   :  { %v1187_v50 = vpop.eup %1186  ;;  %1069 = vst.msk [vmem:[%s2120_s3 + $0x40] sm:$0xff] %vm1060_vm1, %v1185_v48  ;;  %1212 = vrcp.f32 %v884_v45  ;;  %v702_v51 = vsub.f32 0.0, %v638_v47  ;;  %v468_v52 = vpop.xlane.xlu1 %467 }
  0xcf   :  { %v464_v53 = vpop.xlane.xlu0 %463  ;;  %v1189_v54 = vpop.eup %1188  ;;  %v887_v55 = vadd.f32 1.0, %v1187_v50  ;;  %1214 = vpow2.f32 %v790_v42  ;;  %v794_v56 = vmul.f32 1.442695, %v703_v49  ;;  %v641_v57 = vadd.f32 %v1801_v20, %v468_v52 }
  0xd0   :  { %v1191_v58 = vpop.eup %1190  ;;  %v886_v59 = vadd.f32 1.0, %v1189_v54  ;;  %1216 = vpow2.f32 %v788_v46  ;;  %v792_v60 = vmul.f32 1.442695, %v702_v51  ;;  %v640_v61 = vadd.f32 %v1801_v20, %v464_v53 }
  0xd1   :  { %v1193_v62 = vpop.eup %1192  ;;  %1072 = vst.msk [vmem:[%s2120_s3 + $0x58] sm:$0xff] %vm1060_vm1, %v1191_v58  ;;  %1218 = vrcp.f32 %v887_v55  ;;  %v705_v63 = vsub.f32 0.0, %v641_v57 }
  0xd2   :  { %v1195_v0 = vpop.eup %1194  ;;  %1071 = vst.msk [vmem:[%s2120_s3 + $0x50] sm:$0xff] %vm1060_vm1, %v1193_v62  ;;  %1220 = vrcp.f32 %v886_v59  ;;  %v704_v1 = vsub.f32 0.0, %v640_v61  ;;  %v476_v2 = vpop.xlane.xlu1 %475 }
  0xd3   :  { %v472_v3 = vpop.xlane.xlu0 %471  ;;  %v1197_v4 = vpop.eup %1196  ;;  %v889_v5 = vadd.f32 1.0, %v1195_v0  ;;  %1222 = vpow2.f32 %v794_v56  ;;  %v798_v6 = vmul.f32 1.442695, %v705_v63  ;;  %v643_v7 = vadd.f32 %v1801_v20, %v476_v2 }
  0xd4   :  { %v1199_v8 = vpop.eup %1198  ;;  %v888_v9 = vadd.f32 1.0, %v1197_v4  ;;  %1224 = vpow2.f32 %v792_v60  ;;  %v796_v10 = vmul.f32 1.442695, %v704_v1  ;;  %v642_v11 = vadd.f32 %v1801_v20, %v472_v3 }
  0xd5   :  { %v1201_v12 = vpop.eup %1200  ;;  %1074 = vst.msk [vmem:[%s2120_s3 + $0x68] sm:$0xff] %vm1060_vm1, %v1199_v8  ;;  %1226 = vrcp.f32 %v889_v5  ;;  %v707_v13 = vsub.f32 0.0, %v643_v7 }
  0xd6   :  { %v1203_v14 = vpop.eup %1202  ;;  %1073 = vst.msk [vmem:[%s2120_s3 + $0x60] sm:$0xff] %vm1060_vm1, %v1201_v12  ;;  %1228 = vrcp.f32 %v888_v9  ;;  %v706_v15 = vsub.f32 0.0, %v642_v11  ;;  %v484_v16 = vpop.xlane.xlu1 %483 }
  0xd7   :  { %v480_v17 = vpop.xlane.xlu0 %479  ;;  %v1205_v18 = vpop.eup %1204  ;;  %v891_v19 = vadd.f32 1.0, %v1203_v14  ;;  %1230 = vpow2.f32 %v798_v6  ;;  %v802_v23 = vmul.f32 1.442695, %v707_v13  ;;  %v645_v21 = vadd.f32 %v1801_v20, %v484_v16 }
  0xd8   :  { %v1207_v24 = vpop.eup %1206  ;;  %v890_v25 = vadd.f32 1.0, %v1205_v18  ;;  %1232 = vpow2.f32 %v796_v10  ;;  %v800_v26 = vmul.f32 1.442695, %v706_v15  ;;  %v644_v22 = vadd.f32 %v1801_v20, %v480_v17 }
  0xd9   :  { %v1209_v27 = vpop.eup %1208  ;;  %1076 = vst.msk [vmem:[%s2120_s3 + $0x78] sm:$0xff] %vm1060_vm1, %v1207_v24  ;;  %1234 = vrcp.f32 %v891_v19  ;;  %v709_v28 = vsub.f32 0.0, %v645_v21 }
  0xda   :  { %v1211_v29 = vpop.eup %1210  ;;  %1075 = vst.msk [vmem:[%s2120_s3 + $0x70] sm:$0xff] %vm1060_vm1, %v1209_v27  ;;  %1236 = vrcp.f32 %v890_v25  ;;  %v708_v30 = vsub.f32 0.0, %v644_v22  ;;  %v492_v31 = vpop.xlane.xlu1 %491 }
  0xdb   :  { %v488_v32 = vpop.xlane.xlu0 %487  ;;  %v1213_v33 = vpop.eup %1212  ;;  %1078 = vst.msk [vmem:[%s2120_s3 + $0x88] sm:$0xff] %vm1060_vm1, %v1211_v29  ;;  %1238 = vpow2.f32 %v802_v23  ;;  %v806_v34 = vmul.f32 1.442695, %v709_v28  ;;  %v647_v35 = vadd.f32 %v1801_v20, %v492_v31 }
  0xdc   :  { %v646_v36 = vadd.f32 %v1801_v20, %v488_v32  ;;  %v1215_v37 = vpop.eup %1214  ;;  %1077 = vst.msk [vmem:[%s2120_s3 + $0x80] sm:$0xff] %vm1060_vm1, %v1213_v33  ;;  %1240 = vpow2.f32 %v800_v26  ;;  %v804_v38 = vmul.f32 1.442695, %v708_v30 }
  0xdd   :  { %v1217_v39 = vpop.eup %1216  ;;  %v893_v40 = vadd.f32 1.0, %v1215_v37  ;;  %1242 = vpow2.f32 %v806_v34  ;;  %v711_v41 = vsub.f32 0.0, %v647_v35 }
  0xde   :  { %v710_v42 = vsub.f32 0.0, %v646_v36  ;;  %v1219_v43 = vpop.eup %1218  ;;  %v892_v44 = vadd.f32 1.0, %v1217_v39  ;;  %1244 = vpow2.f32 %v804_v38  ;;  %v500_v45 = vpop.xlane.xlu1 %499 }
  0xdf   :  { %v496_v46 = vpop.xlane.xlu0 %495  ;;  %v1221_v47 = vpop.eup %1220  ;;  %1080 = vst.msk [vmem:[%s2120_s3 + $0x98] sm:$0xff] %vm1060_vm1, %v1219_v43  ;;  %1246 = vrcp.f32 %v893_v40  ;;  %v810_v48 = vmul.f32 1.442695, %v711_v41  ;;  %v649_v50 = vadd.f32 %v1801_v20, %v500_v45 }
  0xe0   :  { %v808_v49 = vmul.f32 1.442695, %v710_v42  ;;  %v1223_v51 = vpop.eup %1222  ;;  %1079 = vst.msk [vmem:[%s2120_s3 + $0x90] sm:$0xff] %vm1060_vm1, %v1221_v47  ;;  %1248 = vrcp.f32 %v892_v44  ;;  %v648_v52 = vadd.f32 %v1801_v20, %v496_v46 }
  0xe1   :  { %v1225_v53 = vpop.eup %1224  ;;  %v895_v54 = vadd.f32 1.0, %v1223_v51  ;;  %1250 = vpow2.f32 %v810_v48  ;;  %v713_v55 = vsub.f32 0.0, %v649_v50 }
  0xe2   :  { %v1227_v56 = vpop.eup %1226  ;;  %v894_v57 = vadd.f32 1.0, %v1225_v53  ;;  %1252 = vpow2.f32 %v808_v49  ;;  %v712_v58 = vsub.f32 0.0, %v648_v52  ;;  %v508_v59 = vpop.xlane.xlu1 %507 }
  0xe3   :  { %v504_v60 = vpop.xlane.xlu0 %503  ;;  %v1229_v61 = vpop.eup %1228  ;;  %1082 = vst.msk [vmem:[%s2120_s3 + $0xa8] sm:$0xff] %vm1060_vm1, %v1227_v56  ;;  %1254 = vrcp.f32 %v895_v54  ;;  %v814_v62 = vmul.f32 1.442695, %v713_v55  ;;  %v651_v63 = vadd.f32 %v1801_v20, %v508_v59 }
  0xe4   :  { %v650_v0 = vadd.f32 %v1801_v20, %v504_v60  ;;  %v1231_v1 = vpop.eup %1230  ;;  %1081 = vst.msk [vmem:[%s2120_s3 + $0xa0] sm:$0xff] %vm1060_vm1, %v1229_v61  ;;  %1256 = vrcp.f32 %v894_v57  ;;  %v812_v2 = vmul.f32 1.442695, %v712_v58 }
  0xe5   :  { %v1233_v3 = vpop.eup %1232  ;;  %v897_v4 = vadd.f32 1.0, %v1231_v1  ;;  %1258 = vpow2.f32 %v814_v62  ;;  %v715_v5 = vsub.f32 0.0, %v651_v63 }
  0xe6   :  { %v714_v6 = vsub.f32 0.0, %v650_v0  ;;  %v1235_v7 = vpop.eup %1234  ;;  %v896_v8 = vadd.f32 1.0, %v1233_v3  ;;  %1260 = vpow2.f32 %v812_v2  ;;  %v516_v9 = vpop.xlane.xlu1 %515 }
  0xe7   :  { %v512_v10 = vpop.xlane.xlu0 %511  ;;  %v1237_v11 = vpop.eup %1236  ;;  %1084 = vst.msk [vmem:[%s2120_s3 + $0xb8] sm:$0xff] %vm1060_vm1, %v1235_v7  ;;  %1262 = vrcp.f32 %v897_v4  ;;  %v818_v12 = vmul.f32 1.442695, %v715_v5  ;;  %v653_v14 = vadd.f32 %v1801_v20, %v516_v9 }
  0xe8   :  { %v816_v13 = vmul.f32 1.442695, %v714_v6  ;;  %v1239_v15 = vpop.eup %1238  ;;  %1083 = vst.msk [vmem:[%s2120_s3 + $0xb0] sm:$0xff] %vm1060_vm1, %v1237_v11  ;;  %1264 = vrcp.f32 %v896_v8  ;;  %v652_v16 = vadd.f32 %v1801_v20, %v512_v10 }
  0xe9   :  { %v1241_v17 = vpop.eup %1240  ;;  %v899_v18 = vadd.f32 1.0, %v1239_v15  ;;  %1266 = vpow2.f32 %v818_v12  ;;  %v717_v19 = vsub.f32 0.0, %v653_v14 }
  0xea   :  { %v1243_v23 = vpop.eup %1242  ;;  %v898_v21 = vadd.f32 1.0, %v1241_v17  ;;  %1268 = vpow2.f32 %v816_v13  ;;  %v716_v24 = vsub.f32 0.0, %v652_v16  ;;  %v524_v25 = vpop.xlane.xlu1 %523 }
  0xeb   :  { %v520_v26 = vpop.xlane.xlu0 %519  ;;  %v1245_v22 = vpop.eup %1244  ;;  %1270 = vrcp.f32 %v899_v18  ;;  %v901_v27 = vadd.f32 1.0, %v1243_v23  ;;  %v822_v28 = vmul.f32 1.442695, %v717_v19  ;;  %v655_v29 = vadd.f32 %v1801_v20, %v524_v25 }
  0xec   :  { %v1247_v30 = vpop.eup %1246  ;;  %1272 = vrcp.f32 %v898_v21  ;;  %v900_v31 = vadd.f32 1.0, %v1245_v22  ;;  %v820_v32 = vmul.f32 1.442695, %v716_v24  ;;  %v654_v33 = vadd.f32 %v1801_v20, %v520_v26 }
  0xed   :  { %v1249_v34 = vpop.eup %1248  ;;  %1086 = vst.msk [vmem:[%s2120_s3 + $0xc8] sm:$0xff] %vm1060_vm1, %v1247_v30  ;;  %1274 = vrcp.f32 %v901_v27  ;;  %v719_v35 = vsub.f32 0.0, %v655_v29 }
  0xee   :  { %v1251_v36 = vpop.eup %1250  ;;  %1085 = vst.msk [vmem:[%s2120_s3 + $0xc0] sm:$0xff] %vm1060_vm1, %v1249_v34  ;;  %1276 = vrcp.f32 %v900_v31  ;;  %v718_v37 = vsub.f32 0.0, %v654_v33  ;;  %v532_v38 = vpop.xlane.xlu1 %531 }
  0xef   :  { %v528_v39 = vpop.xlane.xlu0 %527  ;;  %v1253_v40 = vpop.eup %1252  ;;  %v903_v41 = vadd.f32 1.0, %v1251_v36  ;;  %1278 = vpow2.f32 %v822_v28  ;;  %v826_v42 = vmul.f32 1.442695, %v719_v35  ;;  %v657_v43 = vadd.f32 %v1801_v20, %v532_v38 }
  0xf0   :  { %v1255_v44 = vpop.eup %1254  ;;  %v902_v45 = vadd.f32 1.0, %v1253_v40  ;;  %1280 = vpow2.f32 %v820_v32  ;;  %v824_v46 = vmul.f32 1.442695, %v718_v37  ;;  %v656_v47 = vadd.f32 %v1801_v20, %v528_v39 }
  0xf1   :  { %v1257_v48 = vpop.eup %1256  ;;  %1088 = vst.msk [vmem:[%s2120_s3 + $0xd8] sm:$0xff] %vm1060_vm1, %v1255_v44  ;;  %1282 = vrcp.f32 %v903_v41  ;;  %v721_v49 = vsub.f32 0.0, %v657_v43 }
  0xf2   :  { %v1259_v50 = vpop.eup %1258  ;;  %1087 = vst.msk [vmem:[%s2120_s3 + $0xd0] sm:$0xff] %vm1060_vm1, %v1257_v48  ;;  %1284 = vrcp.f32 %v902_v45  ;;  %v720_v51 = vsub.f32 0.0, %v656_v47  ;;  %v540_v52 = vpop.xlane.xlu1 %539 }
  0xf3   :  { %v536_v53 = vpop.xlane.xlu0 %535  ;;  %v1261_v54 = vpop.eup %1260  ;;  %v905_v55 = vadd.f32 1.0, %v1259_v50  ;;  %1286 = vpow2.f32 %v826_v42  ;;  %v830_v56 = vmul.f32 1.442695, %v721_v49  ;;  %v659_v57 = vadd.f32 %v1801_v20, %v540_v52 }
  0xf4   :  { %v1263_v58 = vpop.eup %1262  ;;  %v904_v59 = vadd.f32 1.0, %v1261_v54  ;;  %1288 = vpow2.f32 %v824_v46  ;;  %v828_v60 = vmul.f32 1.442695, %v720_v51  ;;  %v658_v61 = vadd.f32 %v1801_v20, %v536_v53 }
  0xf5   :  { %v1265_v62 = vpop.eup %1264  ;;  %1090 = vst.msk [vmem:[%s2120_s3 + $0xe8] sm:$0xff] %vm1060_vm1, %v1263_v58  ;;  %1290 = vrcp.f32 %v905_v55  ;;  %v723_v63 = vsub.f32 0.0, %v659_v57 }
  0xf6   :  { %v1267_v0 = vpop.eup %1266  ;;  %1089 = vst.msk [vmem:[%s2120_s3 + $0xe0] sm:$0xff] %vm1060_vm1, %v1265_v62  ;;  %1292 = vrcp.f32 %v904_v59  ;;  %v722_v1 = vsub.f32 0.0, %v658_v61  ;;  %v548_v2 = vpop.xlane.xlu1 %547 }
  0xf7   :  { %v544_v3 = vpop.xlane.xlu0 %543  ;;  %v1269_v4 = vpop.eup %1268  ;;  %v907_v5 = vadd.f32 1.0, %v1267_v0  ;;  %1294 = vpow2.f32 %v830_v56  ;;  %v834_v6 = vmul.f32 1.442695, %v723_v63  ;;  %v661_v7 = vadd.f32 %v1801_v20, %v548_v2 }
  0xf8   :  { %v1271_v8 = vpop.eup %1270  ;;  %v906_v9 = vadd.f32 1.0, %v1269_v4  ;;  %1296 = vpow2.f32 %v828_v60  ;;  %v832_v10 = vmul.f32 1.442695, %v722_v1  ;;  %v660_v11 = vadd.f32 %v1801_v20, %v544_v3 }
  0xf9   :  { %v1273_v12 = vpop.eup %1272  ;;  %1092 = vst.msk [vmem:[%s2120_s3 + $0xf8] sm:$0xff] %vm1060_vm1, %v1271_v8  ;;  %1298 = vrcp.f32 %v907_v5  ;;  %v725_v13 = vsub.f32 0.0, %v661_v7 }
  0xfa   :  { %v1275_v14 = vpop.eup %1274  ;;  %1091 = vst.msk [vmem:[%s2120_s3 + $0xf0] sm:$0xff] %vm1060_vm1, %v1273_v12  ;;  %1300 = vrcp.f32 %v906_v9  ;;  %v724_v15 = vsub.f32 0.0, %v660_v11  ;;  %v556_v16 = vpop.xlane.xlu1 %555 }
  0xfb   :  { %v552_v17 = vpop.xlane.xlu0 %551  ;;  %v1277_v18 = vpop.eup %1276  ;;  %1094 = vst.msk [vmem:[%s2120_s3 + $0x108] sm:$0xff] %vm1060_vm1, %v1275_v14  ;;  %1302 = vpow2.f32 %v834_v6  ;;  %v838_v19 = vmul.f32 1.442695, %v725_v13  ;;  %v663_v23 = vadd.f32 %v1801_v20, %v556_v16  ;;  %v1386_v14 = vld [vmem:[#allocation2] ss:$0 sm:$0xff] }
  0xfc   :  { %v662_v21 = vadd.f32 %v1801_v20, %v552_v17  ;;  %v1279_v24 = vpop.eup %1278  ;;  %1093 = vst.msk [vmem:[%s2120_s3 + $0x100] sm:$0xff] %vm1060_vm1, %v1277_v18  ;;  %1304 = vpow2.f32 %v832_v10  ;;  %v836_v25 = vmul.f32 1.442695, %v724_v15 }
  0xfd   :  { %v1281_v26 = vpop.eup %1280  ;;  %v909_v22 = vadd.f32 1.0, %v1279_v24  ;;  %1306 = vpow2.f32 %v838_v19  ;;  %v727_v27 = vsub.f32 0.0, %v663_v23 }
  0xfe   :  { %v726_v28 = vsub.f32 0.0, %v662_v21  ;;  %v1283_v29 = vpop.eup %1282  ;;  %v908_v30 = vadd.f32 1.0, %v1281_v26  ;;  %1308 = vpow2.f32 %v836_v25  ;;  %v564_v31 = vpop.xlane.xlu1 %563 }
  0xff   :  { %v560_v32 = vpop.xlane.xlu0 %559  ;;  %v1285_v33 = vpop.eup %1284  ;;  %1096 = vst.msk [vmem:[%s2120_s3 + $0x118] sm:$0xff] %vm1060_vm1, %v1283_v29  ;;  %1310 = vrcp.f32 %v909_v22  ;;  %v842_v34 = vmul.f32 1.442695, %v727_v27  ;;  %v665_v36 = vadd.f32 %v1801_v20, %v564_v31 }
 0x100   :  { %v840_v35 = vmul.f32 1.442695, %v726_v28  ;;  %v1287_v37 = vpop.eup %1286  ;;  %1095 = vst.msk [vmem:[%s2120_s3 + $0x110] sm:$0xff] %vm1060_vm1, %v1285_v33  ;;  %1312 = vrcp.f32 %v908_v30  ;;  %v664_v38 = vadd.f32 %v1801_v20, %v560_v32 }
 0x101   :  { %v1289_v39 = vpop.eup %1288  ;;  %v911_v40 = vadd.f32 1.0, %v1287_v37  ;;  %1314 = vpow2.f32 %v842_v34  ;;  %v729_v41 = vsub.f32 0.0, %v665_v36 }
 0x102   :  { %v1291_v42 = vpop.eup %1290  ;;  %v910_v43 = vadd.f32 1.0, %v1289_v39  ;;  %1316 = vpow2.f32 %v840_v35  ;;  %v728_v44 = vsub.f32 0.0, %v664_v38  ;;  %v572_v45 = vpop.xlane.xlu1 %571 }
 0x103   :  { %v568_v46 = vpop.xlane.xlu0 %567  ;;  %v1293_v47 = vpop.eup %1292  ;;  %1098 = vst.msk [vmem:[%s2120_s3 + $0x128] sm:$0xff] %vm1060_vm1, %v1291_v42  ;;  %1318 = vrcp.f32 %v911_v40  ;;  %v846_v48 = vmul.f32 1.442695, %v729_v41  ;;  %v667_v49 = vadd.f32 %v1801_v20, %v572_v45 }
 0x104   :  { %v666_v50 = vadd.f32 %v1801_v20, %v568_v46  ;;  %v1295_v51 = vpop.eup %1294  ;;  %1097 = vst.msk [vmem:[%s2120_s3 + $0x120] sm:$0xff] %vm1060_vm1, %v1293_v47  ;;  %1320 = vrcp.f32 %v910_v43  ;;  %v844_v52 = vmul.f32 1.442695, %v728_v44 }
 0x105   :  { %v1297_v53 = vpop.eup %1296  ;;  %v913_v54 = vadd.f32 1.0, %v1295_v51  ;;  %1322 = vpow2.f32 %v846_v48  ;;  %v731_v55 = vsub.f32 0.0, %v667_v49 }
 0x106   :  { %v730_v56 = vsub.f32 0.0, %v666_v50  ;;  %v1299_v57 = vpop.eup %1298  ;;  %v912_v58 = vadd.f32 1.0, %v1297_v53  ;;  %1324 = vpow2.f32 %v844_v52  ;;  %v580_v59 = vpop.xlane.xlu1 %579 }
 0x107   :  { %v576_v60 = vpop.xlane.xlu0 %575  ;;  %v1301_v61 = vpop.eup %1300  ;;  %1100 = vst.msk [vmem:[%s2120_s3 + $0x138] sm:$0xff] %vm1060_vm1, %v1299_v57  ;;  %1326 = vrcp.f32 %v913_v54  ;;  %v850_v62 = vmul.f32 1.442695, %v731_v55  ;;  %v669_v0 = vadd.f32 %v1801_v20, %v580_v59 }
 0x108   :  { %v848_v63 = vmul.f32 1.442695, %v730_v56  ;;  %v1303_v1 = vpop.eup %1302  ;;  %1099 = vst.msk [vmem:[%s2120_s3 + $0x130] sm:$0xff] %vm1060_vm1, %v1301_v61  ;;  %1328 = vrcp.f32 %v912_v58  ;;  %v668_v2 = vadd.f32 %v1801_v20, %v576_v60 }
 0x109   :  { %v1305_v3 = vpop.eup %1304  ;;  %v915_v4 = vadd.f32 1.0, %v1303_v1  ;;  %1330 = vpow2.f32 %v850_v62  ;;  %v733_v5 = vsub.f32 0.0, %v669_v0 }
 0x10a   :  { %v1307_v6 = vpop.eup %1306  ;;  %v914_v7 = vadd.f32 1.0, %v1305_v3  ;;  %1332 = vpow2.f32 %v848_v63  ;;  %v732_v8 = vsub.f32 0.0, %v668_v2  ;;  %v588_v9 = vpop.xlane.xlu1 %587 }
 0x10b   :  { %v584_v10 = vpop.xlane.xlu0 %583  ;;  %v1309_v11 = vpop.eup %1308  ;;  %1334 = vrcp.f32 %v915_v4  ;;  %v917_v12 = vadd.f32 1.0, %v1307_v6  ;;  %v854_v13 = vmul.f32 1.442695, %v733_v5  ;;  %v671_v15 = vadd.f32 %v1386_v14, %v588_v9 }
 0x10c   :  { %v1311_v16 = vpop.eup %1310  ;;  %1336 = vrcp.f32 %v914_v7  ;;  %v916_v17 = vadd.f32 1.0, %v1309_v11  ;;  %v852_v20 = vmul.f32 1.442695, %v732_v8  ;;  %v670_v18 = vadd.f32 %v1386_v14, %v584_v10 }
 0x10d   :  { %v1313_v19 = vpop.eup %1312  ;;  %1102 = vst.msk [vmem:[%s2120_s3 + $0x148] sm:$0xff] %vm1060_vm1, %v1311_v16  ;;  %1338 = vrcp.f32 %v917_v12  ;;  %v735_v23 = vsub.f32 0.0, %v671_v15 }
 0x10e   :  { %v1315_v21 = vpop.eup %1314  ;;  %1101 = vst.msk [vmem:[%s2120_s3 + $0x140] sm:$0xff] %vm1060_vm1, %v1313_v19  ;;  %1340 = vrcp.f32 %v916_v17  ;;  %v734_v24 = vsub.f32 0.0, %v670_v18  ;;  %v596_v25 = vpop.xlane.xlu1 %595 }
 0x10f   :  { %v592_v26 = vpop.xlane.xlu0 %591  ;;  %v1317_v22 = vpop.eup %1316  ;;  %v919_v27 = vadd.f32 1.0, %v1315_v21  ;;  %1342 = vpow2.f32 %v854_v13  ;;  %v858_v28 = vmul.f32 1.442695, %v735_v23  ;;  %v673_v29 = vadd.f32 %v1386_v14, %v596_v25 }
 0x110   :  { %v1319_v30 = vpop.eup %1318  ;;  %v918_v31 = vadd.f32 1.0, %v1317_v22  ;;  %1344 = vpow2.f32 %v852_v20  ;;  %v856_v32 = vmul.f32 1.442695, %v734_v24  ;;  %v672_v33 = vadd.f32 %v1386_v14, %v592_v26 }
 0x111   :  { %v1321_v34 = vpop.eup %1320  ;;  %1104 = vst.msk [vmem:[%s2120_s3 + $0x158] sm:$0xff] %vm1060_vm1, %v1319_v30  ;;  %1346 = vrcp.f32 %v919_v27  ;;  %v737_v35 = vsub.f32 0.0, %v673_v29 }
 0x112   :  { %v1323_v36 = vpop.eup %1322  ;;  %1103 = vst.msk [vmem:[%s2120_s3 + $0x150] sm:$0xff] %vm1060_vm1, %v1321_v34  ;;  %1348 = vrcp.f32 %v918_v31  ;;  %v736_v37 = vsub.f32 0.0, %v672_v33  ;;  %v604_v38 = vpop.xlane.xlu1 %603 }
 0x113   :  { %v600_v39 = vpop.xlane.xlu0 %599  ;;  %v1325_v40 = vpop.eup %1324  ;;  %v921_v41 = vadd.f32 1.0, %v1323_v36  ;;  %1350 = vpow2.f32 %v858_v28  ;;  %v862_v42 = vmul.f32 1.442695, %v737_v35  ;;  %v675_v43 = vadd.f32 %v1386_v14, %v604_v38 }
 0x114   :  { %v1327_v44 = vpop.eup %1326  ;;  %v920_v45 = vadd.f32 1.0, %v1325_v40  ;;  %1352 = vpow2.f32 %v856_v32  ;;  %v860_v46 = vmul.f32 1.442695, %v736_v37  ;;  %v674_v47 = vadd.f32 %v1386_v14, %v600_v39 }
 0x115   :  { %v1329_v48 = vpop.eup %1328  ;;  %1106 = vst.msk [vmem:[%s2120_s3 + $0x168] sm:$0xff] %vm1060_vm1, %v1327_v44  ;;  %1354 = vrcp.f32 %v921_v41  ;;  %v739_v49 = vsub.f32 0.0, %v675_v43 }
 0x116   :  { %v1331_v50 = vpop.eup %1330  ;;  %1105 = vst.msk [vmem:[%s2120_s3 + $0x160] sm:$0xff] %vm1060_vm1, %v1329_v48  ;;  %1356 = vrcp.f32 %v920_v45  ;;  %v738_v51 = vsub.f32 0.0, %v674_v47 }
 0x117   :  { %v1333_v52 = vpop.eup %1332  ;;  %v923_v53 = vadd.f32 1.0, %v1331_v50  ;;  %1358 = vpow2.f32 %v862_v42  ;;  %v866_v54 = vmul.f32 1.442695, %v739_v49 }
 0x118   :  { %v1335_v55 = vpop.eup %1334  ;;  %v922_v56 = vadd.f32 1.0, %v1333_v52  ;;  %1360 = vpow2.f32 %v860_v46  ;;  %v864_v57 = vmul.f32 1.442695, %v738_v51 }
 0x119   :  { %v1337_v58 = vpop.eup %1336  ;;  %1108 = vst.msk [vmem:[%s2120_s3 + $0x178] sm:$0xff] %vm1060_vm1, %v1335_v55  ;;  %1362 = vrcp.f32 %v923_v53 }
 0x11a   :  { %v1339_v59 = vpop.eup %1338  ;;  %1107 = vst.msk [vmem:[%s2120_s3 + $0x170] sm:$0xff] %vm1060_vm1, %v1337_v58  ;;  %1364 = vrcp.f32 %v922_v56 }
 0x11b   :  { %v1341_v60 = vpop.eup %1340  ;;  %1110 = vst.msk [vmem:[%s2120_s3 + $0x188] sm:$0xff] %vm1060_vm1, %v1339_v59  ;;  %1366 = vpow2.f32 %v866_v54 }
 0x11c   :  { %v1343_v61 = vpop.eup %1342  ;;  %1109 = vst.msk [vmem:[%s2120_s3 + $0x180] sm:$0xff] %vm1060_vm1, %v1341_v60  ;;  %1368 = vpow2.f32 %v864_v57 }
 0x11d   :  { %v1345_v62 = vpop.eup %1344  ;;  %v925_v63 = vadd.f32 1.0, %v1343_v61 }
 0x11e   :  { %v1347_v0 = vpop.eup %1346  ;;  %v924_v1 = vadd.f32 1.0, %v1345_v62 }
 0x11f   :  { %v1349_v2 = vpop.eup %1348  ;;  %1112 = vst.msk [vmem:[%s2120_s3 + $0x198] sm:$0xff] %vm1060_vm1, %v1347_v0  ;;  %1370 = vrcp.f32 %v925_v63 }
 0x120   :  { %v1351_v3 = vpop.eup %1350  ;;  %1111 = vst.msk [vmem:[%s2120_s3 + $0x190] sm:$0xff] %vm1060_vm1, %v1349_v2  ;;  %1372 = vrcp.f32 %v924_v1 }
 0x121   :  { %v1353_v4 = vpop.eup %1352  ;;  %v927_v5 = vadd.f32 1.0, %v1351_v3 }
 0x122   :  { %v1355_v6 = vpop.eup %1354  ;;  %v926_v7 = vadd.f32 1.0, %v1353_v4 }
 0x123   :  { %v1357_v8 = vpop.eup %1356  ;;  %1114 = vst.msk [vmem:[%s2120_s3 + $0x1a8] sm:$0xff] %vm1060_vm1, %v1355_v6  ;;  %1374 = vrcp.f32 %v927_v5 }
 0x124   :  { %v1359_v9 = vpop.eup %1358  ;;  %1113 = vst.msk [vmem:[%s2120_s3 + $0x1a0] sm:$0xff] %vm1060_vm1, %v1357_v8  ;;  %1376 = vrcp.f32 %v926_v7 }
 0x125   :  { %v1361_v10 = vpop.eup %1360  ;;  %v929_v11 = vadd.f32 1.0, %v1359_v9 }
 0x126   :  { %v1363_v12 = vpop.eup %1362  ;;  %v928_v13 = vadd.f32 1.0, %v1361_v10 }
 0x127   :  { %v1365_v14 = vpop.eup %1364  ;;  %1116 = vst.msk [vmem:[%s2120_s3 + $0x1b8] sm:$0xff] %vm1060_vm1, %v1363_v12  ;;  %1378 = vrcp.f32 %v929_v11 }
 0x128   :  { %v1367_v15 = vpop.eup %1366  ;;  %1115 = vst.msk [vmem:[%s2120_s3 + $0x1b0] sm:$0xff] %vm1060_vm1, %v1365_v14  ;;  %1380 = vrcp.f32 %v928_v13 }
 0x129   :  { %v1369_v16 = vpop.eup %1368  ;;  %v931_v17 = vadd.f32 1.0, %v1367_v15 }
 0x12a   :  { %v930_v20 = vadd.f32 1.0, %v1369_v16 }
 0x12b   :  { %1382 = vrcp.f32 %v931_v17 }
 0x12c   :  { %v1371_v18 = vpop.eup %1370  ;;  %1384 = vrcp.f32 %v930_v20 }
 0x12d   :  { %v1373_v19 = vpop.eup %1372  ;;  %1118 = vst.msk [vmem:[%s2120_s3 + $0x1c8] sm:$0xff] %vm1060_vm1, %v1371_v18 }
 0x12e   :  { %1117 = vst.msk [vmem:[%s2120_s3 + $0x1c0] sm:$0xff] %vm1060_vm1, %v1373_v19 }
 0x130   :  { %v1375_v23 = vpop.eup %1374 }
 0x131   :  { %v1377_v21 = vpop.eup %1376  ;;  %1120 = vst.msk [vmem:[%s2120_s3 + $0x1d8] sm:$0xff] %vm1060_vm1, %v1375_v23 }
 0x132   :  { %1119 = vst.msk [vmem:[%s2120_s3 + $0x1d0] sm:$0xff] %vm1060_vm1, %v1377_v21 }
 0x134   :  { %v1379_v24 = vpop.eup %1378 }
 0x135   :  { %v1381_v25 = vpop.eup %1380  ;;  %1122 = vst.msk [vmem:[%s2120_s3 + $0x1e8] sm:$0xff] %vm1060_vm1, %v1379_v24 }
 0x136   :  { %1121 = vst.msk [vmem:[%s2120_s3 + $0x1e0] sm:$0xff] %vm1060_vm1, %v1381_v25 }
 0x138   :  { %v1383_v26 = vpop.eup %1382 }
 0x139   :  { %v1385_v22 = vpop.eup %1384  ;;  %1124 = vst.msk [vmem:[%s2120_s3 + $0x1f8] sm:$0xff] %vm1060_vm1, %v1383_v26 }
 0x13a   :  { %1123 = vst.msk [vmem:[%s2120_s3 + $0x1f0] sm:$0xff] %vm1060_vm1, %v1385_v22 }

</bundles_post_ra>
